<compile_context>
chip_gen: v5e
topology: v5e:2x2
jax: 0.10.0
libtpu: 0.0.40
codegen_flags: <defaults>
</compile_context>

<pallas_src>
import numpy as np
import jax
import jax.numpy as jnp
from jax.experimental import pallas as pl
from jax.experimental.pallas import tpu as pltpu

CROP = 100                      # center_crop target size in the reference module
OUT_SIZE = 128                  # resize target size in the reference module
OUT_FLAT = OUT_SIZE * OUT_SIZE  # 16384
COL_TILE = 2048                 # lane tile of the fused operator / output (divides 16384)


# ----------------------------------------------------------------------------
# Host-side helpers (mirror torchvision / the reference module, all Python)
# ----------------------------------------------------------------------------
def line_intersection(line1, line2):
    xdiff = (line1[0][0] - line1[1][0], line2[0][0] - line2[1][0])
    ydiff = (line1[0][1] - line1[1][1], line2[0][1] - line2[1][1])

    def det(a, b):
        return a[0] * b[1] - a[1] * b[0]

    div = det(xdiff, ydiff)
    d = (det(*line1), det(*line2))
    x = det(d, xdiff) / div
    y = det(d, ydiff) / div
    return [x, y]


def get_params(key, width, height, distortion_scale):
    """Mirror of RandomPerspectiveAboutCenter.get_params (host randomness)."""
    half_height = height // 2
    half_width = width // 2
    dh = int(distortion_scale * half_height)
    dw = int(distortion_scale * half_width)
    ks = jax.random.split(key, 8)

    def ri(k, lo, hi):  # randint in [lo, hi), host-materialized like .item()
        return int(jax.random.randint(k, (), lo, hi))

    topleft = [ri(ks[0], 0, dw + 1), ri(ks[1], 0, dh + 1)]
    topright = [ri(ks[2], width - dw - 1, width), ri(ks[3], 0, dh + 1)]
    botright = [ri(ks[4], width - dw - 1, width), ri(ks[5], height - dh - 1, height)]
    botleft = [ri(ks[6], 0, dw + 1), ri(ks[7], height - dh - 1, height)]
    startpoints = [[0, 0], [width - 1, 0], [width - 1, height - 1], [0, height - 1]]
    endpoints = [topleft, topright, botright, botleft]
    return startpoints, endpoints


def get_perspective_coeffs(startpoints, endpoints):
    """torchvision _get_perspective_coeffs (host, float64 lstsq)."""
    A = np.zeros((8, 8), dtype=np.float64)
    for i, (p1, p2) in enumerate(zip(endpoints, startpoints)):
        A[2 * i] = [p1[0], p1[1], 1, 0, 0, 0, -p2[0] * p1[0], -p2[0] * p1[1]]
        A[2 * i + 1] = [0, 0, 0, p1[0], p1[1], 1, -p2[1] * p1[0], -p2[1] * p1[1]]
    b = np.array(startpoints, dtype=np.float64).reshape(8)
    res = np.linalg.lstsq(A, b, rcond=None)[0]
    return [float(v) for v in res]


def center_crop_offsets(H, W, crop_h, crop_w):
    """(top, left) of the crop window in the unpadded image frame (can be < 0)."""
    pad_top = (crop_h - H) // 2 if crop_h > H else 0
    pad_left = (crop_w - W) // 2 if crop_w > W else 0
    pad_bot = (crop_h - H + 1) // 2 if crop_h > H else 0
    pad_right = (crop_w - W + 1) // 2 if crop_w > W else 0
    H2, W2 = H + pad_top + pad_bot, W + pad_left + pad_right
    top = int(round((H2 - crop_h) / 2.0)) - pad_top
    left = int(round((W2 - crop_w) / 2.0)) - pad_left
    return top, left


def _build_resize_op(out_size, in_size):
    """torch.interpolate bilinear (align_corners=False) as a dense row operator."""
    o = np.arange(out_size, dtype=np.float64)[:, None]
    s = np.arange(in_size, dtype=np.float64)[None, :]
    src = (o + 0.5) * (float(in_size) / float(out_size)) - 0.5
    src = np.maximum(src, 0.0)
    i0 = np.floor(src)
    w1 = src - i0
    i1 = np.minimum(i0 + 1.0, float(in_size - 1))
    R = np.where(s == i0, 1.0 - w1, 0.0) + np.where(s == i1, w1, 0.0)
    return R.astype(np.float32)


_RESIZE_OP = _build_resize_op(OUT_SIZE, CROP)   # (128, 100), static


# ----------------------------------------------------------------------------
# Fused operator construction (plain XLA, traced random params -> no recompile)
# ----------------------------------------------------------------------------
def _build_fused_operator(H, W, params):
    """Returns Kt (H*W, 128*128) and bias_flat (1, 128*128) so that
    out_flat = x_flat @ Kt + bias_flat reproduces
    resize(center_crop(translate(perspective(x)))) exactly as in the reference."""
    a, b, c, d, e, f, g, h = [params[i] for i in range(8)]
    tx, ty, fill = params[8], params[9], params[10]
    ct, cl = center_crop_offsets(H, W, CROP, CROP)
    Hf, Wf = float(H), float(W)

    # crop-output pixel grid -> coords in the translated image -> perspective img
    yo = jax.lax.broadcasted_iota(jnp.float32, (CROP, CROP), 0)
    xo = jax.lax.broadcasted_iota(jnp.float32, (CROP, CROP), 1)
    Ycent = yo + float(ct)
    Xcent = xo + float(cl)
    Yp = Ycent - ty
    Xp = Xcent - tx
    valid = ((Xcent >= 0.0) & (Xcent < Wf) & (Ycent >= 0.0) & (Ycent < Hf) &
             (Xp >= 0.0) & (Xp < Wf) & (Yp >= 0.0) & (Yp < Hf))
    Xs = jnp.where(valid, Xp, 0.0)
    Ys = jnp.where(valid, Yp, 0.0)

    # torchvision perspective grid: pixel centers at +0.5, then -0.5 back
    xph = Xs + 0.5
    yph = Ys + 0.5
    den = g * xph + h * yph + 1.0
    den = jnp.where(jnp.abs(den) < 1e-8, 1e-8, den)        # guard inf/NaN
    sx = (a * xph + b * yph + c) / den - 0.5
    sy = (d * xph + e * yph + f) / den - 0.5
    # clip so floor/int-cast is well-defined; taps outside [0,W)x[0,H) vanish anyway
    sx = jnp.clip(sx, -2.0, Wf + 1.0).reshape(-1)           # (P,) P = CROP*CROP
    sy = jnp.clip(sy, -2.0, Hf + 1.0).reshape(-1)
    ix0 = jnp.floor(sx)
    iy0 = jnp.floor(sy)
    fx = sx - ix0
    fy = sy - iy0
    ix0 = ix0.astype(jnp.int32)                             # integer tap compare
    iy0 = iy0.astype(jnp.int32)

    jj = jnp.arange(W, dtype=jnp.int32)[None, :]
    ii = jnp.arange(H, dtype=jnp.int32)[None, :]
    # zeros-padding bilinear tap weights (grid_sample padding_mode="zeros")
    WX = (jnp.where(ix0[:, None] == jj, (1.0 - fx)[:, None], 0.0)
          + jnp.where(ix0[:, None] == jj - 1, fx[:, None], 0.0))     # (P, W)
    WY = (jnp.where(iy0[:, None] == ii, (1.0 - fy)[:, None], 0.0)
          + jnp.where(iy0[:, None] == ii - 1, fy[:, None], 0.0))     # (P, H)

    xmask = WX.sum(axis=1)
    ymask = WY.sum(axis=1)
    mask = xmask * ymask                 # bilinear sample of an all-ones image
    validf = valid.astype(jnp.float32).reshape(-1)

    # cropped = valid * (acc * mask + (1 - mask) * fill), acc = zero-pad sample
    scale = validf * mask
    M3 = ((WY * scale[:, None])[:, :, None] * WX[:, None, :]
          ).reshape(CROP, CROP, H * W)                               # (100,100,HW)
    bias_img = (validf * (1.0 - mask) * fill).reshape(CROP, CROP)    # (100,100)

    # fold the separable 100->128 resize: out = R @ cropped @ R^T
    R = jnp.asarray(_RESIZE_OP)                                      # (128, 100)
    T1 = jnp.einsum('pu,uvk->pvk', R, M3)                            # (128,100,HW)
    Kf = jnp.einsum('qv,pvk->pqk', R, T1)                            # (128,128,HW)
    Kt = Kf.reshape(OUT_FLAT, H * W).T                               # (HW, 16384)
    bias_flat = (R @ bias_img @ R.T).reshape(1, OUT_FLAT)            # (1, 16384)
    return Kt, bias_flat


# ----------------------------------------------------------------------------
# Pallas kernel: batched fused warp+crop+resize = one MXU matmul + bias
# ----------------------------------------------------------------------------
def _fused_warp_resize_kernel(x_ref, k_ref, b_ref, o_ref):
    # x_ref: (PT, H*W)      all planes of this tile, pixels on the lane axis
    # k_ref: (H*W, COL_TILE) column tile of the fused operator
    # b_ref: (1, COL_TILE)   column tile of the resized fill/bias image
    # o_ref: (PT, COL_TILE)  column tile of the flattened 128x128 outputs
    o_ref[...] = (jnp.dot(x_ref[...], k_ref[...],
                          preferred_element_type=jnp.float32)
                  + b_ref[...]).astype(o_ref.dtype)


def _plane_tile(nc):
    # one fat plane tile when possible; otherwise a multiple-of-8 divisor so the
    # (pt, H*W) block satisfies the (8, 128) tiling rule.
    if nc <= 256:
        return nc
    for t in (256, 128, 64, 32, 16, 8):
        if nc % t == 0:
            return t
    return nc


@jax.jit
def _transform(img, params):
    """Compile-once (per image shape) device path: build operator, run kernel."""
    N, C, H, W = img.shape
    nc, hw = N * C, H * W

    Kt, bias_flat = _build_fused_operator(H, W, params)
    x = img.reshape(nc, hw).astype(jnp.float32)

    pt = _plane_tile(nc)
    grid = (nc // pt, OUT_FLAT // COL_TILE)     # column axis gives >=2 even parallel steps

    out_flat = pl.pallas_call(
        _fused_warp_resize_kernel,
        out_shape=jax.ShapeDtypeStruct((nc, OUT_FLAT), jnp.float32),
        grid=grid,
        in_specs=[
            pl.BlockSpec((pt, hw), lambda i, j: (i, 0)),
            pl.BlockSpec((hw, COL_TILE), lambda i, j: (0, j)),
            pl.BlockSpec((1, COL_TILE), lambda i, j: (0, j)),
        ],
        out_specs=pl.BlockSpec((pt, COL_TILE), lambda i, j: (i, j)),
        compiler_params=pltpu.CompilerParams(
            dimension_semantics=("parallel", "parallel"),
            vmem_limit_bytes=32 * 1024 * 1024),
    )(x, Kt, bias_flat)

    return out_flat.reshape(N, C, OUT_SIZE, OUT_SIZE)


def _reference_apply(img, params):
    """Plain-XLA application of the same operator (test harness for the kernel)."""
    N, C, H, W = img.shape
    Kt, bias_flat = _build_fused_operator(H, W, params)
    x = img.reshape(N * C, H * W).astype(jnp.float32)
    out = x @ Kt + bias_flat
    return out.reshape(N, C, OUT_SIZE, OUT_SIZE)


# ----------------------------------------------------------------------------
# Module-equivalent wrapper (host randomness + host branch, like the reference)
# ----------------------------------------------------------------------------
def random_perspective_about_center(img, key, distortion_scale=0.5, p=0.5, fill=0.0):
    """Forward pass of RandomPerspectiveAboutCenter for an NCHW float image."""
    N, C, H, W = img.shape
    k_coin, k_params = jax.random.split(key)

    # host-side coin flip (mirrors `torch.rand(1) < self.p`); the two branches
    # have different output shapes, so this must stay host-level.
    coin = float(jax.random.uniform(k_coin, ()))
    if not (coin < p):
        return img

    startpoints, endpoints = get_params(k_params, W, H, distortion_scale)
    center = line_intersection([endpoints[0], endpoints[2]],
                               [endpoints[1], endpoints[3]])
    tx = W // 2 - round(center[0])
    ty = H // 2 - round(center[1])
    coeffs = get_perspective_coeffs(startpoints, endpoints)

    # random parameters travel as a traced array -> no per-draw recompilation
    params = jnp.asarray(coeffs + [float(tx), float(ty), float(fill)],
                         dtype=jnp.float32)
    return _transform(img.astype(jnp.float32), params)


if __name__ == "__main__":
    key = jax.random.PRNGKey(0)
    k_img, k_aug = jax.random.split(key)

    N, C, H, W = 2, 4, 16, 16
    img = jax.random.normal(k_img, (N, C, H, W), dtype=jnp.float32)

    # p=1.0 so the transform branch (and thus the Pallas kernel) always runs.
    out = random_perspective_about_center(img, k_aug,
                                          distortion_scale=0.5, p=1.0, fill=0.0)
    out = jax.block_until_ready(out)
    assert out.shape == (N, C, OUT_SIZE, OUT_SIZE)
    assert bool(jnp.all(jnp.isfinite(out)))

    # Pallas kernel vs plain-XLA application of the identical operator.
    startpoints, endpoints = get_params(jax.random.split(k_aug)[1], W, H, 0.5)
    center = line_intersection([endpoints[0], endpoints[2]],
                               [endpoints[1], endpoints[3]])
    params = jnp.asarray(get_perspective_coeffs(startpoints, endpoints)
                         + [float(W // 2 - round(center[0])),
                            float(H // 2 - round(center[1])), 0.0],
                         dtype=jnp.float32)
    ref = jax.block_until_ready(_reference_apply(img.astype(jnp.float32), params))
    got = jax.block_until_ready(_transform(img.astype(jnp.float32), params))
    np.testing.assert_allclose(np.asarray(got), np.asarray(ref), rtol=1e-2, atol=1e-2)

    # a second draw (new randoms, new fill) reuses the same compiled kernel.
    out2 = jax.block_until_ready(
        random_perspective_about_center(img, jax.random.PRNGKey(7),
                                        distortion_scale=0.5, p=1.0, fill=0.3))
    assert out2.shape == (N, C, OUT_SIZE, OUT_SIZE)
    assert bool(jnp.all(jnp.isfinite(out2)))

    print("KERNEL_OK")
</pallas_src>

<mosaic_0001>
module attributes {stable_mosaic.version = 11 : i64} {
  func.func @_fused_warp_resize_kernel(%arg0: i32, %arg1: i32, %arg2: memref<8x256xf32, #tpu.memory_space<vmem>>, %arg3: memref<256x2048xf32, #tpu.memory_space<vmem>>, %arg4: memref<1x2048xf32, #tpu.memory_space<vmem>>, %arg5: memref<8x2048xf32, #tpu.memory_space<vmem>>) attributes {dimension_semantics = [#tpu.dimension_semantics<parallel>, #tpu.dimension_semantics<parallel>], iteration_bounds = array<i64: 1, 8>, scalar_prefetch = 0 : i64, scratch_operands = 0 : i64, tpu.core_type = #tpu.core_type<tc>, window_params = [{transform_indices = @transform_0, window_bounds = array<i64: 8, 256>}, {transform_indices = @transform_1, window_bounds = array<i64: 256, 2048>}, {transform_indices = @transform_2, window_bounds = array<i64: 1, 2048>}, {transform_indices = @transform_3, window_bounds = array<i64: 8, 2048>}]} {
    %c0 = arith.constant 0 : index
    %c0_0 = arith.constant 0 : index
    %0 = vector.load %arg2[%c0, %c0_0] : memref<8x256xf32, #tpu.memory_space<vmem>>, vector<8x256xf32>
    %c0_1 = arith.constant 0 : index
    %c0_2 = arith.constant 0 : index
    %1 = vector.load %arg3[%c0_1, %c0_2] : memref<256x2048xf32, #tpu.memory_space<vmem>>, vector<256x2048xf32>
    %cst = arith.constant dense<0.000000e+00> : vector<8x2048xf32>
    %2 = tpu.matmul %0, %1, %cst {dimension_numbers = #tpu.dot_dimension_numbers<[1], [0], [0], [1], [0, 0, 1, 1], [], []>} : vector<8x256xf32>, vector<256x2048xf32>, vector<8x2048xf32> -> vector<8x2048xf32>
    %c0_3 = arith.constant 0 : index
    %c0_4 = arith.constant 0 : index
    %3 = vector.load %arg4[%c0_3, %c0_4] : memref<1x2048xf32, #tpu.memory_space<vmem>>, vector<1x2048xf32>
    %4 = vector.broadcast %3 : vector<1x2048xf32> to vector<8x2048xf32>
    %5 = arith.addf %2, %4 : vector<8x2048xf32>
    %c0_5 = arith.constant 0 : index
    %c0_6 = arith.constant 0 : index
    %6 = vector.load %arg5[%c0_5, %c0_6] : memref<8x2048xf32, #tpu.memory_space<vmem>>, vector<8x2048xf32>
    tpu.vector_store %arg5[%c0_5, %c0_6], %5 {strides = array<i32>} : memref<8x2048xf32, #tpu.memory_space<vmem>>, vector<8x2048xf32>,
    return
  }
  func.func @transform_0(%arg0: i32, %arg1: i32) -> (i32, i32) {
    %c0_i32 = arith.constant 0 : i32
    %c0_i32_0 = arith.constant 0 : i32
    return %arg0, %c0_i32 : i32, i32
  }
  func.func @transform_1(%arg0: i32, %arg1: i32) -> (i32, i32) {
    %c0_i32 = arith.constant 0 : i32
    %c0_i32_0 = arith.constant 0 : i32
    return %c0_i32, %arg1 : i32, i32
  }
  func.func @transform_2(%arg0: i32, %arg1: i32) -> (i32, i32) {
    %c0_i32 = arith.constant 0 : i32
    %c0_i32_0 = arith.constant 0 : i32
    return %c0_i32, %arg1 : i32, i32
  }
  func.func @transform_3(%arg0: i32, %arg1: i32) -> (i32, i32) {
    %c0_i32 = arith.constant 0 : i32
    return %arg0, %arg1 : i32, i32
  }
}

</mosaic_0001>

<bundles_post_ra>
// kernel: _transform.1
= control target key start
LH: loop header
LB: loop body
LE: loop exit
PB: predicated region body
PF: predicated region fallthrough
CT: control target
= control target key end

     0   :  { %s2711_s12 = smov 0   ;;  %s2713_s13 = smov 0   ;;  %s4419_s0 = inlined_call_operand.vmem [shape: f32[8,256], index: 0, kind: input, shape index: {}]   ;;  %s4420_s1 = inlined_call_operand.vmem [shape: f32[256,16384], index: 1, kind: input, shape index: {}]   ;;  %s4421_s2 = inlined_call_operand.vmem [shape: f32[1,16384], index: 2, kind: input, shape index: {}]   ;;  %s4422_s3 = inlined_call_operand.vmem [shape: f32[8,16384], index: 3, kind: output, shape index: {}]  }
   0x1   :  { %s2715_s14 = smov 0   ;;  %s2717_s15 = smov 0  }
   0x2   :  { %s2719_s16 = smov 0  }
   0x3 LB: > { %s22_s17 = sadd.s32 1, %s2685_s15  ;;  %p65_p1 = scmp.ne.s32.totalorder %s2677_s13, %s2673_s12  ;;  %s2689_s16 = sphi %s2719_s16, %s13_s16   ;;  %s2685_s15 = sphi %s2717_s15, %s4427_s15   ;;  %s2681_s14 = sphi %s2715_s14, %s4426_s14   ;;  %s2677_s13 = sphi %s2713_s13, %s4425_s13   ;;  %s2673_s12 = sphi %s2711_s12, %s4424_s12  }
   0x4   : > { %p23_p0 = scmp.ge.s32.totalorder %s22_s17, 8  ;;  %p66_p2 = scmp.eq.s32.totalorder %s2689_s16, 0 }
   0x5   : > { %s58_s19 = sadd.s32 1, %s2677_s13  ;;  %p2597_p5 = scmp.ge.s32.totalorder %s2689_s16, 8 }
   0x6   : > { %s4429_s17 = smov (%p23_p0, %s22_s17), 0  ;;  %p67_p3 = por %p66_p2, %p65_p1 }
   0x7   : > { %s55_s18 = ssub.s32 %s2685_s15, %s4429_s17  ;;  %153 = sbr.rel (%p2597_p5) target bundleno = 528 (0x210), region = 20 }
   0x8   : > { %p56_p4 = scmp.eq.s32.totalorder %s55_s18, 0 }
   0xa   : > { %s2746_s20 = scalar_select %p56_p4, %s2677_s13, %s58_s19  }
   0xc   : > { %156 = sbr.rel (!%p67_p3) target bundleno = 528 (0x210), region = 24  ;;  %s158_s21 = sand.u32 (%p67_p3), 1, %s2677_s13  }
   0xd   : > { %s2608_s22 = sshll.u32 (%p67_p3), %s2685_s15, 7  ;;  %s2598_s23 = sshll.u32 (%p67_p3), %s158_s21, 12 }
   0xe   : > { %s2754_s26 = scalar_lea.vmem (%p67_p3), %s4420_s1, %s2608_s22  ;;  %s2759_s27 = scalar_lea.vmem (%p67_p3), [#allocation2], %s2598_s23 }
   0xf   : > { %v176_v0 = vld [vmem:[%s2754_s26] sm:$0xff] (%p67_p3)  ;;  %v178_v1 = vld [vmem:[%s2754_s26 + $0x8] sm:$0xff] (%p67_p3)  ;;  %v180_v2 = vld [vmem:[%s2754_s26 + $0x10] sm:$0xff] (%p67_p3) }
  0x10   : > { %177 = vst [vmem:[%s2759_s27] sm:$0xff] (%p67_p3), %v176_v0  ;;  %v182_v3 = vld [vmem:[%s2754_s26 + $0x18] sm:$0xff] (%p67_p3)  ;;  %v184_v4 = vld [vmem:[%s2754_s26 + $0x20] sm:$0xff] (%p67_p3)  ;;  %v186_v5 = vld [vmem:[%s2754_s26 + $0x28] sm:$0xff] (%p67_p3) }
  0x11   : > { %179 = vst [vmem:[%s2759_s27 + $0x8] sm:$0xff] %v178_v1  ;;  %v188_v6 = vld [vmem:[%s2754_s26 + $0x30] sm:$0xff]  ;;  %v190_v7 = vld [vmem:[%s2754_s26 + $0x38] sm:$0xff]  ;;  %v192_v8 = vld [vmem:[%s2754_s26 + $0x40] sm:$0xff] }
  0x12   : > { %181 = vst [vmem:[%s2759_s27 + $0x10] sm:$0xff] %v180_v2  ;;  %v194_v9 = vld [vmem:[%s2754_s26 + $0x48] sm:$0xff]  ;;  %v196_v10 = vld [vmem:[%s2754_s26 + $0x50] sm:$0xff]  ;;  %v198_v11 = vld [vmem:[%s2754_s26 + $0x58] sm:$0xff] }
  0x13   : > { %183 = vst [vmem:[%s2759_s27 + $0x18] sm:$0xff] %v182_v3  ;;  %v200_v12 = vld [vmem:[%s2754_s26 + $0x60] sm:$0xff]  ;;  %v202_v13 = vld [vmem:[%s2754_s26 + $0x68] sm:$0xff]  ;;  %v204_v14 = vld [vmem:[%s2754_s26 + $0x70] sm:$0xff] }
  0x14   : > { %185 = vst [vmem:[%s2759_s27 + $0x20] sm:$0xff] %v184_v4  ;;  %v206_v15 = vld [vmem:[%s2754_s26 + $0x78] sm:$0xff]  ;;  %v208_v16 = vld [vmem:[%s2754_s26 + $0x400] sm:$0xff]  ;;  %v210_v17 = vld [vmem:[%s2754_s26 + $0x408] sm:$0xff] }
  0x15   : > { %187 = vst [vmem:[%s2759_s27 + $0x28] sm:$0xff] %v186_v5  ;;  %v212_v18 = vld [vmem:[%s2754_s26 + $0x410] sm:$0xff]  ;;  %v214_v19 = vld [vmem:[%s2754_s26 + $0x418] sm:$0xff]  ;;  %v216_v20 = vld [vmem:[%s2754_s26 + $0x420] sm:$0xff] }
  0x16   : > { %189 = vst [vmem:[%s2759_s27 + $0x30] sm:$0xff] %v188_v6  ;;  %v218_v21 = vld [vmem:[%s2754_s26 + $0x428] sm:$0xff]  ;;  %v220_v22 = vld [vmem:[%s2754_s26 + $0x430] sm:$0xff]  ;;  %v222_v23 = vld [vmem:[%s2754_s26 + $0x438] sm:$0xff] }
  0x17   : > { %191 = vst [vmem:[%s2759_s27 + $0x38] sm:$0xff] %v190_v7  ;;  %v224_v24 = vld [vmem:[%s2754_s26 + $0x440] sm:$0xff]  ;;  %v226_v25 = vld [vmem:[%s2754_s26 + $0x448] sm:$0xff]  ;;  %v228_v26 = vld [vmem:[%s2754_s26 + $0x450] sm:$0xff] }
  0x18   : > { %193 = vst [vmem:[%s2759_s27 + $0x40] sm:$0xff] %v192_v8  ;;  %v230_v27 = vld [vmem:[%s2754_s26 + $0x458] sm:$0xff]  ;;  %v232_v28 = vld [vmem:[%s2754_s26 + $0x460] sm:$0xff]  ;;  %v234_v29 = vld [vmem:[%s2754_s26 + $0x468] sm:$0xff] }
  0x19   : > { %195 = vst [vmem:[%s2759_s27 + $0x48] sm:$0xff] %v194_v9  ;;  %v236_v30 = vld [vmem:[%s2754_s26 + $0x470] sm:$0xff]  ;;  %v238_v31 = vld [vmem:[%s2754_s26 + $0x478] sm:$0xff]  ;;  %v240_v32 = vld [vmem:[%s2754_s26 + $0x800] sm:$0xff] }
  0x1a   : > { %197 = vst [vmem:[%s2759_s27 + $0x50] sm:$0xff] %v196_v10  ;;  %v242_v33 = vld [vmem:[%s2754_s26 + $0x808] sm:$0xff]  ;;  %v244_v34 = vld [vmem:[%s2754_s26 + $0x810] sm:$0xff]  ;;  %v246_v35 = vld [vmem:[%s2754_s26 + $0x818] sm:$0xff] }
  0x1b   : > { %199 = vst [vmem:[%s2759_s27 + $0x58] sm:$0xff] %v198_v11  ;;  %v248_v36 = vld [vmem:[%s2754_s26 + $0x820] sm:$0xff]  ;;  %v250_v37 = vld [vmem:[%s2754_s26 + $0x828] sm:$0xff]  ;;  %v252_v38 = vld [vmem:[%s2754_s26 + $0x830] sm:$0xff] }
  0x1c   : > { %201 = vst [vmem:[%s2759_s27 + $0x60] sm:$0xff] %v200_v12  ;;  %v254_v39 = vld [vmem:[%s2754_s26 + $0x838] sm:$0xff]  ;;  %v256_v40 = vld [vmem:[%s2754_s26 + $0x840] sm:$0xff]  ;;  %v258_v41 = vld [vmem:[%s2754_s26 + $0x848] sm:$0xff] }
  0x1d   : > { %203 = vst [vmem:[%s2759_s27 + $0x68] sm:$0xff] %v202_v13  ;;  %v260_v42 = vld [vmem:[%s2754_s26 + $0x850] sm:$0xff]  ;;  %v262_v43 = vld [vmem:[%s2754_s26 + $0x858] sm:$0xff]  ;;  %v264_v44 = vld [vmem:[%s2754_s26 + $0x860] sm:$0xff] }
  0x1e   : > { %205 = vst [vmem:[%s2759_s27 + $0x70] sm:$0xff] %v204_v14  ;;  %v266_v45 = vld [vmem:[%s2754_s26 + $0x868] sm:$0xff]  ;;  %v268_v46 = vld [vmem:[%s2754_s26 + $0x870] sm:$0xff]  ;;  %v270_v47 = vld [vmem:[%s2754_s26 + $0x878] sm:$0xff] }
  0x1f   : > { %207 = vst [vmem:[%s2759_s27 + $0x78] sm:$0xff] %v206_v15  ;;  %v272_v48 = vld [vmem:[%s2754_s26 + $0xc00] sm:$0xff]  ;;  %v274_v49 = vld [vmem:[%s2754_s26 + $0xc08] sm:$0xff]  ;;  %v276_v50 = vld [vmem:[%s2754_s26 + $0xc10] sm:$0xff] }
  0x20   : > { %209 = vst [vmem:[%s2759_s27 + $0x80] sm:$0xff] %v208_v16  ;;  %v278_v51 = vld [vmem:[%s2754_s26 + $0xc18] sm:$0xff]  ;;  %v280_v52 = vld [vmem:[%s2754_s26 + $0xc20] sm:$0xff]  ;;  %v282_v53 = vld [vmem:[%s2754_s26 + $0xc28] sm:$0xff] }
  0x21   : > { %211 = vst [vmem:[%s2759_s27 + $0x88] sm:$0xff] %v210_v17  ;;  %v284_v54 = vld [vmem:[%s2754_s26 + $0xc30] sm:$0xff]  ;;  %v286_v55 = vld [vmem:[%s2754_s26 + $0xc38] sm:$0xff]  ;;  %v288_v56 = vld [vmem:[%s2754_s26 + $0xc40] sm:$0xff] }
  0x22   : > { %213 = vst [vmem:[%s2759_s27 + $0x90] sm:$0xff] %v212_v18  ;;  %v290_v57 = vld [vmem:[%s2754_s26 + $0xc48] sm:$0xff]  ;;  %v292_v58 = vld [vmem:[%s2754_s26 + $0xc50] sm:$0xff]  ;;  %v294_v59 = vld [vmem:[%s2754_s26 + $0xc58] sm:$0xff] }
  0x23   : > { %215 = vst [vmem:[%s2759_s27 + $0x98] sm:$0xff] %v214_v19  ;;  %v296_v60 = vld [vmem:[%s2754_s26 + $0xc60] sm:$0xff]  ;;  %v298_v61 = vld [vmem:[%s2754_s26 + $0xc68] sm:$0xff]  ;;  %v300_v62 = vld [vmem:[%s2754_s26 + $0xc70] sm:$0xff] }
  0x24   : > { %217 = vst [vmem:[%s2759_s27 + $0xa0] sm:$0xff] %v216_v20  ;;  %v302_v63 = vld [vmem:[%s2754_s26 + $0xc78] sm:$0xff]  ;;  %v304_v0 = vld [vmem:[%s2754_s26 + $0x1000] sm:$0xff]  ;;  %v306_v1 = vld [vmem:[%s2754_s26 + $0x1008] sm:$0xff] }
  0x25   : > { %219 = vst [vmem:[%s2759_s27 + $0xa8] sm:$0xff] %v218_v21  ;;  %v308_v2 = vld [vmem:[%s2754_s26 + $0x1010] sm:$0xff]  ;;  %v310_v3 = vld [vmem:[%s2754_s26 + $0x1018] sm:$0xff]  ;;  %v312_v4 = vld [vmem:[%s2754_s26 + $0x1020] sm:$0xff] }
  0x26   : > { %221 = vst [vmem:[%s2759_s27 + $0xb0] sm:$0xff] %v220_v22  ;;  %v314_v5 = vld [vmem:[%s2754_s26 + $0x1028] sm:$0xff]  ;;  %v316_v6 = vld [vmem:[%s2754_s26 + $0x1030] sm:$0xff]  ;;  %v318_v7 = vld [vmem:[%s2754_s26 + $0x1038] sm:$0xff] }
  0x27   : > { %223 = vst [vmem:[%s2759_s27 + $0xb8] sm:$0xff] %v222_v23  ;;  %v320_v8 = vld [vmem:[%s2754_s26 + $0x1040] sm:$0xff]  ;;  %v322_v9 = vld [vmem:[%s2754_s26 + $0x1048] sm:$0xff]  ;;  %v324_v10 = vld [vmem:[%s2754_s26 + $0x1050] sm:$0xff] }
  0x28   : > { %225 = vst [vmem:[%s2759_s27 + $0xc0] sm:$0xff] %v224_v24  ;;  %v326_v11 = vld [vmem:[%s2754_s26 + $0x1058] sm:$0xff]  ;;  %v328_v12 = vld [vmem:[%s2754_s26 + $0x1060] sm:$0xff]  ;;  %v330_v13 = vld [vmem:[%s2754_s26 + $0x1068] sm:$0xff] }
  0x29   : > { %227 = vst [vmem:[%s2759_s27 + $0xc8] sm:$0xff] %v226_v25  ;;  %v332_v14 = vld [vmem:[%s2754_s26 + $0x1070] sm:$0xff]  ;;  %v334_v15 = vld [vmem:[%s2754_s26 + $0x1078] sm:$0xff]  ;;  %v336_v16 = vld [vmem:[%s2754_s26 + $0x1400] sm:$0xff] }
  0x2a   : > { %229 = vst [vmem:[%s2759_s27 + $0xd0] sm:$0xff] %v228_v26  ;;  %v338_v17 = vld [vmem:[%s2754_s26 + $0x1408] sm:$0xff]  ;;  %v340_v18 = vld [vmem:[%s2754_s26 + $0x1410] sm:$0xff]  ;;  %v342_v19 = vld [vmem:[%s2754_s26 + $0x1418] sm:$0xff] }
  0x2b   : > { %231 = vst [vmem:[%s2759_s27 + $0xd8] sm:$0xff] %v230_v27  ;;  %v344_v20 = vld [vmem:[%s2754_s26 + $0x1420] sm:$0xff]  ;;  %v346_v21 = vld [vmem:[%s2754_s26 + $0x1428] sm:$0xff]  ;;  %v348_v22 = vld [vmem:[%s2754_s26 + $0x1430] sm:$0xff] }
  0x2c   : > { %233 = vst [vmem:[%s2759_s27 + $0xe0] sm:$0xff] %v232_v28  ;;  %v350_v23 = vld [vmem:[%s2754_s26 + $0x1438] sm:$0xff]  ;;  %v352_v24 = vld [vmem:[%s2754_s26 + $0x1440] sm:$0xff]  ;;  %v354_v25 = vld [vmem:[%s2754_s26 + $0x1448] sm:$0xff] }
  0x2d   : > { %235 = vst [vmem:[%s2759_s27 + $0xe8] sm:$0xff] %v234_v29  ;;  %v356_v26 = vld [vmem:[%s2754_s26 + $0x1450] sm:$0xff]  ;;  %v358_v27 = vld [vmem:[%s2754_s26 + $0x1458] sm:$0xff]  ;;  %v360_v28 = vld [vmem:[%s2754_s26 + $0x1460] sm:$0xff] }
  0x2e   : > { %237 = vst [vmem:[%s2759_s27 + $0xf0] sm:$0xff] %v236_v30  ;;  %v362_v29 = vld [vmem:[%s2754_s26 + $0x1468] sm:$0xff]  ;;  %v364_v30 = vld [vmem:[%s2754_s26 + $0x1470] sm:$0xff] }
  0x2f   : > { %239 = vst [vmem:[%s2759_s27 + $0xf8] sm:$0xff] %v238_v31  ;;  %v366_v31 = vld [vmem:[%s2754_s26 + $0x1478] sm:$0xff] }
  0x30   : > { %241 = vst [vmem:[%s2759_s27 + $0x100] sm:$0xff] %v240_v32  ;;  %v368_v32 = vld [vmem:[%s2754_s26 + $0x1800] sm:$0xff] }
  0x31   : > { %243 = vst [vmem:[%s2759_s27 + $0x108] sm:$0xff] %v242_v33  ;;  %v370_v33 = vld [vmem:[%s2754_s26 + $0x1808] sm:$0xff] }
  0x32   : > { %245 = vst [vmem:[%s2759_s27 + $0x110] sm:$0xff] %v244_v34  ;;  %v372_v34 = vld [vmem:[%s2754_s26 + $0x1810] sm:$0xff] }
  0x33   : > { %247 = vst [vmem:[%s2759_s27 + $0x118] sm:$0xff] %v246_v35  ;;  %v374_v35 = vld [vmem:[%s2754_s26 + $0x1818] sm:$0xff] }
  0x34   : > { %249 = vst [vmem:[%s2759_s27 + $0x120] sm:$0xff] %v248_v36  ;;  %v376_v36 = vld [vmem:[%s2754_s26 + $0x1820] sm:$0xff] }
  0x35   : > { %251 = vst [vmem:[%s2759_s27 + $0x128] sm:$0xff] %v250_v37  ;;  %v378_v37 = vld [vmem:[%s2754_s26 + $0x1828] sm:$0xff] }
  0x36   : > { %253 = vst [vmem:[%s2759_s27 + $0x130] sm:$0xff] %v252_v38  ;;  %v380_v38 = vld [vmem:[%s2754_s26 + $0x1830] sm:$0xff] }
  0x37   : > { %255 = vst [vmem:[%s2759_s27 + $0x138] sm:$0xff] %v254_v39  ;;  %v382_v39 = vld [vmem:[%s2754_s26 + $0x1838] sm:$0xff] }
  0x38   : > { %257 = vst [vmem:[%s2759_s27 + $0x140] sm:$0xff] %v256_v40  ;;  %v384_v40 = vld [vmem:[%s2754_s26 + $0x1840] sm:$0xff] }
  0x39   : > { %259 = vst [vmem:[%s2759_s27 + $0x148] sm:$0xff] %v258_v41  ;;  %v386_v41 = vld [vmem:[%s2754_s26 + $0x1848] sm:$0xff] }
  0x3a   : > { %261 = vst [vmem:[%s2759_s27 + $0x150] sm:$0xff] %v260_v42  ;;  %v388_v42 = vld [vmem:[%s2754_s26 + $0x1850] sm:$0xff] }
  0x3b   : > { %263 = vst [vmem:[%s2759_s27 + $0x158] sm:$0xff] %v262_v43  ;;  %v390_v43 = vld [vmem:[%s2754_s26 + $0x1858] sm:$0xff] }
  0x3c   : > { %265 = vst [vmem:[%s2759_s27 + $0x160] sm:$0xff] %v264_v44  ;;  %v392_v44 = vld [vmem:[%s2754_s26 + $0x1860] sm:$0xff] }
  0x3d   : > { %267 = vst [vmem:[%s2759_s27 + $0x168] sm:$0xff] %v266_v45  ;;  %v394_v45 = vld [vmem:[%s2754_s26 + $0x1868] sm:$0xff] }
  0x3e   : > { %269 = vst [vmem:[%s2759_s27 + $0x170] sm:$0xff] %v268_v46  ;;  %v396_v46 = vld [vmem:[%s2754_s26 + $0x1870] sm:$0xff] }
  0x3f   : > { %271 = vst [vmem:[%s2759_s27 + $0x178] sm:$0xff] %v270_v47  ;;  %v398_v47 = vld [vmem:[%s2754_s26 + $0x1878] sm:$0xff] }
  0x40   : > { %273 = vst [vmem:[%s2759_s27 + $0x180] sm:$0xff] %v272_v48  ;;  %v400_v48 = vld [vmem:[%s2754_s26 + $0x1c00] sm:$0xff] }
  0x41   : > { %275 = vst [vmem:[%s2759_s27 + $0x188] sm:$0xff] %v274_v49  ;;  %v402_v49 = vld [vmem:[%s2754_s26 + $0x1c08] sm:$0xff] }
  0x42   : > { %277 = vst [vmem:[%s2759_s27 + $0x190] sm:$0xff] %v276_v50  ;;  %v404_v50 = vld [vmem:[%s2754_s26 + $0x1c10] sm:$0xff] }
  0x43   : > { %279 = vst [vmem:[%s2759_s27 + $0x198] sm:$0xff] %v278_v51  ;;  %v406_v51 = vld [vmem:[%s2754_s26 + $0x1c18] sm:$0xff] }
  0x44   : > { %281 = vst [vmem:[%s2759_s27 + $0x1a0] sm:$0xff] %v280_v52  ;;  %v408_v52 = vld [vmem:[%s2754_s26 + $0x1c20] sm:$0xff] }
  0x45   : > { %283 = vst [vmem:[%s2759_s27 + $0x1a8] sm:$0xff] %v282_v53  ;;  %v410_v53 = vld [vmem:[%s2754_s26 + $0x1c28] sm:$0xff] }
  0x46   : > { %285 = vst [vmem:[%s2759_s27 + $0x1b0] sm:$0xff] %v284_v54  ;;  %v412_v54 = vld [vmem:[%s2754_s26 + $0x1c30] sm:$0xff] }
  0x47   : > { %287 = vst [vmem:[%s2759_s27 + $0x1b8] sm:$0xff] %v286_v55  ;;  %v414_v55 = vld [vmem:[%s2754_s26 + $0x1c38] sm:$0xff] }
  0x48   : > { %289 = vst [vmem:[%s2759_s27 + $0x1c0] sm:$0xff] %v288_v56  ;;  %v416_v56 = vld [vmem:[%s2754_s26 + $0x1c40] sm:$0xff] }
  0x49   : > { %291 = vst [vmem:[%s2759_s27 + $0x1c8] sm:$0xff] %v290_v57  ;;  %v418_v57 = vld [vmem:[%s2754_s26 + $0x1c48] sm:$0xff] }
  0x4a   : > { %293 = vst [vmem:[%s2759_s27 + $0x1d0] sm:$0xff] %v292_v58  ;;  %v420_v58 = vld [vmem:[%s2754_s26 + $0x1c50] sm:$0xff] }
  0x4b   : > { %295 = vst [vmem:[%s2759_s27 + $0x1d8] sm:$0xff] %v294_v59  ;;  %v422_v59 = vld [vmem:[%s2754_s26 + $0x1c58] sm:$0xff] }
  0x4c   : > { %297 = vst [vmem:[%s2759_s27 + $0x1e0] sm:$0xff] %v296_v60  ;;  %v424_v60 = vld [vmem:[%s2754_s26 + $0x1c60] sm:$0xff] }
  0x4d   : > { %299 = vst [vmem:[%s2759_s27 + $0x1e8] sm:$0xff] %v298_v61  ;;  %v426_v61 = vld [vmem:[%s2754_s26 + $0x1c68] sm:$0xff] }
  0x4e   : > { %301 = vst [vmem:[%s2759_s27 + $0x1f0] sm:$0xff] %v300_v62  ;;  %v428_v62 = vld [vmem:[%s2754_s26 + $0x1c70] sm:$0xff] }
  0x4f   : > { %303 = vst [vmem:[%s2759_s27 + $0x1f8] sm:$0xff] %v302_v63  ;;  %v430_v63 = vld [vmem:[%s2754_s26 + $0x1c78] sm:$0xff] }
  0x50   : > { %305 = vst [vmem:[%s2759_s27 + $0x200] sm:$0xff] %v304_v0  ;;  %v432_v0 = vld [vmem:[%s2754_s26 + $0x2000] sm:$0xff] }
  0x51   : > { %307 = vst [vmem:[%s2759_s27 + $0x208] sm:$0xff] %v306_v1  ;;  %v434_v1 = vld [vmem:[%s2754_s26 + $0x2008] sm:$0xff] }
  0x52   : > { %309 = vst [vmem:[%s2759_s27 + $0x210] sm:$0xff] %v308_v2  ;;  %v436_v2 = vld [vmem:[%s2754_s26 + $0x2010] sm:$0xff] }
  0x53   : > { %311 = vst [vmem:[%s2759_s27 + $0x218] sm:$0xff] %v310_v3  ;;  %v438_v3 = vld [vmem:[%s2754_s26 + $0x2018] sm:$0xff] }
  0x54   : > { %313 = vst [vmem:[%s2759_s27 + $0x220] sm:$0xff] %v312_v4  ;;  %v440_v4 = vld [vmem:[%s2754_s26 + $0x2020] sm:$0xff] }
  0x55   : > { %315 = vst [vmem:[%s2759_s27 + $0x228] sm:$0xff] %v314_v5  ;;  %v442_v5 = vld [vmem:[%s2754_s26 + $0x2028] sm:$0xff] }
  0x56   : > { %317 = vst [vmem:[%s2759_s27 + $0x230] sm:$0xff] %v316_v6  ;;  %v444_v6 = vld [vmem:[%s2754_s26 + $0x2030] sm:$0xff] }
  0x57   : > { %319 = vst [vmem:[%s2759_s27 + $0x238] sm:$0xff] %v318_v7  ;;  %v446_v7 = vld [vmem:[%s2754_s26 + $0x2038] sm:$0xff] }
  0x58   : > { %321 = vst [vmem:[%s2759_s27 + $0x240] sm:$0xff] %v320_v8  ;;  %v448_v8 = vld [vmem:[%s2754_s26 + $0x2040] sm:$0xff] }
  0x59   : > { %323 = vst [vmem:[%s2759_s27 + $0x248] sm:$0xff] %v322_v9  ;;  %v450_v9 = vld [vmem:[%s2754_s26 + $0x2048] sm:$0xff] }
  0x5a   : > { %325 = vst [vmem:[%s2759_s27 + $0x250] sm:$0xff] %v324_v10  ;;  %v452_v10 = vld [vmem:[%s2754_s26 + $0x2050] sm:$0xff] }
  0x5b   : > { %327 = vst [vmem:[%s2759_s27 + $0x258] sm:$0xff] %v326_v11  ;;  %v454_v11 = vld [vmem:[%s2754_s26 + $0x2058] sm:$0xff] }
  0x5c   : > { %329 = vst [vmem:[%s2759_s27 + $0x260] sm:$0xff] %v328_v12  ;;  %v456_v12 = vld [vmem:[%s2754_s26 + $0x2060] sm:$0xff] }
  0x5d   : > { %331 = vst [vmem:[%s2759_s27 + $0x268] sm:$0xff] %v330_v13  ;;  %v458_v13 = vld [vmem:[%s2754_s26 + $0x2068] sm:$0xff] }
  0x5e   : > { %333 = vst [vmem:[%s2759_s27 + $0x270] sm:$0xff] %v332_v14  ;;  %v460_v14 = vld [vmem:[%s2754_s26 + $0x2070] sm:$0xff] }
  0x5f   : > { %335 = vst [vmem:[%s2759_s27 + $0x278] sm:$0xff] %v334_v15  ;;  %v462_v15 = vld [vmem:[%s2754_s26 + $0x2078] sm:$0xff] }
  0x60   : > { %337 = vst [vmem:[%s2759_s27 + $0x280] sm:$0xff] %v336_v16  ;;  %v464_v16 = vld [vmem:[%s2754_s26 + $0x2400] sm:$0xff] }
  0x61   : > { %339 = vst [vmem:[%s2759_s27 + $0x288] sm:$0xff] %v338_v17  ;;  %v466_v17 = vld [vmem:[%s2754_s26 + $0x2408] sm:$0xff] }
  0x62   : > { %341 = vst [vmem:[%s2759_s27 + $0x290] sm:$0xff] %v340_v18  ;;  %v468_v18 = vld [vmem:[%s2754_s26 + $0x2410] sm:$0xff] }
  0x63   : > { %343 = vst [vmem:[%s2759_s27 + $0x298] sm:$0xff] %v342_v19  ;;  %v470_v19 = vld [vmem:[%s2754_s26 + $0x2418] sm:$0xff] }
  0x64   : > { %345 = vst [vmem:[%s2759_s27 + $0x2a0] sm:$0xff] %v344_v20  ;;  %v472_v20 = vld [vmem:[%s2754_s26 + $0x2420] sm:$0xff] }
  0x65   : > { %347 = vst [vmem:[%s2759_s27 + $0x2a8] sm:$0xff] %v346_v21  ;;  %v474_v21 = vld [vmem:[%s2754_s26 + $0x2428] sm:$0xff] }
  0x66   : > { %349 = vst [vmem:[%s2759_s27 + $0x2b0] sm:$0xff] %v348_v22  ;;  %v476_v22 = vld [vmem:[%s2754_s26 + $0x2430] sm:$0xff] }
  0x67   : > { %351 = vst [vmem:[%s2759_s27 + $0x2b8] sm:$0xff] %v350_v23  ;;  %v478_v23 = vld [vmem:[%s2754_s26 + $0x2438] sm:$0xff] }
  0x68   : > { %353 = vst [vmem:[%s2759_s27 + $0x2c0] sm:$0xff] %v352_v24  ;;  %v480_v24 = vld [vmem:[%s2754_s26 + $0x2440] sm:$0xff] }
  0x69   : > { %355 = vst [vmem:[%s2759_s27 + $0x2c8] sm:$0xff] %v354_v25  ;;  %v482_v25 = vld [vmem:[%s2754_s26 + $0x2448] sm:$0xff] }
  0x6a   : > { %357 = vst [vmem:[%s2759_s27 + $0x2d0] sm:$0xff] %v356_v26  ;;  %v484_v26 = vld [vmem:[%s2754_s26 + $0x2450] sm:$0xff] }
  0x6b   : > { %359 = vst [vmem:[%s2759_s27 + $0x2d8] sm:$0xff] %v358_v27  ;;  %v486_v27 = vld [vmem:[%s2754_s26 + $0x2458] sm:$0xff] }
  0x6c   : > { %361 = vst [vmem:[%s2759_s27 + $0x2e0] sm:$0xff] %v360_v28  ;;  %v488_v28 = vld [vmem:[%s2754_s26 + $0x2460] sm:$0xff] }
  0x6d   : > { %363 = vst [vmem:[%s2759_s27 + $0x2e8] sm:$0xff] %v362_v29  ;;  %v490_v29 = vld [vmem:[%s2754_s26 + $0x2468] sm:$0xff] }
  0x6e   : > { %365 = vst [vmem:[%s2759_s27 + $0x2f0] sm:$0xff] %v364_v30  ;;  %v492_v30 = vld [vmem:[%s2754_s26 + $0x2470] sm:$0xff] }
  0x6f   : > { %367 = vst [vmem:[%s2759_s27 + $0x2f8] sm:$0xff] %v366_v31  ;;  %v494_v31 = vld [vmem:[%s2754_s26 + $0x2478] sm:$0xff] }
  0x70   : > { %369 = vst [vmem:[%s2759_s27 + $0x300] sm:$0xff] %v368_v32  ;;  %v496_v32 = vld [vmem:[%s2754_s26 + $0x2800] sm:$0xff] }
  0x71   : > { %371 = vst [vmem:[%s2759_s27 + $0x308] sm:$0xff] %v370_v33  ;;  %v498_v33 = vld [vmem:[%s2754_s26 + $0x2808] sm:$0xff] }
  0x72   : > { %373 = vst [vmem:[%s2759_s27 + $0x310] sm:$0xff] %v372_v34  ;;  %v500_v34 = vld [vmem:[%s2754_s26 + $0x2810] sm:$0xff] }
  0x73   : > { %375 = vst [vmem:[%s2759_s27 + $0x318] sm:$0xff] %v374_v35  ;;  %v502_v35 = vld [vmem:[%s2754_s26 + $0x2818] sm:$0xff] }
  0x74   : > { %377 = vst [vmem:[%s2759_s27 + $0x320] sm:$0xff] %v376_v36  ;;  %v504_v36 = vld [vmem:[%s2754_s26 + $0x2820] sm:$0xff] }
  0x75   : > { %379 = vst [vmem:[%s2759_s27 + $0x328] sm:$0xff] %v378_v37  ;;  %v506_v37 = vld [vmem:[%s2754_s26 + $0x2828] sm:$0xff] }
  0x76   : > { %381 = vst [vmem:[%s2759_s27 + $0x330] sm:$0xff] %v380_v38  ;;  %v508_v38 = vld [vmem:[%s2754_s26 + $0x2830] sm:$0xff] }
  0x77   : > { %383 = vst [vmem:[%s2759_s27 + $0x338] sm:$0xff] %v382_v39  ;;  %v510_v39 = vld [vmem:[%s2754_s26 + $0x2838] sm:$0xff] }
  0x78   : > { %385 = vst [vmem:[%s2759_s27 + $0x340] sm:$0xff] %v384_v40  ;;  %v512_v40 = vld [vmem:[%s2754_s26 + $0x2840] sm:$0xff] }
  0x79   : > { %387 = vst [vmem:[%s2759_s27 + $0x348] sm:$0xff] %v386_v41  ;;  %v514_v41 = vld [vmem:[%s2754_s26 + $0x2848] sm:$0xff] }
  0x7a   : > { %389 = vst [vmem:[%s2759_s27 + $0x350] sm:$0xff] %v388_v42  ;;  %v516_v42 = vld [vmem:[%s2754_s26 + $0x2850] sm:$0xff] }
  0x7b   : > { %391 = vst [vmem:[%s2759_s27 + $0x358] sm:$0xff] %v390_v43  ;;  %v518_v43 = vld [vmem:[%s2754_s26 + $0x2858] sm:$0xff] }
  0x7c   : > { %393 = vst [vmem:[%s2759_s27 + $0x360] sm:$0xff] %v392_v44  ;;  %v520_v44 = vld [vmem:[%s2754_s26 + $0x2860] sm:$0xff] }
  0x7d   : > { %395 = vst [vmem:[%s2759_s27 + $0x368] sm:$0xff] %v394_v45  ;;  %v522_v45 = vld [vmem:[%s2754_s26 + $0x2868] sm:$0xff] }
  0x7e   : > { %397 = vst [vmem:[%s2759_s27 + $0x370] sm:$0xff] %v396_v46  ;;  %v524_v46 = vld [vmem:[%s2754_s26 + $0x2870] sm:$0xff] }
  0x7f   : > { %399 = vst [vmem:[%s2759_s27 + $0x378] sm:$0xff] %v398_v47  ;;  %v526_v47 = vld [vmem:[%s2754_s26 + $0x2878] sm:$0xff] }
  0x80   : > { %401 = vst [vmem:[%s2759_s27 + $0x380] sm:$0xff] %v400_v48  ;;  %v528_v48 = vld [vmem:[%s2754_s26 + $0x2c00] sm:$0xff] }
  0x81   : > { %403 = vst [vmem:[%s2759_s27 + $0x388] sm:$0xff] %v402_v49  ;;  %v530_v49 = vld [vmem:[%s2754_s26 + $0x2c08] sm:$0xff] }
  0x82   : > { %405 = vst [vmem:[%s2759_s27 + $0x390] sm:$0xff] %v404_v50  ;;  %v532_v50 = vld [vmem:[%s2754_s26 + $0x2c10] sm:$0xff] }
  0x83   : > { %407 = vst [vmem:[%s2759_s27 + $0x398] sm:$0xff] %v406_v51  ;;  %v534_v51 = vld [vmem:[%s2754_s26 + $0x2c18] sm:$0xff] }
  0x84   : > { %409 = vst [vmem:[%s2759_s27 + $0x3a0] sm:$0xff] %v408_v52  ;;  %v536_v52 = vld [vmem:[%s2754_s26 + $0x2c20] sm:$0xff] }
  0x85   : > { %411 = vst [vmem:[%s2759_s27 + $0x3a8] sm:$0xff] %v410_v53  ;;  %v538_v53 = vld [vmem:[%s2754_s26 + $0x2c28] sm:$0xff] }
  0x86   : > { %413 = vst [vmem:[%s2759_s27 + $0x3b0] sm:$0xff] %v412_v54  ;;  %v540_v54 = vld [vmem:[%s2754_s26 + $0x2c30] sm:$0xff] }
  0x87   : > { %415 = vst [vmem:[%s2759_s27 + $0x3b8] sm:$0xff] %v414_v55  ;;  %v542_v55 = vld [vmem:[%s2754_s26 + $0x2c38] sm:$0xff] }
  0x88   : > { %417 = vst [vmem:[%s2759_s27 + $0x3c0] sm:$0xff] %v416_v56  ;;  %v544_v56 = vld [vmem:[%s2754_s26 + $0x2c40] sm:$0xff] }
  0x89   : > { %419 = vst [vmem:[%s2759_s27 + $0x3c8] sm:$0xff] %v418_v57  ;;  %v546_v57 = vld [vmem:[%s2754_s26 + $0x2c48] sm:$0xff] }
  0x8a   : > { %421 = vst [vmem:[%s2759_s27 + $0x3d0] sm:$0xff] %v420_v58  ;;  %v548_v58 = vld [vmem:[%s2754_s26 + $0x2c50] sm:$0xff] }
  0x8b   : > { %423 = vst [vmem:[%s2759_s27 + $0x3d8] sm:$0xff] %v422_v59  ;;  %v550_v59 = vld [vmem:[%s2754_s26 + $0x2c58] sm:$0xff] }
  0x8c   : > { %425 = vst [vmem:[%s2759_s27 + $0x3e0] sm:$0xff] %v424_v60  ;;  %v552_v60 = vld [vmem:[%s2754_s26 + $0x2c60] sm:$0xff] }
  0x8d   : > { %427 = vst [vmem:[%s2759_s27 + $0x3e8] sm:$0xff] %v426_v61  ;;  %v554_v61 = vld [vmem:[%s2754_s26 + $0x2c68] sm:$0xff] }
  0x8e   : > { %429 = vst [vmem:[%s2759_s27 + $0x3f0] sm:$0xff] %v428_v62  ;;  %v556_v62 = vld [vmem:[%s2754_s26 + $0x2c70] sm:$0xff] }
  0x8f   : > { %431 = vst [vmem:[%s2759_s27 + $0x3f8] sm:$0xff] %v430_v63  ;;  %v558_v63 = vld [vmem:[%s2754_s26 + $0x2c78] sm:$0xff] }
  0x90   : > { %433 = vst [vmem:[%s2759_s27 + $0x400] sm:$0xff] %v432_v0  ;;  %v560_v0 = vld [vmem:[%s2754_s26 + $0x3000] sm:$0xff] }
  0x91   : > { %435 = vst [vmem:[%s2759_s27 + $0x408] sm:$0xff] %v434_v1  ;;  %v562_v1 = vld [vmem:[%s2754_s26 + $0x3008] sm:$0xff] }
  0x92   : > { %437 = vst [vmem:[%s2759_s27 + $0x410] sm:$0xff] %v436_v2  ;;  %v564_v2 = vld [vmem:[%s2754_s26 + $0x3010] sm:$0xff] }
  0x93   : > { %439 = vst [vmem:[%s2759_s27 + $0x418] sm:$0xff] %v438_v3  ;;  %v566_v3 = vld [vmem:[%s2754_s26 + $0x3018] sm:$0xff] }
  0x94   : > { %441 = vst [vmem:[%s2759_s27 + $0x420] sm:$0xff] %v440_v4  ;;  %v568_v4 = vld [vmem:[%s2754_s26 + $0x3020] sm:$0xff] }
  0x95   : > { %443 = vst [vmem:[%s2759_s27 + $0x428] sm:$0xff] %v442_v5  ;;  %v570_v5 = vld [vmem:[%s2754_s26 + $0x3028] sm:$0xff] }
  0x96   : > { %445 = vst [vmem:[%s2759_s27 + $0x430] sm:$0xff] %v444_v6  ;;  %v572_v6 = vld [vmem:[%s2754_s26 + $0x3030] sm:$0xff] }
  0x97   : > { %447 = vst [vmem:[%s2759_s27 + $0x438] sm:$0xff] %v446_v7  ;;  %v574_v7 = vld [vmem:[%s2754_s26 + $0x3038] sm:$0xff] }
  0x98   : > { %449 = vst [vmem:[%s2759_s27 + $0x440] sm:$0xff] %v448_v8  ;;  %v576_v8 = vld [vmem:[%s2754_s26 + $0x3040] sm:$0xff] }
  0x99   : > { %451 = vst [vmem:[%s2759_s27 + $0x448] sm:$0xff] %v450_v9  ;;  %v578_v9 = vld [vmem:[%s2754_s26 + $0x3048] sm:$0xff] }
  0x9a   : > { %453 = vst [vmem:[%s2759_s27 + $0x450] sm:$0xff] %v452_v10  ;;  %v580_v10 = vld [vmem:[%s2754_s26 + $0x3050] sm:$0xff] }
  0x9b   : > { %455 = vst [vmem:[%s2759_s27 + $0x458] sm:$0xff] %v454_v11  ;;  %v582_v11 = vld [vmem:[%s2754_s26 + $0x3058] sm:$0xff] }
  0x9c   : > { %457 = vst [vmem:[%s2759_s27 + $0x460] sm:$0xff] %v456_v12  ;;  %v584_v12 = vld [vmem:[%s2754_s26 + $0x3060] sm:$0xff] }
  0x9d   : > { %459 = vst [vmem:[%s2759_s27 + $0x468] sm:$0xff] %v458_v13  ;;  %v586_v13 = vld [vmem:[%s2754_s26 + $0x3068] sm:$0xff] }
  0x9e   : > { %461 = vst [vmem:[%s2759_s27 + $0x470] sm:$0xff] %v460_v14  ;;  %v588_v14 = vld [vmem:[%s2754_s26 + $0x3070] sm:$0xff] }
  0x9f   : > { %463 = vst [vmem:[%s2759_s27 + $0x478] sm:$0xff] %v462_v15  ;;  %v590_v15 = vld [vmem:[%s2754_s26 + $0x3078] sm:$0xff] }
  0xa0   : > { %465 = vst [vmem:[%s2759_s27 + $0x480] sm:$0xff] %v464_v16  ;;  %v592_v16 = vld [vmem:[%s2754_s26 + $0x3400] sm:$0xff] }
  0xa1   : > { %467 = vst [vmem:[%s2759_s27 + $0x488] sm:$0xff] %v466_v17  ;;  %v594_v17 = vld [vmem:[%s2754_s26 + $0x3408] sm:$0xff] }
  0xa2   : > { %469 = vst [vmem:[%s2759_s27 + $0x490] sm:$0xff] %v468_v18  ;;  %v596_v18 = vld [vmem:[%s2754_s26 + $0x3410] sm:$0xff] }
  0xa3   : > { %471 = vst [vmem:[%s2759_s27 + $0x498] sm:$0xff] %v470_v19  ;;  %v598_v19 = vld [vmem:[%s2754_s26 + $0x3418] sm:$0xff] }
  0xa4   : > { %473 = vst [vmem:[%s2759_s27 + $0x4a0] sm:$0xff] %v472_v20  ;;  %v600_v20 = vld [vmem:[%s2754_s26 + $0x3420] sm:$0xff] }
  0xa5   : > { %475 = vst [vmem:[%s2759_s27 + $0x4a8] sm:$0xff] %v474_v21  ;;  %v602_v21 = vld [vmem:[%s2754_s26 + $0x3428] sm:$0xff] }
  0xa6   : > { %477 = vst [vmem:[%s2759_s27 + $0x4b0] sm:$0xff] %v476_v22  ;;  %v604_v22 = vld [vmem:[%s2754_s26 + $0x3430] sm:$0xff] }
  0xa7   : > { %479 = vst [vmem:[%s2759_s27 + $0x4b8] sm:$0xff] %v478_v23  ;;  %v606_v23 = vld [vmem:[%s2754_s26 + $0x3438] sm:$0xff] }
  0xa8   : > { %481 = vst [vmem:[%s2759_s27 + $0x4c0] sm:$0xff] %v480_v24  ;;  %v608_v24 = vld [vmem:[%s2754_s26 + $0x3440] sm:$0xff] }
  0xa9   : > { %483 = vst [vmem:[%s2759_s27 + $0x4c8] sm:$0xff] %v482_v25  ;;  %v610_v25 = vld [vmem:[%s2754_s26 + $0x3448] sm:$0xff] }
  0xaa   : > { %485 = vst [vmem:[%s2759_s27 + $0x4d0] sm:$0xff] %v484_v26  ;;  %v612_v26 = vld [vmem:[%s2754_s26 + $0x3450] sm:$0xff] }
  0xab   : > { %487 = vst [vmem:[%s2759_s27 + $0x4d8] sm:$0xff] %v486_v27  ;;  %v614_v27 = vld [vmem:[%s2754_s26 + $0x3458] sm:$0xff] }
  0xac   : > { %489 = vst [vmem:[%s2759_s27 + $0x4e0] sm:$0xff] %v488_v28  ;;  %v616_v28 = vld [vmem:[%s2754_s26 + $0x3460] sm:$0xff] }
  0xad   : > { %491 = vst [vmem:[%s2759_s27 + $0x4e8] sm:$0xff] %v490_v29  ;;  %v618_v29 = vld [vmem:[%s2754_s26 + $0x3468] sm:$0xff] }
  0xae   : > { %493 = vst [vmem:[%s2759_s27 + $0x4f0] sm:$0xff] %v492_v30  ;;  %v620_v30 = vld [vmem:[%s2754_s26 + $0x3470] sm:$0xff] }
  0xaf   : > { %495 = vst [vmem:[%s2759_s27 + $0x4f8] sm:$0xff] %v494_v31  ;;  %v622_v31 = vld [vmem:[%s2754_s26 + $0x3478] sm:$0xff] }
  0xb0   : > { %497 = vst [vmem:[%s2759_s27 + $0x500] sm:$0xff] %v496_v32  ;;  %v624_v32 = vld [vmem:[%s2754_s26 + $0x3800] sm:$0xff] }
  0xb1   : > { %499 = vst [vmem:[%s2759_s27 + $0x508] sm:$0xff] %v498_v33  ;;  %v626_v33 = vld [vmem:[%s2754_s26 + $0x3808] sm:$0xff] }
  0xb2   : > { %501 = vst [vmem:[%s2759_s27 + $0x510] sm:$0xff] %v500_v34  ;;  %v628_v34 = vld [vmem:[%s2754_s26 + $0x3810] sm:$0xff] }
  0xb3   : > { %503 = vst [vmem:[%s2759_s27 + $0x518] sm:$0xff] %v502_v35  ;;  %v630_v35 = vld [vmem:[%s2754_s26 + $0x3818] sm:$0xff] }
  0xb4   : > { %505 = vst [vmem:[%s2759_s27 + $0x520] sm:$0xff] %v504_v36  ;;  %v632_v36 = vld [vmem:[%s2754_s26 + $0x3820] sm:$0xff] }
  0xb5   : > { %507 = vst [vmem:[%s2759_s27 + $0x528] sm:$0xff] %v506_v37  ;;  %v634_v37 = vld [vmem:[%s2754_s26 + $0x3828] sm:$0xff] }
  0xb6   : > { %509 = vst [vmem:[%s2759_s27 + $0x530] sm:$0xff] %v508_v38  ;;  %v636_v38 = vld [vmem:[%s2754_s26 + $0x3830] sm:$0xff] }
  0xb7   : > { %511 = vst [vmem:[%s2759_s27 + $0x538] sm:$0xff] %v510_v39  ;;  %v638_v39 = vld [vmem:[%s2754_s26 + $0x3838] sm:$0xff] }
  0xb8   : > { %513 = vst [vmem:[%s2759_s27 + $0x540] sm:$0xff] %v512_v40  ;;  %v640_v40 = vld [vmem:[%s2754_s26 + $0x3840] sm:$0xff] }
  0xb9   : > { %515 = vst [vmem:[%s2759_s27 + $0x548] sm:$0xff] %v514_v41  ;;  %v642_v41 = vld [vmem:[%s2754_s26 + $0x3848] sm:$0xff] }
  0xba   : > { %517 = vst [vmem:[%s2759_s27 + $0x550] sm:$0xff] %v516_v42  ;;  %v644_v42 = vld [vmem:[%s2754_s26 + $0x3850] sm:$0xff] }
  0xbb   : > { %519 = vst [vmem:[%s2759_s27 + $0x558] sm:$0xff] %v518_v43  ;;  %v646_v43 = vld [vmem:[%s2754_s26 + $0x3858] sm:$0xff] }
  0xbc   : > { %521 = vst [vmem:[%s2759_s27 + $0x560] sm:$0xff] %v520_v44  ;;  %v648_v44 = vld [vmem:[%s2754_s26 + $0x3860] sm:$0xff] }
  0xbd   : > { %523 = vst [vmem:[%s2759_s27 + $0x568] sm:$0xff] %v522_v45  ;;  %v650_v45 = vld [vmem:[%s2754_s26 + $0x3868] sm:$0xff] }
  0xbe   : > { %525 = vst [vmem:[%s2759_s27 + $0x570] sm:$0xff] %v524_v46  ;;  %v652_v46 = vld [vmem:[%s2754_s26 + $0x3870] sm:$0xff] }
  0xbf   : > { %527 = vst [vmem:[%s2759_s27 + $0x578] sm:$0xff] %v526_v47  ;;  %v654_v47 = vld [vmem:[%s2754_s26 + $0x3878] sm:$0xff] }
  0xc0   : > { %529 = vst [vmem:[%s2759_s27 + $0x580] sm:$0xff] %v528_v48  ;;  %v656_v48 = vld [vmem:[%s2754_s26 + $0x3c00] sm:$0xff] }
  0xc1   : > { %531 = vst [vmem:[%s2759_s27 + $0x588] sm:$0xff] %v530_v49  ;;  %v658_v49 = vld [vmem:[%s2754_s26 + $0x3c08] sm:$0xff] }
  0xc2   : > { %533 = vst [vmem:[%s2759_s27 + $0x590] sm:$0xff] %v532_v50  ;;  %v660_v50 = vld [vmem:[%s2754_s26 + $0x3c10] sm:$0xff] }
  0xc3   : > { %535 = vst [vmem:[%s2759_s27 + $0x598] sm:$0xff] %v534_v51  ;;  %v662_v51 = vld [vmem:[%s2754_s26 + $0x3c18] sm:$0xff] }
  0xc4   : > { %537 = vst [vmem:[%s2759_s27 + $0x5a0] sm:$0xff] %v536_v52  ;;  %v664_v52 = vld [vmem:[%s2754_s26 + $0x3c20] sm:$0xff] }
  0xc5   : > { %539 = vst [vmem:[%s2759_s27 + $0x5a8] sm:$0xff] %v538_v53  ;;  %v666_v53 = vld [vmem:[%s2754_s26 + $0x3c28] sm:$0xff] }
  0xc6   : > { %541 = vst [vmem:[%s2759_s27 + $0x5b0] sm:$0xff] %v540_v54  ;;  %v668_v54 = vld [vmem:[%s2754_s26 + $0x3c30] sm:$0xff] }
  0xc7   : > { %543 = vst [vmem:[%s2759_s27 + $0x5b8] sm:$0xff] %v542_v55  ;;  %v670_v55 = vld [vmem:[%s2754_s26 + $0x3c38] sm:$0xff] }
  0xc8   : > { %545 = vst [vmem:[%s2759_s27 + $0x5c0] sm:$0xff] %v544_v56  ;;  %v672_v56 = vld [vmem:[%s2754_s26 + $0x3c40] sm:$0xff] }
  0xc9   : > { %547 = vst [vmem:[%s2759_s27 + $0x5c8] sm:$0xff] %v546_v57  ;;  %v674_v57 = vld [vmem:[%s2754_s26 + $0x3c48] sm:$0xff] }
  0xca   : > { %549 = vst [vmem:[%s2759_s27 + $0x5d0] sm:$0xff] %v548_v58  ;;  %v676_v58 = vld [vmem:[%s2754_s26 + $0x3c50] sm:$0xff] }
  0xcb   : > { %551 = vst [vmem:[%s2759_s27 + $0x5d8] sm:$0xff] %v550_v59  ;;  %v678_v59 = vld [vmem:[%s2754_s26 + $0x3c58] sm:$0xff] }
  0xcc   : > { %553 = vst [vmem:[%s2759_s27 + $0x5e0] sm:$0xff] %v552_v60  ;;  %v680_v60 = vld [vmem:[%s2754_s26 + $0x3c60] sm:$0xff] }
  0xcd   : > { %555 = vst [vmem:[%s2759_s27 + $0x5e8] sm:$0xff] %v554_v61  ;;  %v682_v61 = vld [vmem:[%s2754_s26 + $0x3c68] sm:$0xff] }
  0xce   : > { %557 = vst [vmem:[%s2759_s27 + $0x5f0] sm:$0xff] %v556_v62  ;;  %v684_v62 = vld [vmem:[%s2754_s26 + $0x3c70] sm:$0xff] }
  0xcf   : > { %559 = vst [vmem:[%s2759_s27 + $0x5f8] sm:$0xff] %v558_v63  ;;  %v686_v63 = vld [vmem:[%s2754_s26 + $0x3c78] sm:$0xff] }
  0xd0   : > { %561 = vst [vmem:[%s2759_s27 + $0x600] sm:$0xff] %v560_v0  ;;  %v688_v0 = vld [vmem:[%s2754_s26 + $0x4000] sm:$0xff] }
  0xd1   : > { %563 = vst [vmem:[%s2759_s27 + $0x608] sm:$0xff] %v562_v1  ;;  %v690_v1 = vld [vmem:[%s2754_s26 + $0x4008] sm:$0xff] }
  0xd2   : > { %565 = vst [vmem:[%s2759_s27 + $0x610] sm:$0xff] %v564_v2  ;;  %v692_v2 = vld [vmem:[%s2754_s26 + $0x4010] sm:$0xff] }
  0xd3   : > { %567 = vst [vmem:[%s2759_s27 + $0x618] sm:$0xff] %v566_v3  ;;  %v694_v3 = vld [vmem:[%s2754_s26 + $0x4018] sm:$0xff] }
  0xd4   : > { %569 = vst [vmem:[%s2759_s27 + $0x620] sm:$0xff] %v568_v4  ;;  %v696_v4 = vld [vmem:[%s2754_s26 + $0x4020] sm:$0xff] }
  0xd5   : > { %571 = vst [vmem:[%s2759_s27 + $0x628] sm:$0xff] %v570_v5  ;;  %v698_v5 = vld [vmem:[%s2754_s26 + $0x4028] sm:$0xff] }
  0xd6   : > { %573 = vst [vmem:[%s2759_s27 + $0x630] sm:$0xff] %v572_v6  ;;  %v700_v6 = vld [vmem:[%s2754_s26 + $0x4030] sm:$0xff] }
  0xd7   : > { %575 = vst [vmem:[%s2759_s27 + $0x638] sm:$0xff] %v574_v7  ;;  %v702_v7 = vld [vmem:[%s2754_s26 + $0x4038] sm:$0xff] }
  0xd8   : > { %577 = vst [vmem:[%s2759_s27 + $0x640] sm:$0xff] %v576_v8  ;;  %v704_v8 = vld [vmem:[%s2754_s26 + $0x4040] sm:$0xff] }
  0xd9   : > { %579 = vst [vmem:[%s2759_s27 + $0x648] sm:$0xff] %v578_v9  ;;  %v706_v9 = vld [vmem:[%s2754_s26 + $0x4048] sm:$0xff] }
  0xda   : > { %581 = vst [vmem:[%s2759_s27 + $0x650] sm:$0xff] %v580_v10  ;;  %v708_v10 = vld [vmem:[%s2754_s26 + $0x4050] sm:$0xff] }
  0xdb   : > { %583 = vst [vmem:[%s2759_s27 + $0x658] sm:$0xff] %v582_v11  ;;  %v710_v11 = vld [vmem:[%s2754_s26 + $0x4058] sm:$0xff] }
  0xdc   : > { %585 = vst [vmem:[%s2759_s27 + $0x660] sm:$0xff] %v584_v12  ;;  %v712_v12 = vld [vmem:[%s2754_s26 + $0x4060] sm:$0xff] }
  0xdd   : > { %587 = vst [vmem:[%s2759_s27 + $0x668] sm:$0xff] %v586_v13  ;;  %v714_v13 = vld [vmem:[%s2754_s26 + $0x4068] sm:$0xff] }
  0xde   : > { %589 = vst [vmem:[%s2759_s27 + $0x670] sm:$0xff] %v588_v14  ;;  %v716_v14 = vld [vmem:[%s2754_s26 + $0x4070] sm:$0xff] }
  0xdf   : > { %591 = vst [vmem:[%s2759_s27 + $0x678] sm:$0xff] %v590_v15  ;;  %v718_v15 = vld [vmem:[%s2754_s26 + $0x4078] sm:$0xff] }
  0xe0   : > { %593 = vst [vmem:[%s2759_s27 + $0x680] sm:$0xff] %v592_v16  ;;  %v720_v16 = vld [vmem:[%s2754_s26 + $0x4400] sm:$0xff] }
  0xe1   : > { %595 = vst [vmem:[%s2759_s27 + $0x688] sm:$0xff] %v594_v17  ;;  %v722_v17 = vld [vmem:[%s2754_s26 + $0x4408] sm:$0xff] }
  0xe2   : > { %597 = vst [vmem:[%s2759_s27 + $0x690] sm:$0xff] %v596_v18  ;;  %v724_v18 = vld [vmem:[%s2754_s26 + $0x4410] sm:$0xff] }
  0xe3   : > { %599 = vst [vmem:[%s2759_s27 + $0x698] sm:$0xff] %v598_v19  ;;  %v726_v19 = vld [vmem:[%s2754_s26 + $0x4418] sm:$0xff] }
  0xe4   : > { %601 = vst [vmem:[%s2759_s27 + $0x6a0] sm:$0xff] %v600_v20  ;;  %v728_v20 = vld [vmem:[%s2754_s26 + $0x4420] sm:$0xff] }
  0xe5   : > { %603 = vst [vmem:[%s2759_s27 + $0x6a8] sm:$0xff] %v602_v21  ;;  %v730_v21 = vld [vmem:[%s2754_s26 + $0x4428] sm:$0xff] }
  0xe6   : > { %605 = vst [vmem:[%s2759_s27 + $0x6b0] sm:$0xff] %v604_v22  ;;  %v732_v22 = vld [vmem:[%s2754_s26 + $0x4430] sm:$0xff] }
  0xe7   : > { %607 = vst [vmem:[%s2759_s27 + $0x6b8] sm:$0xff] %v606_v23  ;;  %v734_v23 = vld [vmem:[%s2754_s26 + $0x4438] sm:$0xff] }
  0xe8   : > { %609 = vst [vmem:[%s2759_s27 + $0x6c0] sm:$0xff] %v608_v24  ;;  %v736_v24 = vld [vmem:[%s2754_s26 + $0x4440] sm:$0xff] }
  0xe9   : > { %611 = vst [vmem:[%s2759_s27 + $0x6c8] sm:$0xff] %v610_v25  ;;  %v738_v25 = vld [vmem:[%s2754_s26 + $0x4448] sm:$0xff] }
  0xea   : > { %613 = vst [vmem:[%s2759_s27 + $0x6d0] sm:$0xff] %v612_v26  ;;  %v740_v26 = vld [vmem:[%s2754_s26 + $0x4450] sm:$0xff] }
  0xeb   : > { %615 = vst [vmem:[%s2759_s27 + $0x6d8] sm:$0xff] %v614_v27  ;;  %v742_v27 = vld [vmem:[%s2754_s26 + $0x4458] sm:$0xff] }
  0xec   : > { %617 = vst [vmem:[%s2759_s27 + $0x6e0] sm:$0xff] %v616_v28  ;;  %v744_v28 = vld [vmem:[%s2754_s26 + $0x4460] sm:$0xff] }
  0xed   : > { %619 = vst [vmem:[%s2759_s27 + $0x6e8] sm:$0xff] %v618_v29  ;;  %v746_v29 = vld [vmem:[%s2754_s26 + $0x4468] sm:$0xff] }
  0xee   : > { %621 = vst [vmem:[%s2759_s27 + $0x6f0] sm:$0xff] %v620_v30  ;;  %v748_v30 = vld [vmem:[%s2754_s26 + $0x4470] sm:$0xff] }
  0xef   : > { %623 = vst [vmem:[%s2759_s27 + $0x6f8] sm:$0xff] %v622_v31  ;;  %v750_v31 = vld [vmem:[%s2754_s26 + $0x4478] sm:$0xff] }
  0xf0   : > { %625 = vst [vmem:[%s2759_s27 + $0x700] sm:$0xff] %v624_v32  ;;  %v752_v32 = vld [vmem:[%s2754_s26 + $0x4800] sm:$0xff] }
  0xf1   : > { %627 = vst [vmem:[%s2759_s27 + $0x708] sm:$0xff] %v626_v33  ;;  %v754_v33 = vld [vmem:[%s2754_s26 + $0x4808] sm:$0xff] }
  0xf2   : > { %629 = vst [vmem:[%s2759_s27 + $0x710] sm:$0xff] %v628_v34  ;;  %v756_v34 = vld [vmem:[%s2754_s26 + $0x4810] sm:$0xff] }
  0xf3   : > { %631 = vst [vmem:[%s2759_s27 + $0x718] sm:$0xff] %v630_v35  ;;  %v758_v35 = vld [vmem:[%s2754_s26 + $0x4818] sm:$0xff] }
  0xf4   : > { %633 = vst [vmem:[%s2759_s27 + $0x720] sm:$0xff] %v632_v36  ;;  %v760_v36 = vld [vmem:[%s2754_s26 + $0x4820] sm:$0xff] }
  0xf5   : > { %635 = vst [vmem:[%s2759_s27 + $0x728] sm:$0xff] %v634_v37  ;;  %v762_v37 = vld [vmem:[%s2754_s26 + $0x4828] sm:$0xff] }
  0xf6   : > { %637 = vst [vmem:[%s2759_s27 + $0x730] sm:$0xff] %v636_v38  ;;  %v764_v38 = vld [vmem:[%s2754_s26 + $0x4830] sm:$0xff] }
  0xf7   : > { %639 = vst [vmem:[%s2759_s27 + $0x738] sm:$0xff] %v638_v39  ;;  %v766_v39 = vld [vmem:[%s2754_s26 + $0x4838] sm:$0xff] }
  0xf8   : > { %641 = vst [vmem:[%s2759_s27 + $0x740] sm:$0xff] %v640_v40  ;;  %v768_v40 = vld [vmem:[%s2754_s26 + $0x4840] sm:$0xff] }
  0xf9   : > { %643 = vst [vmem:[%s2759_s27 + $0x748] sm:$0xff] %v642_v41  ;;  %v770_v41 = vld [vmem:[%s2754_s26 + $0x4848] sm:$0xff] }
  0xfa   : > { %645 = vst [vmem:[%s2759_s27 + $0x750] sm:$0xff] %v644_v42  ;;  %v772_v42 = vld [vmem:[%s2754_s26 + $0x4850] sm:$0xff] }
  0xfb   : > { %647 = vst [vmem:[%s2759_s27 + $0x758] sm:$0xff] %v646_v43  ;;  %v774_v43 = vld [vmem:[%s2754_s26 + $0x4858] sm:$0xff] }
  0xfc   : > { %649 = vst [vmem:[%s2759_s27 + $0x760] sm:$0xff] %v648_v44  ;;  %v776_v44 = vld [vmem:[%s2754_s26 + $0x4860] sm:$0xff] }
  0xfd   : > { %651 = vst [vmem:[%s2759_s27 + $0x768] sm:$0xff] %v650_v45  ;;  %v778_v45 = vld [vmem:[%s2754_s26 + $0x4868] sm:$0xff] }
  0xfe   : > { %653 = vst [vmem:[%s2759_s27 + $0x770] sm:$0xff] %v652_v46  ;;  %v780_v46 = vld [vmem:[%s2754_s26 + $0x4870] sm:$0xff] }
  0xff   : > { %655 = vst [vmem:[%s2759_s27 + $0x778] sm:$0xff] %v654_v47  ;;  %v782_v47 = vld [vmem:[%s2754_s26 + $0x4878] sm:$0xff] }
 0x100   : > { %657 = vst [vmem:[%s2759_s27 + $0x780] sm:$0xff] %v656_v48  ;;  %v784_v48 = vld [vmem:[%s2754_s26 + $0x4c00] sm:$0xff] }
 0x101   : > { %659 = vst [vmem:[%s2759_s27 + $0x788] sm:$0xff] %v658_v49  ;;  %v786_v49 = vld [vmem:[%s2754_s26 + $0x4c08] sm:$0xff] }
 0x102   : > { %661 = vst [vmem:[%s2759_s27 + $0x790] sm:$0xff] %v660_v50  ;;  %v788_v50 = vld [vmem:[%s2754_s26 + $0x4c10] sm:$0xff] }
 0x103   : > { %663 = vst [vmem:[%s2759_s27 + $0x798] sm:$0xff] %v662_v51  ;;  %v790_v51 = vld [vmem:[%s2754_s26 + $0x4c18] sm:$0xff] }
 0x104   : > { %665 = vst [vmem:[%s2759_s27 + $0x7a0] sm:$0xff] %v664_v52  ;;  %v792_v52 = vld [vmem:[%s2754_s26 + $0x4c20] sm:$0xff] }
 0x105   : > { %667 = vst [vmem:[%s2759_s27 + $0x7a8] sm:$0xff] %v666_v53  ;;  %v794_v53 = vld [vmem:[%s2754_s26 + $0x4c28] sm:$0xff] }
 0x106   : > { %669 = vst [vmem:[%s2759_s27 + $0x7b0] sm:$0xff] %v668_v54  ;;  %v796_v54 = vld [vmem:[%s2754_s26 + $0x4c30] sm:$0xff] }
 0x107   : > { %671 = vst [vmem:[%s2759_s27 + $0x7b8] sm:$0xff] %v670_v55  ;;  %v798_v55 = vld [vmem:[%s2754_s26 + $0x4c38] sm:$0xff] }
 0x108   : > { %673 = vst [vmem:[%s2759_s27 + $0x7c0] sm:$0xff] %v672_v56  ;;  %v800_v56 = vld [vmem:[%s2754_s26 + $0x4c40] sm:$0xff] }
 0x109   : > { %675 = vst [vmem:[%s2759_s27 + $0x7c8] sm:$0xff] %v674_v57  ;;  %v802_v57 = vld [vmem:[%s2754_s26 + $0x4c48] sm:$0xff] }
 0x10a   : > { %677 = vst [vmem:[%s2759_s27 + $0x7d0] sm:$0xff] %v676_v58  ;;  %v804_v58 = vld [vmem:[%s2754_s26 + $0x4c50] sm:$0xff] }
 0x10b   : > { %679 = vst [vmem:[%s2759_s27 + $0x7d8] sm:$0xff] %v678_v59  ;;  %v806_v59 = vld [vmem:[%s2754_s26 + $0x4c58] sm:$0xff] }
 0x10c   : > { %681 = vst [vmem:[%s2759_s27 + $0x7e0] sm:$0xff] %v680_v60  ;;  %v808_v60 = vld [vmem:[%s2754_s26 + $0x4c60] sm:$0xff] }
 0x10d   : > { %683 = vst [vmem:[%s2759_s27 + $0x7e8] sm:$0xff] %v682_v61  ;;  %v810_v61 = vld [vmem:[%s2754_s26 + $0x4c68] sm:$0xff] }
 0x10e   : > { %685 = vst [vmem:[%s2759_s27 + $0x7f0] sm:$0xff] %v684_v62  ;;  %v812_v62 = vld [vmem:[%s2754_s26 + $0x4c70] sm:$0xff] }
 0x10f   : > { %687 = vst [vmem:[%s2759_s27 + $0x7f8] sm:$0xff] %v686_v63  ;;  %v814_v63 = vld [vmem:[%s2754_s26 + $0x4c78] sm:$0xff] }
 0x110   : > { %689 = vst [vmem:[%s2759_s27 + $0x800] sm:$0xff] %v688_v0  ;;  %v816_v0 = vld [vmem:[%s2754_s26 + $0x5000] sm:$0xff] }
 0x111   : > { %691 = vst [vmem:[%s2759_s27 + $0x808] sm:$0xff] %v690_v1  ;;  %v818_v1 = vld [vmem:[%s2754_s26 + $0x5008] sm:$0xff] }
 0x112   : > { %693 = vst [vmem:[%s2759_s27 + $0x810] sm:$0xff] %v692_v2  ;;  %v820_v2 = vld [vmem:[%s2754_s26 + $0x5010] sm:$0xff] }
 0x113   : > { %695 = vst [vmem:[%s2759_s27 + $0x818] sm:$0xff] %v694_v3  ;;  %v822_v3 = vld [vmem:[%s2754_s26 + $0x5018] sm:$0xff] }
 0x114   : > { %697 = vst [vmem:[%s2759_s27 + $0x820] sm:$0xff] %v696_v4  ;;  %v824_v4 = vld [vmem:[%s2754_s26 + $0x5020] sm:$0xff] }
 0x115   : > { %699 = vst [vmem:[%s2759_s27 + $0x828] sm:$0xff] %v698_v5  ;;  %v826_v5 = vld [vmem:[%s2754_s26 + $0x5028] sm:$0xff] }
 0x116   : > { %701 = vst [vmem:[%s2759_s27 + $0x830] sm:$0xff] %v700_v6  ;;  %v828_v6 = vld [vmem:[%s2754_s26 + $0x5030] sm:$0xff] }
 0x117   : > { %703 = vst [vmem:[%s2759_s27 + $0x838] sm:$0xff] %v702_v7  ;;  %v830_v7 = vld [vmem:[%s2754_s26 + $0x5038] sm:$0xff] }
 0x118   : > { %705 = vst [vmem:[%s2759_s27 + $0x840] sm:$0xff] %v704_v8  ;;  %v832_v8 = vld [vmem:[%s2754_s26 + $0x5040] sm:$0xff] }
 0x119   : > { %707 = vst [vmem:[%s2759_s27 + $0x848] sm:$0xff] %v706_v9  ;;  %v834_v9 = vld [vmem:[%s2754_s26 + $0x5048] sm:$0xff] }
 0x11a   : > { %709 = vst [vmem:[%s2759_s27 + $0x850] sm:$0xff] %v708_v10  ;;  %v836_v10 = vld [vmem:[%s2754_s26 + $0x5050] sm:$0xff] }
 0x11b   : > { %711 = vst [vmem:[%s2759_s27 + $0x858] sm:$0xff] %v710_v11  ;;  %v838_v11 = vld [vmem:[%s2754_s26 + $0x5058] sm:$0xff] }
 0x11c   : > { %713 = vst [vmem:[%s2759_s27 + $0x860] sm:$0xff] %v712_v12  ;;  %v840_v12 = vld [vmem:[%s2754_s26 + $0x5060] sm:$0xff] }
 0x11d   : > { %715 = vst [vmem:[%s2759_s27 + $0x868] sm:$0xff] %v714_v13  ;;  %v842_v13 = vld [vmem:[%s2754_s26 + $0x5068] sm:$0xff] }
 0x11e   : > { %717 = vst [vmem:[%s2759_s27 + $0x870] sm:$0xff] %v716_v14  ;;  %v844_v14 = vld [vmem:[%s2754_s26 + $0x5070] sm:$0xff] }
 0x11f   : > { %719 = vst [vmem:[%s2759_s27 + $0x878] sm:$0xff] %v718_v15  ;;  %v846_v15 = vld [vmem:[%s2754_s26 + $0x5078] sm:$0xff] }
 0x120   : > { %721 = vst [vmem:[%s2759_s27 + $0x880] sm:$0xff] %v720_v16  ;;  %v848_v16 = vld [vmem:[%s2754_s26 + $0x5400] sm:$0xff] }
 0x121   : > { %723 = vst [vmem:[%s2759_s27 + $0x888] sm:$0xff] %v722_v17  ;;  %v850_v17 = vld [vmem:[%s2754_s26 + $0x5408] sm:$0xff] }
 0x122   : > { %725 = vst [vmem:[%s2759_s27 + $0x890] sm:$0xff] %v724_v18  ;;  %v852_v18 = vld [vmem:[%s2754_s26 + $0x5410] sm:$0xff] }
 0x123   : > { %727 = vst [vmem:[%s2759_s27 + $0x898] sm:$0xff] %v726_v19  ;;  %v854_v19 = vld [vmem:[%s2754_s26 + $0x5418] sm:$0xff] }
 0x124   : > { %729 = vst [vmem:[%s2759_s27 + $0x8a0] sm:$0xff] %v728_v20  ;;  %v856_v20 = vld [vmem:[%s2754_s26 + $0x5420] sm:$0xff] }
 0x125   : > { %731 = vst [vmem:[%s2759_s27 + $0x8a8] sm:$0xff] %v730_v21  ;;  %v858_v21 = vld [vmem:[%s2754_s26 + $0x5428] sm:$0xff] }
 0x126   : > { %733 = vst [vmem:[%s2759_s27 + $0x8b0] sm:$0xff] %v732_v22  ;;  %v860_v22 = vld [vmem:[%s2754_s26 + $0x5430] sm:$0xff] }
 0x127   : > { %735 = vst [vmem:[%s2759_s27 + $0x8b8] sm:$0xff] %v734_v23  ;;  %v862_v23 = vld [vmem:[%s2754_s26 + $0x5438] sm:$0xff] }
 0x128   : > { %737 = vst [vmem:[%s2759_s27 + $0x8c0] sm:$0xff] %v736_v24  ;;  %v864_v24 = vld [vmem:[%s2754_s26 + $0x5440] sm:$0xff] }
 0x129   : > { %739 = vst [vmem:[%s2759_s27 + $0x8c8] sm:$0xff] %v738_v25  ;;  %v866_v25 = vld [vmem:[%s2754_s26 + $0x5448] sm:$0xff] }
 0x12a   : > { %741 = vst [vmem:[%s2759_s27 + $0x8d0] sm:$0xff] %v740_v26  ;;  %v868_v26 = vld [vmem:[%s2754_s26 + $0x5450] sm:$0xff] }
 0x12b   : > { %743 = vst [vmem:[%s2759_s27 + $0x8d8] sm:$0xff] %v742_v27  ;;  %v870_v27 = vld [vmem:[%s2754_s26 + $0x5458] sm:$0xff] }
 0x12c   : > { %745 = vst [vmem:[%s2759_s27 + $0x8e0] sm:$0xff] %v744_v28  ;;  %v872_v28 = vld [vmem:[%s2754_s26 + $0x5460] sm:$0xff] }
 0x12d   : > { %747 = vst [vmem:[%s2759_s27 + $0x8e8] sm:$0xff] %v746_v29  ;;  %v874_v29 = vld [vmem:[%s2754_s26 + $0x5468] sm:$0xff] }
 0x12e   : > { %749 = vst [vmem:[%s2759_s27 + $0x8f0] sm:$0xff] %v748_v30  ;;  %v876_v30 = vld [vmem:[%s2754_s26 + $0x5470] sm:$0xff] }
 0x12f   : > { %751 = vst [vmem:[%s2759_s27 + $0x8f8] sm:$0xff] %v750_v31  ;;  %v878_v31 = vld [vmem:[%s2754_s26 + $0x5478] sm:$0xff] }
 0x130   : > { %753 = vst [vmem:[%s2759_s27 + $0x900] sm:$0xff] %v752_v32  ;;  %v880_v32 = vld [vmem:[%s2754_s26 + $0x5800] sm:$0xff] }
 0x131   : > { %755 = vst [vmem:[%s2759_s27 + $0x908] sm:$0xff] %v754_v33  ;;  %v882_v33 = vld [vmem:[%s2754_s26 + $0x5808] sm:$0xff] }
 0x132   : > { %757 = vst [vmem:[%s2759_s27 + $0x910] sm:$0xff] %v756_v34  ;;  %v884_v34 = vld [vmem:[%s2754_s26 + $0x5810] sm:$0xff] }
 0x133   : > { %759 = vst [vmem:[%s2759_s27 + $0x918] sm:$0xff] %v758_v35  ;;  %v886_v35 = vld [vmem:[%s2754_s26 + $0x5818] sm:$0xff] }
 0x134   : > { %761 = vst [vmem:[%s2759_s27 + $0x920] sm:$0xff] %v760_v36  ;;  %v888_v36 = vld [vmem:[%s2754_s26 + $0x5820] sm:$0xff] }
 0x135   : > { %763 = vst [vmem:[%s2759_s27 + $0x928] sm:$0xff] %v762_v37  ;;  %v890_v37 = vld [vmem:[%s2754_s26 + $0x5828] sm:$0xff] }
 0x136   : > { %765 = vst [vmem:[%s2759_s27 + $0x930] sm:$0xff] %v764_v38  ;;  %v892_v38 = vld [vmem:[%s2754_s26 + $0x5830] sm:$0xff] }
 0x137   : > { %767 = vst [vmem:[%s2759_s27 + $0x938] sm:$0xff] %v766_v39  ;;  %v894_v39 = vld [vmem:[%s2754_s26 + $0x5838] sm:$0xff] }
 0x138   : > { %769 = vst [vmem:[%s2759_s27 + $0x940] sm:$0xff] %v768_v40  ;;  %v896_v40 = vld [vmem:[%s2754_s26 + $0x5840] sm:$0xff] }
 0x139   : > { %771 = vst [vmem:[%s2759_s27 + $0x948] sm:$0xff] %v770_v41  ;;  %v898_v41 = vld [vmem:[%s2754_s26 + $0x5848] sm:$0xff] }
 0x13a   : > { %773 = vst [vmem:[%s2759_s27 + $0x950] sm:$0xff] %v772_v42  ;;  %v900_v42 = vld [vmem:[%s2754_s26 + $0x5850] sm:$0xff] }
 0x13b   : > { %775 = vst [vmem:[%s2759_s27 + $0x958] sm:$0xff] %v774_v43  ;;  %v902_v43 = vld [vmem:[%s2754_s26 + $0x5858] sm:$0xff] }
 0x13c   : > { %777 = vst [vmem:[%s2759_s27 + $0x960] sm:$0xff] %v776_v44  ;;  %v904_v44 = vld [vmem:[%s2754_s26 + $0x5860] sm:$0xff] }
 0x13d   : > { %779 = vst [vmem:[%s2759_s27 + $0x968] sm:$0xff] %v778_v45  ;;  %v906_v45 = vld [vmem:[%s2754_s26 + $0x5868] sm:$0xff] }
 0x13e   : > { %781 = vst [vmem:[%s2759_s27 + $0x970] sm:$0xff] %v780_v46  ;;  %v908_v46 = vld [vmem:[%s2754_s26 + $0x5870] sm:$0xff] }
 0x13f   : > { %783 = vst [vmem:[%s2759_s27 + $0x978] sm:$0xff] %v782_v47  ;;  %v910_v47 = vld [vmem:[%s2754_s26 + $0x5878] sm:$0xff] }
 0x140   : > { %785 = vst [vmem:[%s2759_s27 + $0x980] sm:$0xff] %v784_v48  ;;  %v912_v48 = vld [vmem:[%s2754_s26 + $0x5c00] sm:$0xff] }
 0x141   : > { %787 = vst [vmem:[%s2759_s27 + $0x988] sm:$0xff] %v786_v49  ;;  %v914_v49 = vld [vmem:[%s2754_s26 + $0x5c08] sm:$0xff] }
 0x142   : > { %789 = vst [vmem:[%s2759_s27 + $0x990] sm:$0xff] %v788_v50  ;;  %v916_v50 = vld [vmem:[%s2754_s26 + $0x5c10] sm:$0xff] }
 0x143   : > { %791 = vst [vmem:[%s2759_s27 + $0x998] sm:$0xff] %v790_v51  ;;  %v918_v51 = vld [vmem:[%s2754_s26 + $0x5c18] sm:$0xff] }
 0x144   : > { %793 = vst [vmem:[%s2759_s27 + $0x9a0] sm:$0xff] %v792_v52  ;;  %v920_v52 = vld [vmem:[%s2754_s26 + $0x5c20] sm:$0xff] }
 0x145   : > { %795 = vst [vmem:[%s2759_s27 + $0x9a8] sm:$0xff] %v794_v53  ;;  %v922_v53 = vld [vmem:[%s2754_s26 + $0x5c28] sm:$0xff] }
 0x146   : > { %797 = vst [vmem:[%s2759_s27 + $0x9b0] sm:$0xff] %v796_v54  ;;  %v924_v54 = vld [vmem:[%s2754_s26 + $0x5c30] sm:$0xff] }
 0x147   : > { %799 = vst [vmem:[%s2759_s27 + $0x9b8] sm:$0xff] %v798_v55  ;;  %v926_v55 = vld [vmem:[%s2754_s26 + $0x5c38] sm:$0xff] }
 0x148   : > { %801 = vst [vmem:[%s2759_s27 + $0x9c0] sm:$0xff] %v800_v56  ;;  %v928_v56 = vld [vmem:[%s2754_s26 + $0x5c40] sm:$0xff] }
 0x149   : > { %803 = vst [vmem:[%s2759_s27 + $0x9c8] sm:$0xff] %v802_v57  ;;  %v930_v57 = vld [vmem:[%s2754_s26 + $0x5c48] sm:$0xff] }
 0x14a   : > { %805 = vst [vmem:[%s2759_s27 + $0x9d0] sm:$0xff] %v804_v58  ;;  %v932_v58 = vld [vmem:[%s2754_s26 + $0x5c50] sm:$0xff] }
 0x14b   : > { %807 = vst [vmem:[%s2759_s27 + $0x9d8] sm:$0xff] %v806_v59  ;;  %v934_v59 = vld [vmem:[%s2754_s26 + $0x5c58] sm:$0xff] }
 0x14c   : > { %809 = vst [vmem:[%s2759_s27 + $0x9e0] sm:$0xff] %v808_v60  ;;  %v936_v60 = vld [vmem:[%s2754_s26 + $0x5c60] sm:$0xff] }
 0x14d   : > { %811 = vst [vmem:[%s2759_s27 + $0x9e8] sm:$0xff] %v810_v61  ;;  %v938_v61 = vld [vmem:[%s2754_s26 + $0x5c68] sm:$0xff] }
 0x14e   : > { %813 = vst [vmem:[%s2759_s27 + $0x9f0] sm:$0xff] %v812_v62  ;;  %v940_v62 = vld [vmem:[%s2754_s26 + $0x5c70] sm:$0xff] }
 0x14f   : > { %815 = vst [vmem:[%s2759_s27 + $0x9f8] sm:$0xff] %v814_v63  ;;  %v942_v63 = vld [vmem:[%s2754_s26 + $0x5c78] sm:$0xff] }
 0x150   : > { %817 = vst [vmem:[%s2759_s27 + $0xa00] sm:$0xff] %v816_v0  ;;  %v944_v0 = vld [vmem:[%s2754_s26 + $0x6000] sm:$0xff] }
 0x151   : > { %819 = vst [vmem:[%s2759_s27 + $0xa08] sm:$0xff] %v818_v1  ;;  %v946_v1 = vld [vmem:[%s2754_s26 + $0x6008] sm:$0xff] }
 0x152   : > { %821 = vst [vmem:[%s2759_s27 + $0xa10] sm:$0xff] %v820_v2  ;;  %v948_v2 = vld [vmem:[%s2754_s26 + $0x6010] sm:$0xff] }
 0x153   : > { %823 = vst [vmem:[%s2759_s27 + $0xa18] sm:$0xff] %v822_v3  ;;  %v950_v3 = vld [vmem:[%s2754_s26 + $0x6018] sm:$0xff] }
 0x154   : > { %825 = vst [vmem:[%s2759_s27 + $0xa20] sm:$0xff] %v824_v4  ;;  %v952_v4 = vld [vmem:[%s2754_s26 + $0x6020] sm:$0xff] }
 0x155   : > { %827 = vst [vmem:[%s2759_s27 + $0xa28] sm:$0xff] %v826_v5  ;;  %v954_v5 = vld [vmem:[%s2754_s26 + $0x6028] sm:$0xff] }
 0x156   : > { %829 = vst [vmem:[%s2759_s27 + $0xa30] sm:$0xff] %v828_v6  ;;  %v956_v6 = vld [vmem:[%s2754_s26 + $0x6030] sm:$0xff] }
 0x157   : > { %831 = vst [vmem:[%s2759_s27 + $0xa38] sm:$0xff] %v830_v7  ;;  %v958_v7 = vld [vmem:[%s2754_s26 + $0x6038] sm:$0xff] }
 0x158   : > { %833 = vst [vmem:[%s2759_s27 + $0xa40] sm:$0xff] %v832_v8  ;;  %v960_v8 = vld [vmem:[%s2754_s26 + $0x6040] sm:$0xff] }
 0x159   : > { %835 = vst [vmem:[%s2759_s27 + $0xa48] sm:$0xff] %v834_v9  ;;  %v962_v9 = vld [vmem:[%s2754_s26 + $0x6048] sm:$0xff] }
 0x15a   : > { %837 = vst [vmem:[%s2759_s27 + $0xa50] sm:$0xff] %v836_v10  ;;  %v964_v10 = vld [vmem:[%s2754_s26 + $0x6050] sm:$0xff] }
 0x15b   : > { %839 = vst [vmem:[%s2759_s27 + $0xa58] sm:$0xff] %v838_v11  ;;  %v966_v11 = vld [vmem:[%s2754_s26 + $0x6058] sm:$0xff] }
 0x15c   : > { %841 = vst [vmem:[%s2759_s27 + $0xa60] sm:$0xff] %v840_v12  ;;  %v968_v12 = vld [vmem:[%s2754_s26 + $0x6060] sm:$0xff] }
 0x15d   : > { %843 = vst [vmem:[%s2759_s27 + $0xa68] sm:$0xff] %v842_v13  ;;  %v970_v13 = vld [vmem:[%s2754_s26 + $0x6068] sm:$0xff] }
 0x15e   : > { %845 = vst [vmem:[%s2759_s27 + $0xa70] sm:$0xff] %v844_v14  ;;  %v972_v14 = vld [vmem:[%s2754_s26 + $0x6070] sm:$0xff] }
 0x15f   : > { %847 = vst [vmem:[%s2759_s27 + $0xa78] sm:$0xff] %v846_v15  ;;  %v974_v15 = vld [vmem:[%s2754_s26 + $0x6078] sm:$0xff] }
 0x160   : > { %849 = vst [vmem:[%s2759_s27 + $0xa80] sm:$0xff] %v848_v16  ;;  %v976_v16 = vld [vmem:[%s2754_s26 + $0x6400] sm:$0xff] }
 0x161   : > { %851 = vst [vmem:[%s2759_s27 + $0xa88] sm:$0xff] %v850_v17  ;;  %v978_v17 = vld [vmem:[%s2754_s26 + $0x6408] sm:$0xff] }
 0x162   : > { %853 = vst [vmem:[%s2759_s27 + $0xa90] sm:$0xff] %v852_v18  ;;  %v980_v18 = vld [vmem:[%s2754_s26 + $0x6410] sm:$0xff] }
 0x163   : > { %855 = vst [vmem:[%s2759_s27 + $0xa98] sm:$0xff] %v854_v19  ;;  %v982_v19 = vld [vmem:[%s2754_s26 + $0x6418] sm:$0xff] }
 0x164   : > { %857 = vst [vmem:[%s2759_s27 + $0xaa0] sm:$0xff] %v856_v20  ;;  %v984_v20 = vld [vmem:[%s2754_s26 + $0x6420] sm:$0xff] }
 0x165   : > { %859 = vst [vmem:[%s2759_s27 + $0xaa8] sm:$0xff] %v858_v21  ;;  %v986_v21 = vld [vmem:[%s2754_s26 + $0x6428] sm:$0xff] }
 0x166   : > { %861 = vst [vmem:[%s2759_s27 + $0xab0] sm:$0xff] %v860_v22  ;;  %v988_v22 = vld [vmem:[%s2754_s26 + $0x6430] sm:$0xff] }
 0x167   : > { %863 = vst [vmem:[%s2759_s27 + $0xab8] sm:$0xff] %v862_v23  ;;  %v990_v23 = vld [vmem:[%s2754_s26 + $0x6438] sm:$0xff] }
 0x168   : > { %865 = vst [vmem:[%s2759_s27 + $0xac0] sm:$0xff] %v864_v24  ;;  %v992_v24 = vld [vmem:[%s2754_s26 + $0x6440] sm:$0xff] }
 0x169   : > { %867 = vst [vmem:[%s2759_s27 + $0xac8] sm:$0xff] %v866_v25  ;;  %v994_v25 = vld [vmem:[%s2754_s26 + $0x6448] sm:$0xff] }
 0x16a   : > { %869 = vst [vmem:[%s2759_s27 + $0xad0] sm:$0xff] %v868_v26  ;;  %v996_v26 = vld [vmem:[%s2754_s26 + $0x6450] sm:$0xff] }
 0x16b   : > { %871 = vst [vmem:[%s2759_s27 + $0xad8] sm:$0xff] %v870_v27  ;;  %v998_v27 = vld [vmem:[%s2754_s26 + $0x6458] sm:$0xff] }
 0x16c   : > { %873 = vst [vmem:[%s2759_s27 + $0xae0] sm:$0xff] %v872_v28  ;;  %v1000_v28 = vld [vmem:[%s2754_s26 + $0x6460] sm:$0xff] }
 0x16d   : > { %875 = vst [vmem:[%s2759_s27 + $0xae8] sm:$0xff] %v874_v29  ;;  %v1002_v29 = vld [vmem:[%s2754_s26 + $0x6468] sm:$0xff] }
 0x16e   : > { %877 = vst [vmem:[%s2759_s27 + $0xaf0] sm:$0xff] %v876_v30  ;;  %v1004_v30 = vld [vmem:[%s2754_s26 + $0x6470] sm:$0xff] }
 0x16f   : > { %879 = vst [vmem:[%s2759_s27 + $0xaf8] sm:$0xff] %v878_v31  ;;  %v1006_v31 = vld [vmem:[%s2754_s26 + $0x6478] sm:$0xff] }
 0x170   : > { %881 = vst [vmem:[%s2759_s27 + $0xb00] sm:$0xff] %v880_v32  ;;  %v1008_v32 = vld [vmem:[%s2754_s26 + $0x6800] sm:$0xff] }
 0x171   : > { %883 = vst [vmem:[%s2759_s27 + $0xb08] sm:$0xff] %v882_v33  ;;  %v1010_v33 = vld [vmem:[%s2754_s26 + $0x6808] sm:$0xff] }
 0x172   : > { %885 = vst [vmem:[%s2759_s27 + $0xb10] sm:$0xff] %v884_v34  ;;  %v1012_v34 = vld [vmem:[%s2754_s26 + $0x6810] sm:$0xff] }
 0x173   : > { %887 = vst [vmem:[%s2759_s27 + $0xb18] sm:$0xff] %v886_v35  ;;  %v1014_v35 = vld [vmem:[%s2754_s26 + $0x6818] sm:$0xff] }
 0x174   : > { %889 = vst [vmem:[%s2759_s27 + $0xb20] sm:$0xff] %v888_v36  ;;  %v1016_v36 = vld [vmem:[%s2754_s26 + $0x6820] sm:$0xff] }
 0x175   : > { %891 = vst [vmem:[%s2759_s27 + $0xb28] sm:$0xff] %v890_v37  ;;  %v1018_v37 = vld [vmem:[%s2754_s26 + $0x6828] sm:$0xff] }
 0x176   : > { %893 = vst [vmem:[%s2759_s27 + $0xb30] sm:$0xff] %v892_v38  ;;  %v1020_v38 = vld [vmem:[%s2754_s26 + $0x6830] sm:$0xff] }
 0x177   : > { %895 = vst [vmem:[%s2759_s27 + $0xb38] sm:$0xff] %v894_v39  ;;  %v1022_v39 = vld [vmem:[%s2754_s26 + $0x6838] sm:$0xff] }
 0x178   : > { %897 = vst [vmem:[%s2759_s27 + $0xb40] sm:$0xff] %v896_v40  ;;  %v1024_v40 = vld [vmem:[%s2754_s26 + $0x6840] sm:$0xff] }
 0x179   : > { %899 = vst [vmem:[%s2759_s27 + $0xb48] sm:$0xff] %v898_v41  ;;  %v1026_v41 = vld [vmem:[%s2754_s26 + $0x6848] sm:$0xff] }
 0x17a   : > { %901 = vst [vmem:[%s2759_s27 + $0xb50] sm:$0xff] %v900_v42  ;;  %v1028_v42 = vld [vmem:[%s2754_s26 + $0x6850] sm:$0xff] }
 0x17b   : > { %903 = vst [vmem:[%s2759_s27 + $0xb58] sm:$0xff] %v902_v43  ;;  %v1030_v43 = vld [vmem:[%s2754_s26 + $0x6858] sm:$0xff] }
 0x17c   : > { %905 = vst [vmem:[%s2759_s27 + $0xb60] sm:$0xff] %v904_v44  ;;  %v1032_v44 = vld [vmem:[%s2754_s26 + $0x6860] sm:$0xff] }
 0x17d   : > { %907 = vst [vmem:[%s2759_s27 + $0xb68] sm:$0xff] %v906_v45  ;;  %v1034_v45 = vld [vmem:[%s2754_s26 + $0x6868] sm:$0xff] }
 0x17e   : > { %909 = vst [vmem:[%s2759_s27 + $0xb70] sm:$0xff] %v908_v46  ;;  %v1036_v46 = vld [vmem:[%s2754_s26 + $0x6870] sm:$0xff] }
 0x17f   : > { %911 = vst [vmem:[%s2759_s27 + $0xb78] sm:$0xff] %v910_v47  ;;  %v1038_v47 = vld [vmem:[%s2754_s26 + $0x6878] sm:$0xff] }
 0x180   : > { %913 = vst [vmem:[%s2759_s27 + $0xb80] sm:$0xff] %v912_v48  ;;  %v1040_v48 = vld [vmem:[%s2754_s26 + $0x6c00] sm:$0xff] }
 0x181   : > { %915 = vst [vmem:[%s2759_s27 + $0xb88] sm:$0xff] %v914_v49  ;;  %v1042_v49 = vld [vmem:[%s2754_s26 + $0x6c08] sm:$0xff] }
 0x182   : > { %917 = vst [vmem:[%s2759_s27 + $0xb90] sm:$0xff] %v916_v50  ;;  %v1044_v50 = vld [vmem:[%s2754_s26 + $0x6c10] sm:$0xff] }
 0x183   : > { %919 = vst [vmem:[%s2759_s27 + $0xb98] sm:$0xff] %v918_v51  ;;  %v1046_v51 = vld [vmem:[%s2754_s26 + $0x6c18] sm:$0xff] }
 0x184   : > { %921 = vst [vmem:[%s2759_s27 + $0xba0] sm:$0xff] %v920_v52  ;;  %v1048_v52 = vld [vmem:[%s2754_s26 + $0x6c20] sm:$0xff] }
 0x185   : > { %923 = vst [vmem:[%s2759_s27 + $0xba8] sm:$0xff] %v922_v53  ;;  %v1050_v53 = vld [vmem:[%s2754_s26 + $0x6c28] sm:$0xff] }
 0x186   : > { %925 = vst [vmem:[%s2759_s27 + $0xbb0] sm:$0xff] %v924_v54  ;;  %v1052_v54 = vld [vmem:[%s2754_s26 + $0x6c30] sm:$0xff] }
 0x187   : > { %927 = vst [vmem:[%s2759_s27 + $0xbb8] sm:$0xff] %v926_v55  ;;  %v1054_v55 = vld [vmem:[%s2754_s26 + $0x6c38] sm:$0xff] }
 0x188   : > { %929 = vst [vmem:[%s2759_s27 + $0xbc0] sm:$0xff] %v928_v56  ;;  %v1056_v56 = vld [vmem:[%s2754_s26 + $0x6c40] sm:$0xff] }
 0x189   : > { %931 = vst [vmem:[%s2759_s27 + $0xbc8] sm:$0xff] %v930_v57  ;;  %v1058_v57 = vld [vmem:[%s2754_s26 + $0x6c48] sm:$0xff] }
 0x18a   : > { %933 = vst [vmem:[%s2759_s27 + $0xbd0] sm:$0xff] %v932_v58  ;;  %v1060_v58 = vld [vmem:[%s2754_s26 + $0x6c50] sm:$0xff] }
 0x18b   : > { %935 = vst [vmem:[%s2759_s27 + $0xbd8] sm:$0xff] %v934_v59  ;;  %v1062_v59 = vld [vmem:[%s2754_s26 + $0x6c58] sm:$0xff] }
 0x18c   : > { %937 = vst [vmem:[%s2759_s27 + $0xbe0] sm:$0xff] %v936_v60  ;;  %v1064_v60 = vld [vmem:[%s2754_s26 + $0x6c60] sm:$0xff] }
 0x18d   : > { %939 = vst [vmem:[%s2759_s27 + $0xbe8] sm:$0xff] %v938_v61  ;;  %v1066_v61 = vld [vmem:[%s2754_s26 + $0x6c68] sm:$0xff] }
 0x18e   : > { %941 = vst [vmem:[%s2759_s27 + $0xbf0] sm:$0xff] %v940_v62  ;;  %v1068_v62 = vld [vmem:[%s2754_s26 + $0x6c70] sm:$0xff] }
 0x18f   : > { %943 = vst [vmem:[%s2759_s27 + $0xbf8] sm:$0xff] %v942_v63  ;;  %v1070_v63 = vld [vmem:[%s2754_s26 + $0x6c78] sm:$0xff] }
 0x190   : > { %945 = vst [vmem:[%s2759_s27 + $0xc00] sm:$0xff] %v944_v0  ;;  %v1072_v0 = vld [vmem:[%s2754_s26 + $0x7000] sm:$0xff] }
 0x191   : > { %947 = vst [vmem:[%s2759_s27 + $0xc08] sm:$0xff] %v946_v1  ;;  %v1074_v1 = vld [vmem:[%s2754_s26 + $0x7008] sm:$0xff] }
 0x192   : > { %949 = vst [vmem:[%s2759_s27 + $0xc10] sm:$0xff] %v948_v2  ;;  %v1076_v2 = vld [vmem:[%s2754_s26 + $0x7010] sm:$0xff] }
 0x193   : > { %951 = vst [vmem:[%s2759_s27 + $0xc18] sm:$0xff] %v950_v3  ;;  %v1078_v3 = vld [vmem:[%s2754_s26 + $0x7018] sm:$0xff] }
 0x194   : > { %953 = vst [vmem:[%s2759_s27 + $0xc20] sm:$0xff] %v952_v4  ;;  %v1080_v4 = vld [vmem:[%s2754_s26 + $0x7020] sm:$0xff] }
 0x195   : > { %955 = vst [vmem:[%s2759_s27 + $0xc28] sm:$0xff] %v954_v5  ;;  %v1082_v5 = vld [vmem:[%s2754_s26 + $0x7028] sm:$0xff] }
 0x196   : > { %957 = vst [vmem:[%s2759_s27 + $0xc30] sm:$0xff] %v956_v6  ;;  %v1084_v6 = vld [vmem:[%s2754_s26 + $0x7030] sm:$0xff] }
 0x197   : > { %959 = vst [vmem:[%s2759_s27 + $0xc38] sm:$0xff] %v958_v7  ;;  %v1086_v7 = vld [vmem:[%s2754_s26 + $0x7038] sm:$0xff] }
 0x198   : > { %961 = vst [vmem:[%s2759_s27 + $0xc40] sm:$0xff] %v960_v8  ;;  %v1088_v8 = vld [vmem:[%s2754_s26 + $0x7040] sm:$0xff] }
 0x199   : > { %963 = vst [vmem:[%s2759_s27 + $0xc48] sm:$0xff] %v962_v9  ;;  %v1090_v9 = vld [vmem:[%s2754_s26 + $0x7048] sm:$0xff] }
 0x19a   : > { %965 = vst [vmem:[%s2759_s27 + $0xc50] sm:$0xff] %v964_v10  ;;  %v1092_v10 = vld [vmem:[%s2754_s26 + $0x7050] sm:$0xff] }
 0x19b   : > { %967 = vst [vmem:[%s2759_s27 + $0xc58] sm:$0xff] %v966_v11  ;;  %v1094_v11 = vld [vmem:[%s2754_s26 + $0x7058] sm:$0xff] }
 0x19c   : > { %969 = vst [vmem:[%s2759_s27 + $0xc60] sm:$0xff] %v968_v12  ;;  %v1096_v12 = vld [vmem:[%s2754_s26 + $0x7060] sm:$0xff] }
 0x19d   : > { %971 = vst [vmem:[%s2759_s27 + $0xc68] sm:$0xff] %v970_v13  ;;  %v1098_v13 = vld [vmem:[%s2754_s26 + $0x7068] sm:$0xff] }
 0x19e   : > { %973 = vst [vmem:[%s2759_s27 + $0xc70] sm:$0xff] %v972_v14  ;;  %v1100_v14 = vld [vmem:[%s2754_s26 + $0x7070] sm:$0xff] }
 0x19f   : > { %975 = vst [vmem:[%s2759_s27 + $0xc78] sm:$0xff] %v974_v15  ;;  %v1102_v15 = vld [vmem:[%s2754_s26 + $0x7078] sm:$0xff] }
 0x1a0   : > { %977 = vst [vmem:[%s2759_s27 + $0xc80] sm:$0xff] %v976_v16  ;;  %v1104_v16 = vld [vmem:[%s2754_s26 + $0x7400] sm:$0xff] }
 0x1a1   : > { %979 = vst [vmem:[%s2759_s27 + $0xc88] sm:$0xff] %v978_v17  ;;  %v1106_v17 = vld [vmem:[%s2754_s26 + $0x7408] sm:$0xff] }
 0x1a2   : > { %981 = vst [vmem:[%s2759_s27 + $0xc90] sm:$0xff] %v980_v18  ;;  %v1108_v18 = vld [vmem:[%s2754_s26 + $0x7410] sm:$0xff] }
 0x1a3   : > { %983 = vst [vmem:[%s2759_s27 + $0xc98] sm:$0xff] %v982_v19  ;;  %v1110_v19 = vld [vmem:[%s2754_s26 + $0x7418] sm:$0xff] }
 0x1a4   : > { %985 = vst [vmem:[%s2759_s27 + $0xca0] sm:$0xff] %v984_v20  ;;  %v1112_v20 = vld [vmem:[%s2754_s26 + $0x7420] sm:$0xff] }
 0x1a5   : > { %987 = vst [vmem:[%s2759_s27 + $0xca8] sm:$0xff] %v986_v21  ;;  %v1114_v21 = vld [vmem:[%s2754_s26 + $0x7428] sm:$0xff] }
 0x1a6   : > { %989 = vst [vmem:[%s2759_s27 + $0xcb0] sm:$0xff] %v988_v22  ;;  %v1116_v22 = vld [vmem:[%s2754_s26 + $0x7430] sm:$0xff] }
 0x1a7   : > { %991 = vst [vmem:[%s2759_s27 + $0xcb8] sm:$0xff] %v990_v23  ;;  %v1118_v23 = vld [vmem:[%s2754_s26 + $0x7438] sm:$0xff] }
 0x1a8   : > { %993 = vst [vmem:[%s2759_s27 + $0xcc0] sm:$0xff] %v992_v24  ;;  %v1120_v24 = vld [vmem:[%s2754_s26 + $0x7440] sm:$0xff] }
 0x1a9   : > { %995 = vst [vmem:[%s2759_s27 + $0xcc8] sm:$0xff] %v994_v25  ;;  %v1122_v25 = vld [vmem:[%s2754_s26 + $0x7448] sm:$0xff] }
 0x1aa   : > { %997 = vst [vmem:[%s2759_s27 + $0xcd0] sm:$0xff] %v996_v26  ;;  %v1124_v26 = vld [vmem:[%s2754_s26 + $0x7450] sm:$0xff] }
 0x1ab   : > { %999 = vst [vmem:[%s2759_s27 + $0xcd8] sm:$0xff] %v998_v27  ;;  %v1126_v27 = vld [vmem:[%s2754_s26 + $0x7458] sm:$0xff] }
 0x1ac   : > { %1001 = vst [vmem:[%s2759_s27 + $0xce0] sm:$0xff] %v1000_v28  ;;  %v1128_v28 = vld [vmem:[%s2754_s26 + $0x7460] sm:$0xff] }
 0x1ad   : > { %1003 = vst [vmem:[%s2759_s27 + $0xce8] sm:$0xff] %v1002_v29  ;;  %v1130_v29 = vld [vmem:[%s2754_s26 + $0x7468] sm:$0xff] }
 0x1ae   : > { %1005 = vst [vmem:[%s2759_s27 + $0xcf0] sm:$0xff] %v1004_v30  ;;  %v1132_v30 = vld [vmem:[%s2754_s26 + $0x7470] sm:$0xff] }
 0x1af   : > { %1007 = vst [vmem:[%s2759_s27 + $0xcf8] sm:$0xff] %v1006_v31  ;;  %v1134_v31 = vld [vmem:[%s2754_s26 + $0x7478] sm:$0xff] }
 0x1b0   : > { %1009 = vst [vmem:[%s2759_s27 + $0xd00] sm:$0xff] %v1008_v32  ;;  %v1136_v32 = vld [vmem:[%s2754_s26 + $0x7800] sm:$0xff] }
 0x1b1   : > { %1011 = vst [vmem:[%s2759_s27 + $0xd08] sm:$0xff] %v1010_v33  ;;  %v1138_v33 = vld [vmem:[%s2754_s26 + $0x7808] sm:$0xff] }
 0x1b2   : > { %1013 = vst [vmem:[%s2759_s27 + $0xd10] sm:$0xff] %v1012_v34  ;;  %v1140_v34 = vld [vmem:[%s2754_s26 + $0x7810] sm:$0xff] }
 0x1b3   : > { %1015 = vst [vmem:[%s2759_s27 + $0xd18] sm:$0xff] %v1014_v35  ;;  %v1142_v35 = vld [vmem:[%s2754_s26 + $0x7818] sm:$0xff] }
 0x1b4   : > { %1017 = vst [vmem:[%s2759_s27 + $0xd20] sm:$0xff] %v1016_v36  ;;  %v1144_v36 = vld [vmem:[%s2754_s26 + $0x7820] sm:$0xff] }
 0x1b5   : > { %1019 = vst [vmem:[%s2759_s27 + $0xd28] sm:$0xff] %v1018_v37  ;;  %v1146_v37 = vld [vmem:[%s2754_s26 + $0x7828] sm:$0xff] }
 0x1b6   : > { %1021 = vst [vmem:[%s2759_s27 + $0xd30] sm:$0xff] %v1020_v38  ;;  %v1148_v38 = vld [vmem:[%s2754_s26 + $0x7830] sm:$0xff] }
 0x1b7   : > { %1023 = vst [vmem:[%s2759_s27 + $0xd38] sm:$0xff] %v1022_v39  ;;  %v1150_v39 = vld [vmem:[%s2754_s26 + $0x7838] sm:$0xff] }
 0x1b8   : > { %1025 = vst [vmem:[%s2759_s27 + $0xd40] sm:$0xff] %v1024_v40  ;;  %v1152_v40 = vld [vmem:[%s2754_s26 + $0x7840] sm:$0xff] }
 0x1b9   : > { %1027 = vst [vmem:[%s2759_s27 + $0xd48] sm:$0xff] %v1026_v41  ;;  %v1154_v41 = vld [vmem:[%s2754_s26 + $0x7848] sm:$0xff] }
 0x1ba   : > { %1029 = vst [vmem:[%s2759_s27 + $0xd50] sm:$0xff] %v1028_v42  ;;  %v1156_v42 = vld [vmem:[%s2754_s26 + $0x7850] sm:$0xff] }
 0x1bb   : > { %1031 = vst [vmem:[%s2759_s27 + $0xd58] sm:$0xff] %v1030_v43  ;;  %v1158_v43 = vld [vmem:[%s2754_s26 + $0x7858] sm:$0xff] }
 0x1bc   : > { %1033 = vst [vmem:[%s2759_s27 + $0xd60] sm:$0xff] %v1032_v44  ;;  %v1160_v44 = vld [vmem:[%s2754_s26 + $0x7860] sm:$0xff] }
 0x1bd   : > { %1035 = vst [vmem:[%s2759_s27 + $0xd68] sm:$0xff] %v1034_v45  ;;  %v1162_v45 = vld [vmem:[%s2754_s26 + $0x7868] sm:$0xff] }
 0x1be   : > { %1037 = vst [vmem:[%s2759_s27 + $0xd70] sm:$0xff] %v1036_v46  ;;  %v1164_v46 = vld [vmem:[%s2754_s26 + $0x7870] sm:$0xff] }
 0x1bf   : > { %1039 = vst [vmem:[%s2759_s27 + $0xd78] sm:$0xff] %v1038_v47  ;;  %v1166_v47 = vld [vmem:[%s2754_s26 + $0x7878] sm:$0xff] }
 0x1c0   : > { %1041 = vst [vmem:[%s2759_s27 + $0xd80] sm:$0xff] %v1040_v48  ;;  %v1168_v48 = vld [vmem:[%s2754_s26 + $0x7c00] sm:$0xff] }
 0x1c1   : > { %1043 = vst [vmem:[%s2759_s27 + $0xd88] sm:$0xff] %v1042_v49  ;;  %v1170_v49 = vld [vmem:[%s2754_s26 + $0x7c08] sm:$0xff] }
 0x1c2   : > { %1045 = vst [vmem:[%s2759_s27 + $0xd90] sm:$0xff] %v1044_v50  ;;  %v1172_v50 = vld [vmem:[%s2754_s26 + $0x7c10] sm:$0xff] }
 0x1c3   : > { %1047 = vst [vmem:[%s2759_s27 + $0xd98] sm:$0xff] %v1046_v51  ;;  %v1174_v51 = vld [vmem:[%s2754_s26 + $0x7c18] sm:$0xff] }
 0x1c4   : > { %1049 = vst [vmem:[%s2759_s27 + $0xda0] sm:$0xff] %v1048_v52  ;;  %v1176_v52 = vld [vmem:[%s2754_s26 + $0x7c20] sm:$0xff] }
 0x1c5   : > { %1051 = vst [vmem:[%s2759_s27 + $0xda8] sm:$0xff] %v1050_v53  ;;  %v1178_v53 = vld [vmem:[%s2754_s26 + $0x7c28] sm:$0xff] }
 0x1c6   : > { %1053 = vst [vmem:[%s2759_s27 + $0xdb0] sm:$0xff] %v1052_v54  ;;  %v1180_v54 = vld [vmem:[%s2754_s26 + $0x7c30] sm:$0xff] }
 0x1c7   : > { %1055 = vst [vmem:[%s2759_s27 + $0xdb8] sm:$0xff] %v1054_v55  ;;  %v1182_v55 = vld [vmem:[%s2754_s26 + $0x7c38] sm:$0xff] }
 0x1c8   : > { %1057 = vst [vmem:[%s2759_s27 + $0xdc0] sm:$0xff] %v1056_v56  ;;  %v1184_v56 = vld [vmem:[%s2754_s26 + $0x7c40] sm:$0xff] }
 0x1c9   : > { %1059 = vst [vmem:[%s2759_s27 + $0xdc8] sm:$0xff] %v1058_v57  ;;  %v1186_v57 = vld [vmem:[%s2754_s26 + $0x7c48] sm:$0xff] }
 0x1ca   : > { %1061 = vst [vmem:[%s2759_s27 + $0xdd0] sm:$0xff] %v1060_v58  ;;  %v1188_v58 = vld [vmem:[%s2754_s26 + $0x7c50] sm:$0xff] }
 0x1cb   : > { %1063 = vst [vmem:[%s2759_s27 + $0xdd8] sm:$0xff] %v1062_v59  ;;  %v1190_v59 = vld [vmem:[%s2754_s26 + $0x7c58] sm:$0xff] }
 0x1cc   : > { %1065 = vst [vmem:[%s2759_s27 + $0xde0] sm:$0xff] %v1064_v60  ;;  %v1192_v60 = vld [vmem:[%s2754_s26 + $0x7c60] sm:$0xff] }
 0x1cd   : > { %1067 = vst [vmem:[%s2759_s27 + $0xde8] sm:$0xff] %v1066_v61  ;;  %v1194_v61 = vld [vmem:[%s2754_s26 + $0x7c68] sm:$0xff] }
 0x1ce   : > { %1069 = vst [vmem:[%s2759_s27 + $0xdf0] sm:$0xff] %v1068_v62  ;;  %v1196_v62 = vld [vmem:[%s2754_s26 + $0x7c70] sm:$0xff] }
 0x1cf   : > { %1071 = vst [vmem:[%s2759_s27 + $0xdf8] sm:$0xff] %v1070_v63  ;;  %v1198_v63 = vld [vmem:[%s2754_s26 + $0x7c78] sm:$0xff] }
 0x1d0   : > { %1073 = vst [vmem:[%s2759_s27 + $0xe00] sm:$0xff] %v1072_v0 }
 0x1d1   : > { %1075 = vst [vmem:[%s2759_s27 + $0xe08] sm:$0xff] %v1074_v1 }
 0x1d2   : > { %1077 = vst [vmem:[%s2759_s27 + $0xe10] sm:$0xff] %v1076_v2 }
 0x1d3   : > { %1079 = vst [vmem:[%s2759_s27 + $0xe18] sm:$0xff] %v1078_v3 }
 0x1d4   : > { %1081 = vst [vmem:[%s2759_s27 + $0xe20] sm:$0xff] %v1080_v4 }
 0x1d5   : > { %1083 = vst [vmem:[%s2759_s27 + $0xe28] sm:$0xff] %v1082_v5 }
 0x1d6   : > { %1085 = vst [vmem:[%s2759_s27 + $0xe30] sm:$0xff] %v1084_v6 }
 0x1d7   : > { %1087 = vst [vmem:[%s2759_s27 + $0xe38] sm:$0xff] %v1086_v7 }
 0x1d8   : > { %1089 = vst [vmem:[%s2759_s27 + $0xe40] sm:$0xff] %v1088_v8 }
 0x1d9   : > { %1091 = vst [vmem:[%s2759_s27 + $0xe48] sm:$0xff] %v1090_v9 }
 0x1da   : > { %1093 = vst [vmem:[%s2759_s27 + $0xe50] sm:$0xff] %v1092_v10 }
 0x1db   : > { %1095 = vst [vmem:[%s2759_s27 + $0xe58] sm:$0xff] %v1094_v11 }
 0x1dc   : > { %1097 = vst [vmem:[%s2759_s27 + $0xe60] sm:$0xff] %v1096_v12 }
 0x1dd   : > { %1099 = vst [vmem:[%s2759_s27 + $0xe68] sm:$0xff] %v1098_v13 }
 0x1de   : > { %1101 = vst [vmem:[%s2759_s27 + $0xe70] sm:$0xff] %v1100_v14 }
 0x1df   : > { %1103 = vst [vmem:[%s2759_s27 + $0xe78] sm:$0xff] %v1102_v15 }
 0x1e0   : > { %1105 = vst [vmem:[%s2759_s27 + $0xe80] sm:$0xff] %v1104_v16 }
 0x1e1   : > { %1107 = vst [vmem:[%s2759_s27 + $0xe88] sm:$0xff] %v1106_v17 }
 0x1e2   : > { %1109 = vst [vmem:[%s2759_s27 + $0xe90] sm:$0xff] %v1108_v18 }
 0x1e3   : > { %1111 = vst [vmem:[%s2759_s27 + $0xe98] sm:$0xff] %v1110_v19 }
 0x1e4   : > { %1113 = vst [vmem:[%s2759_s27 + $0xea0] sm:$0xff] %v1112_v20 }
 0x1e5   : > { %1115 = vst [vmem:[%s2759_s27 + $0xea8] sm:$0xff] %v1114_v21 }
 0x1e6   : > { %1117 = vst [vmem:[%s2759_s27 + $0xeb0] sm:$0xff] %v1116_v22 }
 0x1e7   : > { %1119 = vst [vmem:[%s2759_s27 + $0xeb8] sm:$0xff] %v1118_v23 }
 0x1e8   : > { %1121 = vst [vmem:[%s2759_s27 + $0xec0] sm:$0xff] %v1120_v24 }
 0x1e9   : > { %1123 = vst [vmem:[%s2759_s27 + $0xec8] sm:$0xff] %v1122_v25 }
 0x1ea   : > { %1125 = vst [vmem:[%s2759_s27 + $0xed0] sm:$0xff] %v1124_v26 }
 0x1eb   : > { %1127 = vst [vmem:[%s2759_s27 + $0xed8] sm:$0xff] %v1126_v27 }
 0x1ec   : > { %1129 = vst [vmem:[%s2759_s27 + $0xee0] sm:$0xff] %v1128_v28 }
 0x1ed   : > { %1131 = vst [vmem:[%s2759_s27 + $0xee8] sm:$0xff] %v1130_v29 }
 0x1ee   : > { %1133 = vst [vmem:[%s2759_s27 + $0xef0] sm:$0xff] %v1132_v30 }
 0x1ef   : > { %1135 = vst [vmem:[%s2759_s27 + $0xef8] sm:$0xff] %v1134_v31 }
 0x1f0   : > { %1137 = vst [vmem:[%s2759_s27 + $0xf00] sm:$0xff] %v1136_v32 }
 0x1f1   : > { %1139 = vst [vmem:[%s2759_s27 + $0xf08] sm:$0xff] %v1138_v33 }
 0x1f2   : > { %1141 = vst [vmem:[%s2759_s27 + $0xf10] sm:$0xff] %v1140_v34 }
 0x1f3   : > { %1143 = vst [vmem:[%s2759_s27 + $0xf18] sm:$0xff] %v1142_v35 }
 0x1f4   : > { %1145 = vst [vmem:[%s2759_s27 + $0xf20] sm:$0xff] %v1144_v36 }
 0x1f5   : > { %1147 = vst [vmem:[%s2759_s27 + $0xf28] sm:$0xff] %v1146_v37 }
 0x1f6   : > { %1149 = vst [vmem:[%s2759_s27 + $0xf30] sm:$0xff] %v1148_v38 }
 0x1f7   : > { %1151 = vst [vmem:[%s2759_s27 + $0xf38] sm:$0xff] %v1150_v39 }
 0x1f8   : > { %1153 = vst [vmem:[%s2759_s27 + $0xf40] sm:$0xff] %v1152_v40 }
 0x1f9   : > { %1155 = vst [vmem:[%s2759_s27 + $0xf48] sm:$0xff] %v1154_v41 }
 0x1fa   : > { %1157 = vst [vmem:[%s2759_s27 + $0xf50] sm:$0xff] %v1156_v42 }
 0x1fb   : > { %1159 = vst [vmem:[%s2759_s27 + $0xf58] sm:$0xff] %v1158_v43 }
 0x1fc   : > { %1161 = vst [vmem:[%s2759_s27 + $0xf60] sm:$0xff] %v1160_v44 }
 0x1fd   : > { %1163 = vst [vmem:[%s2759_s27 + $0xf68] sm:$0xff] %v1162_v45 }
 0x1fe   : > { %1165 = vst [vmem:[%s2759_s27 + $0xf70] sm:$0xff] %v1164_v46 }
 0x1ff   : > { %1167 = vst [vmem:[%s2759_s27 + $0xf78] sm:$0xff] %v1166_v47 }
 0x200   : > { %1169 = vst [vmem:[%s2759_s27 + $0xf80] sm:$0xff] %v1168_v48 }
 0x201   : > { %1171 = vst [vmem:[%s2759_s27 + $0xf88] sm:$0xff] %v1170_v49 }
 0x202   : > { %1173 = vst [vmem:[%s2759_s27 + $0xf90] sm:$0xff] %v1172_v50 }
 0x203   : > { %1175 = vst [vmem:[%s2759_s27 + $0xf98] sm:$0xff] %v1174_v51 }
 0x204   : > { %1177 = vst [vmem:[%s2759_s27 + $0xfa0] sm:$0xff] %v1176_v52 }
 0x205   : > { %1179 = vst [vmem:[%s2759_s27 + $0xfa8] sm:$0xff] %v1178_v53 }
 0x206   : > { %1181 = vst [vmem:[%s2759_s27 + $0xfb0] sm:$0xff] %v1180_v54 }
 0x207   : > { %1183 = vst [vmem:[%s2759_s27 + $0xfb8] sm:$0xff] %v1182_v55 }
 0x208   : > { %1185 = vst [vmem:[%s2759_s27 + $0xfc0] sm:$0xff] %v1184_v56 }
 0x209   : > { %1187 = vst [vmem:[%s2759_s27 + $0xfc8] sm:$0xff] %v1186_v57 }
 0x20a   : > { %1189 = vst [vmem:[%s2759_s27 + $0xfd0] sm:$0xff] %v1188_v58 }
 0x20b   : > { %1191 = vst [vmem:[%s2759_s27 + $0xfd8] sm:$0xff] %v1190_v59 }
 0x20c   : > { %1193 = vst [vmem:[%s2759_s27 + $0xfe0] sm:$0xff] %v1192_v60 }
 0x20d   : > { %1195 = vst [vmem:[%s2759_s27 + $0xfe8] sm:$0xff] %v1194_v61 }
 0x20e   : > { %1197 = vst [vmem:[%s2759_s27 + $0xff0] sm:$0xff] %v1196_v62 }
 0x20f   : > { %1199 = vst [vmem:[%s2759_s27 + $0xff8] sm:$0xff] %v1198_v63 }
 0x210 PF: > { %p2601_p6 = scmp.ge.s32.totalorder %s2689_s16, 1  ;;  %p1212_p7 = scmp.lt.s32.totalorder %s2689_s16, 9 }
 0x212   : > { %p1213_p8 = pnand %p2601_p6, %p1212_p7 }
 0x213   : > { %s1219_s28 = sand.u32 (!%p1213_p8), 1, %s2673_s12   ;;  %s2603_s8 = sshll.u32 (!%p1213_p8), %s2681_s14, 4 }
 0x214   : > { %1216 = sbr.rel (%p1213_p8) target bundleno = 943 (0x3af), region = 51  ;;  %s2602_s29 = sshll.u32 (!%p1213_p8), %s1219_s28, 12 }
 0x215   : > { %s3785_s30 = scalar_lea.vmem (!%p1213_p8), [#allocation2], %s2602_s29  ;;  %p4155_p9 = scmp.lt.s32.totalorder (!%p1213_p8), %s2603_s8, 127 }
 0x219   : > { %v1519_v0 = vld [vmem:[%s3785_s30 + $0x788] sm:$0xff]  ;;  %v1518_v4 = vld [vmem:[%s3785_s30 + $0x780] sm:$0xff]  ;;  %v1521_v61 = vld [vmem:[%s3785_s30 + $0x798] sm:$0xff]  ;;  %s4431_s8 = smov (!%p4155_p9, %s2603_s8), 127 }
 0x21a   : > { %v1503_v1 = vld [vmem:[%s3785_s30 + $0x708] sm:$0xff]  ;;  %1866 = vmatpush.msra.mxu2 %v1519_v0  ;;  %1826 = vmatpush.msra.mxu0 %v1518_v4  ;;  %v1502_v7 = vld [vmem:[%s3785_s30 + $0x700] sm:$0xff]  ;;  %v1777_v62 = vld [vmem:[%s3785_s30 + $0xf98] sm:$0xff]  ;;  %s4185_s12 = scalar_lea.vmem %s4421_s2, %s4431_s8  ;;  %s2605_s14 = sshll.u32 %s4431_s8, 3 }
 0x21b   : > { %v1775_v2 = vld [vmem:[%s3785_s30 + $0xf88] sm:$0xff]  ;;  %v1774_v9 = vld [vmem:[%s3785_s30 + $0xf80] sm:$0xff]  ;;  %s4219_s21 = scalar_lea.vmem %s4422_s3, %s2605_s14 }
 0x21c   : > { %1886 = vmatpush.msra.mxu3 %v1775_v2  ;;  %v1759_v3 = vld [vmem:[%s3785_s30 + $0xf08] sm:$0xff]  ;;  %1867 = vmatpush.msra.mxu2 %v1503_v1  ;;  %v1486_v11 = vld [vmem:[%s3785_s30 + $0x680] sm:$0xff]  ;;  %v1505_v1 = vld [vmem:[%s3785_s30 + $0x718] sm:$0xff] }
 0x21d   : > { %v1487_v5 = vld [vmem:[%s3785_s30 + $0x688] sm:$0xff]  ;;  %1827 = vmatpush.msra.mxu0 %v1502_v7  ;;  %1846 = vmatpush.msra.mxu1 %v1774_v9  ;;  %v1758_v12 = vld [vmem:[%s3785_s30 + $0xf00] sm:$0xff]  ;;  %v1761_v2 = vld [vmem:[%s3785_s30 + $0xf18] sm:$0xff] }
 0x21e   : > { %v1743_v6 = vld [vmem:[%s3785_s30 + $0xe88] sm:$0xff]  ;;  %1887 = vmatpush.msra.mxu3 %v1759_v3  ;;  %1868 = vmatpush.msra.mxu2 %v1487_v5  ;;  %v1470_v13 = vld [vmem:[%s3785_s30 + $0x600] sm:$0xff]  ;;  %v1520_v3 = vld [vmem:[%s3785_s30 + $0x790] sm:$0xff] }
 0x21f   : > { %v1471_v8 = vld [vmem:[%s3785_s30 + $0x608] sm:$0xff]  ;;  %v1742_v14 = vld [vmem:[%s3785_s30 + $0xe80] sm:$0xff]  ;;  %1828 = vmatpush.msra.mxu0 %v1486_v11  ;;  %1847 = vmatpush.msra.mxu1 %v1758_v12  ;;  %v1489_v5 = vld [vmem:[%s3785_s30 + $0x698] sm:$0xff] }
 0x220   : > { %v1727_v10 = vld [vmem:[%s3785_s30 + $0xe08] sm:$0xff]  ;;  %1888 = vmatpush.msra.mxu3 %v1743_v6  ;;  %1869 = vmatpush.msra.mxu2 %v1471_v8  ;;  %v1454_v17 = vld [vmem:[%s3785_s30 + $0x580] sm:$0xff]  ;;  %v1745_v6 = vld [vmem:[%s3785_s30 + $0xe98] sm:$0xff] }
 0x221   : > { %v1455_v15 = vld [vmem:[%s3785_s30 + $0x588] sm:$0xff]  ;;  %v1726_v18 = vld [vmem:[%s3785_s30 + $0xe00] sm:$0xff]  ;;  %1829 = vmatpush.msra.mxu0 %v1470_v13  ;;  %1848 = vmatpush.msra.mxu1 %v1742_v14  ;;  %v1504_v7 = vld [vmem:[%s3785_s30 + $0x710] sm:$0xff] }
 0x222   : > { %v1711_v16 = vld [vmem:[%s3785_s30 + $0xd88] sm:$0xff]  ;;  %1889 = vmatpush.msra.mxu3 %v1727_v10  ;;  %1870 = vmatpush.msra.mxu2 %v1455_v15  ;;  %v1438_v21 = vld [vmem:[%s3785_s30 + $0x500] sm:$0xff]  ;;  %v1776_v8 = vld [vmem:[%s3785_s30 + $0xf90] sm:$0xff] }
 0x223   : > { %v1439_v19 = vld [vmem:[%s3785_s30 + $0x508] sm:$0xff]  ;;  %v1710_v22 = vld [vmem:[%s3785_s30 + $0xd80] sm:$0xff]  ;;  %1830 = vmatpush.msra.mxu0 %v1454_v17  ;;  %1849 = vmatpush.msra.mxu1 %v1726_v18  ;;  %v1473_v9 = vld [vmem:[%s3785_s30 + $0x618] sm:$0xff] }
 0x224   : > { %v1695_v20 = vld [vmem:[%s3785_s30 + $0xd08] sm:$0xff]  ;;  %1890 = vmatpush.msra.mxu3 %v1711_v16  ;;  %1871 = vmatpush.msra.mxu2 %v1439_v19  ;;  %v1422_v25 = vld [vmem:[%s3785_s30 + $0x480] sm:$0xff]  ;;  %v1729_v10 = vld [vmem:[%s3785_s30 + $0xe18] sm:$0xff] }
 0x225   : > { %v1423_v23 = vld [vmem:[%s3785_s30 + $0x488] sm:$0xff]  ;;  %v1694_v26 = vld [vmem:[%s3785_s30 + $0xd00] sm:$0xff]  ;;  %1831 = vmatpush.msra.mxu0 %v1438_v21  ;;  %1850 = vmatpush.msra.mxu1 %v1710_v22  ;;  %v1488_v11 = vld [vmem:[%s3785_s30 + $0x690] sm:$0xff] }
 0x226   : > { %v1679_v24 = vld [vmem:[%s3785_s30 + $0xc88] sm:$0xff]  ;;  %1891 = vmatpush.msra.mxu3 %v1695_v20  ;;  %1872 = vmatpush.msra.mxu2 %v1423_v23  ;;  %v1406_v29 = vld [vmem:[%s3785_s30 + $0x400] sm:$0xff]  ;;  %v1760_v12 = vld [vmem:[%s3785_s30 + $0xf10] sm:$0xff] }
 0x227   : > { %v1407_v27 = vld [vmem:[%s3785_s30 + $0x408] sm:$0xff]  ;;  %v1678_v30 = vld [vmem:[%s3785_s30 + $0xc80] sm:$0xff]  ;;  %1832 = vmatpush.msra.mxu0 %v1422_v25  ;;  %1851 = vmatpush.msra.mxu1 %v1694_v26  ;;  %v1457_v13 = vld [vmem:[%s3785_s30 + $0x598] sm:$0xff] }
 0x228   : > { %v1663_v28 = vld [vmem:[%s3785_s30 + $0xc08] sm:$0xff]  ;;  %1892 = vmatpush.msra.mxu3 %v1679_v24  ;;  %1873 = vmatpush.msra.mxu2 %v1407_v27  ;;  %v1390_v33 = vld [vmem:[%s3785_s30 + $0x380] sm:$0xff]  ;;  %v1713_v14 = vld [vmem:[%s3785_s30 + $0xd98] sm:$0xff] }
 0x229   : > { %v1391_v31 = vld [vmem:[%s3785_s30 + $0x388] sm:$0xff]  ;;  %v1662_v34 = vld [vmem:[%s3785_s30 + $0xc00] sm:$0xff]  ;;  %1833 = vmatpush.msra.mxu0 %v1406_v29  ;;  %1852 = vmatpush.msra.mxu1 %v1678_v30  ;;  %v1472_v15 = vld [vmem:[%s3785_s30 + $0x610] sm:$0xff] }
 0x22a   : > { %v1647_v32 = vld [vmem:[%s3785_s30 + $0xb88] sm:$0xff]  ;;  %1893 = vmatpush.msra.mxu3 %v1663_v28  ;;  %1874 = vmatpush.msra.mxu2 %v1391_v31  ;;  %v1374_v37 = vld [vmem:[%s3785_s30 + $0x300] sm:$0xff]  ;;  %v1744_v16 = vld [vmem:[%s3785_s30 + $0xe90] sm:$0xff] }
 0x22b   : > { %v1375_v35 = vld [vmem:[%s3785_s30 + $0x308] sm:$0xff]  ;;  %v1646_v38 = vld [vmem:[%s3785_s30 + $0xb80] sm:$0xff]  ;;  %1834 = vmatpush.msra.mxu0 %v1390_v33  ;;  %1853 = vmatpush.msra.mxu1 %v1662_v34  ;;  %v1441_v17 = vld [vmem:[%s3785_s30 + $0x518] sm:$0xff] }
 0x22c   : > { %v1631_v36 = vld [vmem:[%s3785_s30 + $0xb08] sm:$0xff]  ;;  %1894 = vmatpush.msra.mxu3 %v1647_v32  ;;  %1875 = vmatpush.msra.mxu2 %v1375_v35  ;;  %v1358_v41 = vld [vmem:[%s3785_s30 + $0x280] sm:$0xff]  ;;  %v1697_v18 = vld [vmem:[%s3785_s30 + $0xd18] sm:$0xff] }
 0x22d   : > { %v1359_v39 = vld [vmem:[%s3785_s30 + $0x288] sm:$0xff]  ;;  %v1630_v42 = vld [vmem:[%s3785_s30 + $0xb00] sm:$0xff]  ;;  %1835 = vmatpush.msra.mxu0 %v1374_v37  ;;  %1854 = vmatpush.msra.mxu1 %v1646_v38  ;;  %v1456_v19 = vld [vmem:[%s3785_s30 + $0x590] sm:$0xff] }
 0x22e   : > { %v1615_v40 = vld [vmem:[%s3785_s30 + $0xa88] sm:$0xff]  ;;  %1895 = vmatpush.msra.mxu3 %v1631_v36  ;;  %1876 = vmatpush.msra.mxu2 %v1359_v39  ;;  %v1342_v45 = vld [vmem:[%s3785_s30 + $0x200] sm:$0xff]  ;;  %v1728_v20 = vld [vmem:[%s3785_s30 + $0xe10] sm:$0xff] }
 0x22f   : > { %v1343_v43 = vld [vmem:[%s3785_s30 + $0x208] sm:$0xff]  ;;  %v1614_v46 = vld [vmem:[%s3785_s30 + $0xa80] sm:$0xff]  ;;  %1836 = vmatpush.msra.mxu0 %v1358_v41  ;;  %1855 = vmatpush.msra.mxu1 %v1630_v42  ;;  %v1425_v21 = vld [vmem:[%s3785_s30 + $0x498] sm:$0xff] }
 0x230   : > { %v1599_v44 = vld [vmem:[%s3785_s30 + $0xa08] sm:$0xff]  ;;  %1896 = vmatpush.msra.mxu3 %v1615_v40  ;;  %1877 = vmatpush.msra.mxu2 %v1343_v43  ;;  %v1326_v49 = vld [vmem:[%s3785_s30 + $0x180] sm:$0xff]  ;;  %v1681_v22 = vld [vmem:[%s3785_s30 + $0xc98] sm:$0xff] }
 0x231   : > { %v1327_v47 = vld [vmem:[%s3785_s30 + $0x188] sm:$0xff]  ;;  %v1598_v50 = vld [vmem:[%s3785_s30 + $0xa00] sm:$0xff]  ;;  %1837 = vmatpush.msra.mxu0 %v1342_v45  ;;  %1856 = vmatpush.msra.mxu1 %v1614_v46  ;;  %v1440_v23 = vld [vmem:[%s3785_s30 + $0x510] sm:$0xff] }
 0x232   : > { %v1583_v48 = vld [vmem:[%s3785_s30 + $0x988] sm:$0xff]  ;;  %1897 = vmatpush.msra.mxu3 %v1599_v44  ;;  %1878 = vmatpush.msra.mxu2 %v1327_v47  ;;  %v1310_v53 = vld [vmem:[%s3785_s30 + $0x100] sm:$0xff]  ;;  %v1712_v24 = vld [vmem:[%s3785_s30 + $0xd90] sm:$0xff] }
 0x233   : > { %v1311_v51 = vld [vmem:[%s3785_s30 + $0x108] sm:$0xff]  ;;  %v1582_v54 = vld [vmem:[%s3785_s30 + $0x980] sm:$0xff]  ;;  %1838 = vmatpush.msra.mxu0 %v1326_v49  ;;  %1857 = vmatpush.msra.mxu1 %v1598_v50  ;;  %v1409_v25 = vld [vmem:[%s3785_s30 + $0x418] sm:$0xff] }
 0x234   : > { %v1567_v52 = vld [vmem:[%s3785_s30 + $0x908] sm:$0xff]  ;;  %1898 = vmatpush.msra.mxu3 %v1583_v48  ;;  %1879 = vmatpush.msra.mxu2 %v1311_v51  ;;  %v1294_v57 = vld [vmem:[%s3785_s30 + $0x80] sm:$0xff]  ;;  %v1665_v26 = vld [vmem:[%s3785_s30 + $0xc18] sm:$0xff] }
 0x235   : > { %v1295_v55 = vld [vmem:[%s3785_s30 + $0x88] sm:$0xff]  ;;  %v1566_v58 = vld [vmem:[%s3785_s30 + $0x900] sm:$0xff]  ;;  %1839 = vmatpush.msra.mxu0 %v1310_v53  ;;  %1858 = vmatpush.msra.mxu1 %v1582_v54  ;;  %v1424_v27 = vld [vmem:[%s3785_s30 + $0x490] sm:$0xff] }
 0x236   : > { %v1551_v56 = vld [vmem:[%s3785_s30 + $0x888] sm:$0xff]  ;;  %1899 = vmatpush.msra.mxu3 %v1567_v52  ;;  %1880 = vmatpush.msra.mxu2 %v1295_v55  ;;  %v1278_v63 = vld [vmem:[%s3785_s30] sm:$0xff]  ;;  %v1696_v28 = vld [vmem:[%s3785_s30 + $0xd10] sm:$0xff] }
 0x237   : > { %v1279_v59 = vld [vmem:[%s3785_s30 + $0x8] sm:$0xff]  ;;  %1840 = vmatpush.msra.mxu0 %v1294_v57  ;;  %1859 = vmatpush.msra.mxu1 %v1566_v58  ;;  %v1550_v0 = vld [vmem:[%s3785_s30 + $0x880] sm:$0xff]  ;;  %v1393_v29 = vld [vmem:[%s3785_s30 + $0x398] sm:$0xff] }
 0x238   : > { %v1535_v60 = vld [vmem:[%s3785_s30 + $0x808] sm:$0xff]  ;;  %1900 = vmatpush.msra.mxu3 %v1551_v56  ;;  %1881 = vmatpush.msra.mxu2 %v1279_v59  ;;  %v1534_v4 = vld [vmem:[%s3785_s30 + $0x800] sm:$0xff]  ;;  %v1649_v30 = vld [vmem:[%s3785_s30 + $0xb98] sm:$0xff] }
 0x239   : > { %1841 = vmatpush.msra.mxu0 %v1278_v63  ;;  %1860 = vmatpush.msra.mxu1 %v1550_v0  ;;  %v1408_v31 = vld [vmem:[%s3785_s30 + $0x410] sm:$0xff]  ;;  %v1377_v33 = vld [vmem:[%s3785_s30 + $0x318] sm:$0xff]  ;;  %v3909_v55 = vld [vmem:[%s4419_s0] sm:$0xff] }
 0x23a   : > { %1901 = vmatpush.msra.mxu3 %v1535_v60  ;;  %1946 = vmatpush.msrb.mxu2 %v1521_v61  ;;  %v1680_v32 = vld [vmem:[%s3785_s30 + $0xc90] sm:$0xff]  ;;  %v1633_v34 = vld [vmem:[%s3785_s30 + $0xb18] sm:$0xff]  ;;  %v1523_v59 = vld [vmem:[%s3785_s30 + $0x7a8] sm:$0xff] }
 0x23b   : > { %1906 = vmatpush.msrb.mxu0 %v1520_v3  ;;  %1861 = vmatpush.msra.mxu1 %v1534_v4  ;;  %v1392_v35 = vld [vmem:[%s3785_s30 + $0x390] sm:$0xff]  ;;  %v1361_v37 = vld [vmem:[%s3785_s30 + $0x298] sm:$0xff]  ;;  %v3920_v61 = vld [vmem:[%s4419_s0 + $0x8] sm:$0xff] }
 0x23c   : > { %1966 = vmatpush.msrb.mxu3 %v1777_v62  ;;  %1947 = vmatpush.msrb.mxu2 %v1505_v1  ;;  %v1664_v36 = vld [vmem:[%s3785_s30 + $0xc10] sm:$0xff]  ;;  %v1617_v38 = vld [vmem:[%s3785_s30 + $0xa98] sm:$0xff]  ;;  %v1507_v63 = vld [vmem:[%s3785_s30 + $0x728] sm:$0xff] }
 0x23d   : > { %1907 = vmatpush.msrb.mxu0 %v1504_v7  ;;  %1926 = vmatpush.msrb.mxu1 %v1776_v8  ;;  %v1376_v39 = vld [vmem:[%s3785_s30 + $0x310] sm:$0xff]  ;;  %v1345_v41 = vld [vmem:[%s3785_s30 + $0x218] sm:$0xff]  ;;  %v1779_v0 = vld [vmem:[%s3785_s30 + $0xfa8] sm:$0xff] }
 0x23e   : > { %1967 = vmatpush.msrb.mxu3 %v1761_v2  ;;  %1948 = vmatpush.msrb.mxu2 %v1489_v5  ;;  %v1648_v40 = vld [vmem:[%s3785_s30 + $0xb90] sm:$0xff]  ;;  %v1601_v42 = vld [vmem:[%s3785_s30 + $0xa18] sm:$0xff]  ;;  %v1491_v3 = vld [vmem:[%s3785_s30 + $0x6a8] sm:$0xff] }
 0x23f   : > { %1908 = vmatpush.msrb.mxu0 %v1488_v11  ;;  %1927 = vmatpush.msrb.mxu1 %v1760_v12  ;;  %v1360_v43 = vld [vmem:[%s3785_s30 + $0x290] sm:$0xff]  ;;  %v1329_v45 = vld [vmem:[%s3785_s30 + $0x198] sm:$0xff]  ;;  %v1763_v4 = vld [vmem:[%s3785_s30 + $0xf28] sm:$0xff] }
 0x240   : > { %1968 = vmatpush.msrb.mxu3 %v1745_v6  ;;  %1949 = vmatpush.msrb.mxu2 %v1473_v9  ;;  %v1632_v44 = vld [vmem:[%s3785_s30 + $0xb10] sm:$0xff]  ;;  %v1585_v46 = vld [vmem:[%s3785_s30 + $0x998] sm:$0xff]  ;;  %v1522_v6 = vld [vmem:[%s3785_s30 + $0x7a0] sm:$0xff] }
 0x241   : > { %1909 = vmatpush.msrb.mxu0 %v1472_v15  ;;  %1928 = vmatpush.msrb.mxu1 %v1744_v16  ;;  %v1344_v47 = vld [vmem:[%s3785_s30 + $0x210] sm:$0xff]  ;;  %v1313_v49 = vld [vmem:[%s3785_s30 + $0x118] sm:$0xff]  ;;  %v1475_v7 = vld [vmem:[%s3785_s30 + $0x628] sm:$0xff] }
 0x242   : > { %1969 = vmatpush.msrb.mxu3 %v1729_v10  ;;  %1950 = vmatpush.msrb.mxu2 %v1457_v13  ;;  %v1616_v48 = vld [vmem:[%s3785_s30 + $0xa90] sm:$0xff]  ;;  %v1569_v50 = vld [vmem:[%s3785_s30 + $0x918] sm:$0xff]  ;;  %v1747_v8 = vld [vmem:[%s3785_s30 + $0xea8] sm:$0xff] }
 0x243   : > { %1910 = vmatpush.msrb.mxu0 %v1456_v19  ;;  %1929 = vmatpush.msrb.mxu1 %v1728_v20  ;;  %v1328_v51 = vld [vmem:[%s3785_s30 + $0x190] sm:$0xff]  ;;  %v1297_v53 = vld [vmem:[%s3785_s30 + $0x98] sm:$0xff]  ;;  %v1506_v10 = vld [vmem:[%s3785_s30 + $0x720] sm:$0xff] }
 0x244   : > { %1970 = vmatpush.msrb.mxu3 %v1713_v14  ;;  %1951 = vmatpush.msrb.mxu2 %v1441_v17  ;;  %v1600_v52 = vld [vmem:[%s3785_s30 + $0xa10] sm:$0xff]  ;;  %v1553_v54 = vld [vmem:[%s3785_s30 + $0x898] sm:$0xff]  ;;  %v1778_v11 = vld [vmem:[%s3785_s30 + $0xfa0] sm:$0xff] }
 0x245   : > { %1911 = vmatpush.msrb.mxu0 %v1440_v23  ;;  %1930 = vmatpush.msrb.mxu1 %v1712_v24  ;;  %v1312_v56 = vld [vmem:[%s3785_s30 + $0x110] sm:$0xff]  ;;  %v1281_v57 = vld [vmem:[%s3785_s30 + $0x18] sm:$0xff]  ;;  %v1459_v12 = vld [vmem:[%s3785_s30 + $0x5a8] sm:$0xff] }
 0x246   : > { %1971 = vmatpush.msrb.mxu3 %v1697_v18  ;;  %1952 = vmatpush.msrb.mxu2 %v1425_v21  ;;  %v1584_v58 = vld [vmem:[%s3785_s30 + $0x990] sm:$0xff]  ;;  %v1537_v60 = vld [vmem:[%s3785_s30 + $0x818] sm:$0xff]  ;;  %v1731_v13 = vld [vmem:[%s3785_s30 + $0xe28] sm:$0xff] }
 0x247   : > { %1912 = vmatpush.msrb.mxu0 %v1424_v27  ;;  %1931 = vmatpush.msrb.mxu1 %v1696_v28  ;;  %v1296_v62 = vld [vmem:[%s3785_s30 + $0x90] sm:$0xff]  ;;  %v1490_v14 = vld [vmem:[%s3785_s30 + $0x6a0] sm:$0xff]  ;;  %v1443_v16 = vld [vmem:[%s3785_s30 + $0x528] sm:$0xff] }
 0x248   : > { %1972 = vmatpush.msrb.mxu3 %v1681_v22  ;;  %1953 = vmatpush.msrb.mxu2 %v1409_v25  ;;  %v1568_v1 = vld [vmem:[%s3785_s30 + $0x910] sm:$0xff]  ;;  %v1762_v15 = vld [vmem:[%s3785_s30 + $0xf20] sm:$0xff]  ;;  %v1715_v17 = vld [vmem:[%s3785_s30 + $0xda8] sm:$0xff] }
 0x249   : > { %1913 = vmatpush.msrb.mxu0 %v1408_v31  ;;  %1932 = vmatpush.msrb.mxu1 %v1680_v32  ;;  %v1280_v2 = vld [vmem:[%s3785_s30 + $0x10] sm:$0xff]  ;;  %v1474_v18 = vld [vmem:[%s3785_s30 + $0x620] sm:$0xff]  ;;  %v1427_v20 = vld [vmem:[%s3785_s30 + $0x4a8] sm:$0xff] }
 0x24a   : > { %1973 = vmatpush.msrb.mxu3 %v1665_v26  ;;  %1954 = vmatpush.msrb.mxu2 %v1393_v29  ;;  %v1552_v5 = vld [vmem:[%s3785_s30 + $0x890] sm:$0xff]  ;;  %v1746_v19 = vld [vmem:[%s3785_s30 + $0xea0] sm:$0xff]  ;;  %v1699_v21 = vld [vmem:[%s3785_s30 + $0xd28] sm:$0xff] }
 0x24b   : > { %1914 = vmatpush.msrb.mxu0 %v1392_v35  ;;  %1933 = vmatpush.msrb.mxu1 %v1664_v36  ;;  %v1536_v9 = vld [vmem:[%s3785_s30 + $0x810] sm:$0xff]  ;;  %v1458_v22 = vld [vmem:[%s3785_s30 + $0x5a0] sm:$0xff]  ;;  %v1411_v24 = vld [vmem:[%s3785_s30 + $0x428] sm:$0xff] }
 0x24c   : > { %1974 = vmatpush.msrb.mxu3 %v1649_v30  ;;  %1955 = vmatpush.msrb.mxu2 %v1377_v33  ;;  %v1730_v23 = vld [vmem:[%s3785_s30 + $0xe20] sm:$0xff]  ;;  %v1683_v25 = vld [vmem:[%s3785_s30 + $0xca8] sm:$0xff] }
 0x24d   : > { %1915 = vmatpush.msrb.mxu0 %v1376_v39  ;;  %1934 = vmatpush.msrb.mxu1 %v1648_v40  ;;  %v1442_v26 = vld [vmem:[%s3785_s30 + $0x520] sm:$0xff]  ;;  %v1395_v28 = vld [vmem:[%s3785_s30 + $0x3a8] sm:$0xff] }
 0x24e   : > { %1975 = vmatpush.msrb.mxu3 %v1633_v34  ;;  %1956 = vmatpush.msrb.mxu2 %v1361_v37  ;;  %v1714_v27 = vld [vmem:[%s3785_s30 + $0xda0] sm:$0xff]  ;;  %v1667_v29 = vld [vmem:[%s3785_s30 + $0xc28] sm:$0xff] }
 0x24f   : > { %1916 = vmatpush.msrb.mxu0 %v1360_v43  ;;  %1935 = vmatpush.msrb.mxu1 %v1632_v44  ;;  %v1426_v30 = vld [vmem:[%s3785_s30 + $0x4a0] sm:$0xff]  ;;  %v1379_v32 = vld [vmem:[%s3785_s30 + $0x328] sm:$0xff] }
 0x250   : > { %1976 = vmatpush.msrb.mxu3 %v1617_v38  ;;  %1957 = vmatpush.msrb.mxu2 %v1345_v41  ;;  %v1698_v31 = vld [vmem:[%s3785_s30 + $0xd20] sm:$0xff]  ;;  %v1651_v33 = vld [vmem:[%s3785_s30 + $0xba8] sm:$0xff] }
 0x251   : > { %1917 = vmatpush.msrb.mxu0 %v1344_v47  ;;  %1936 = vmatpush.msrb.mxu1 %v1616_v48  ;;  %v1410_v34 = vld [vmem:[%s3785_s30 + $0x420] sm:$0xff]  ;;  %v1363_v36 = vld [vmem:[%s3785_s30 + $0x2a8] sm:$0xff] }
 0x252   : > { %1977 = vmatpush.msrb.mxu3 %v1601_v42  ;;  %1958 = vmatpush.msrb.mxu2 %v1329_v45  ;;  %v1682_v35 = vld [vmem:[%s3785_s30 + $0xca0] sm:$0xff]  ;;  %v1635_v37 = vld [vmem:[%s3785_s30 + $0xb28] sm:$0xff] }
 0x253   : > { %1918 = vmatpush.msrb.mxu0 %v1328_v51  ;;  %1937 = vmatpush.msrb.mxu1 %v1600_v52  ;;  %v1394_v38 = vld [vmem:[%s3785_s30 + $0x3a0] sm:$0xff]  ;;  %v1347_v40 = vld [vmem:[%s3785_s30 + $0x228] sm:$0xff] }
 0x254   : > { %1978 = vmatpush.msrb.mxu3 %v1585_v46  ;;  %1959 = vmatpush.msrb.mxu2 %v1313_v49  ;;  %v1666_v39 = vld [vmem:[%s3785_s30 + $0xc20] sm:$0xff]  ;;  %v1619_v41 = vld [vmem:[%s3785_s30 + $0xaa8] sm:$0xff] }
 0x255   : > { %1882 = vmatmul.f32.vlgmr.msra.gmra.mxu2 %v3909_v55  ;;  %1919 = vmatpush.msrb.mxu0 %v1312_v56  ;;  %v1378_v42 = vld [vmem:[%s3785_s30 + $0x320] sm:$0xff]  ;;  %v1331_v44 = vld [vmem:[%s3785_s30 + $0x1a8] sm:$0xff] }
 0x256   : > { %1979 = vmatpush.msrb.mxu3 %v1569_v50  ;;  %1960 = vmatpush.msrb.mxu2 %v1297_v53  ;;  %v1650_v43 = vld [vmem:[%s3785_s30 + $0xba0] sm:$0xff]  ;;  %v1603_v45 = vld [vmem:[%s3785_s30 + $0xa28] sm:$0xff] }
 0x257   : > { %1938 = vmatpush.msrb.mxu1 %v1584_v58  ;;  %1902 = vmatmul.f32.vlgmr.msra.gmra.mxu3 %v3920_v61  ;;  %v1362_v46 = vld [vmem:[%s3785_s30 + $0x2a0] sm:$0xff]  ;;  %v1315_v48 = vld [vmem:[%s3785_s30 + $0x128] sm:$0xff] }
 0x258   : > { %1980 = vmatpush.msrb.mxu3 %v1553_v54  ;;  %1961 = vmatpush.msrb.mxu2 %v1281_v57  ;;  %v1634_v47 = vld [vmem:[%s3785_s30 + $0xb20] sm:$0xff]  ;;  %v1587_v49 = vld [vmem:[%s3785_s30 + $0x9a8] sm:$0xff] }
 0x259   : > { %1920 = vmatpush.msrb.mxu0 %v1296_v62  ;;  %1939 = vmatpush.msrb.mxu1 %v1568_v1  ;;  %v1346_v50 = vld [vmem:[%s3785_s30 + $0x220] sm:$0xff]  ;;  %v1299_v52 = vld [vmem:[%s3785_s30 + $0xa8] sm:$0xff]  ;;  %v1781_v1 = vld [vmem:[%s3785_s30 + $0xfb8] sm:$0xff] }
 0x25a   : > { %2026 = vmatpush.msra.mxu2 %v1523_v59  ;;  %1981 = vmatpush.msrb.mxu3 %v1537_v60  ;;  %v1618_v51 = vld [vmem:[%s3785_s30 + $0xaa0] sm:$0xff]  ;;  %v1571_v53 = vld [vmem:[%s3785_s30 + $0x928] sm:$0xff]  ;;  %v1525_v59 = vld [vmem:[%s3785_s30 + $0x7b8] sm:$0xff] }
 0x25b   : > { %1921 = vmatpush.msrb.mxu0 %v1280_v2  ;;  %1940 = vmatpush.msrb.mxu1 %v1552_v5  ;;  %v1330_v54 = vld [vmem:[%s3785_s30 + $0x1a0] sm:$0xff]  ;;  %v1283_v57 = vld [vmem:[%s3785_s30 + $0x28] sm:$0xff]  ;;  %v1765_v5 = vld [vmem:[%s3785_s30 + $0xf38] sm:$0xff] }
 0x25c   : > { %2027 = vmatpush.msra.mxu2 %v1507_v63  ;;  %2046 = vmatpush.msra.mxu3 %v1779_v0  ;;  %v1602_v56 = vld [vmem:[%s3785_s30 + $0xa20] sm:$0xff]  ;;  %v1555_v58 = vld [vmem:[%s3785_s30 + $0x8a8] sm:$0xff]  ;;  %v1509_v0 = vld [vmem:[%s3785_s30 + $0x738] sm:$0xff] }
 0x25d   : > { %1842 = vmatmul.f32.vlgmr.msra.gmra.mxu0 %v3909_v55  ;;  %1941 = vmatpush.msrb.mxu1 %v1536_v9  ;;  %v1314_v60 = vld [vmem:[%s3785_s30 + $0x120] sm:$0xff]  ;;  %v1539_v63 = vld [vmem:[%s3785_s30 + $0x828] sm:$0xff]  ;;  %v1477_v9 = vld [vmem:[%s3785_s30 + $0x638] sm:$0xff] }
 0x25e   : > { %2028 = vmatpush.msra.mxu2 %v1491_v3  ;;  %2047 = vmatpush.msra.mxu3 %v1763_v4  ;;  %v1586_v62 = vld [vmem:[%s3785_s30 + $0x9a0] sm:$0xff]  ;;  %v1493_v4 = vld [vmem:[%s3785_s30 + $0x6b8] sm:$0xff] }
 0x25f   : > { %1986 = vmatpush.msra.mxu0 %v1522_v6  ;;  %1862 = vmatmul.f32.vlgmr.msra.gmra.mxu1 %v3920_v61  ;;  %v1298_v2 = vld [vmem:[%s3785_s30 + $0xa0] sm:$0xff] }
 0x260   : > { %2029 = vmatpush.msra.mxu2 %v1475_v7  ;;  %2048 = vmatpush.msra.mxu3 %v1747_v8  ;;  %v1570_v3 = vld [vmem:[%s3785_s30 + $0x920] sm:$0xff]  ;;  %v1524_v8 = vld [vmem:[%s3785_s30 + $0x7b0] sm:$0xff] }
 0x261   : > { %1987 = vmatpush.msra.mxu0 %v1506_v10  ;;  %2006 = vmatpush.msra.mxu1 %v1778_v11  ;;  %v1282_v6 = vld [vmem:[%s3785_s30 + $0x20] sm:$0xff]  ;;  %v1749_v10 = vld [vmem:[%s3785_s30 + $0xeb8] sm:$0xff] }
 0x262   : > { %2030 = vmatpush.msra.mxu2 %v1459_v12  ;;  %2049 = vmatpush.msra.mxu3 %v1731_v13  ;;  %v1554_v7 = vld [vmem:[%s3785_s30 + $0x8a0] sm:$0xff]  ;;  %v1508_v12 = vld [vmem:[%s3785_s30 + $0x730] sm:$0xff] }
 0x263   : > { %1988 = vmatpush.msra.mxu0 %v1490_v14  ;;  %2007 = vmatpush.msra.mxu1 %v1762_v15  ;;  %v1538_v11 = vld [vmem:[%s3785_s30 + $0x820] sm:$0xff]  ;;  %v1780_v13 = vld [vmem:[%s3785_s30 + $0xfb0] sm:$0xff]  ;;  %v1461_v14 = vld [vmem:[%s3785_s30 + $0x5b8] sm:$0xff] }
 0x264   : > { %2031 = vmatpush.msra.mxu2 %v1443_v16  ;;  %2050 = vmatpush.msra.mxu3 %v1715_v17  ;;  %v1733_v15 = vld [vmem:[%s3785_s30 + $0xe38] sm:$0xff]  ;;  %v1492_v16 = vld [vmem:[%s3785_s30 + $0x6b0] sm:$0xff] }
 0x265   : > { %1989 = vmatpush.msra.mxu0 %v1474_v18  ;;  %2008 = vmatpush.msra.mxu1 %v1746_v19  ;;  %v1764_v17 = vld [vmem:[%s3785_s30 + $0xf30] sm:$0xff]  ;;  %v1445_v18 = vld [vmem:[%s3785_s30 + $0x538] sm:$0xff] }
 0x266   : > { %2032 = vmatpush.msra.mxu2 %v1427_v20  ;;  %2051 = vmatpush.msra.mxu3 %v1699_v21  ;;  %v1717_v19 = vld [vmem:[%s3785_s30 + $0xdb8] sm:$0xff]  ;;  %v1476_v20 = vld [vmem:[%s3785_s30 + $0x630] sm:$0xff] }
 0x267   : > { %1990 = vmatpush.msra.mxu0 %v1458_v22  ;;  %2009 = vmatpush.msra.mxu1 %v1730_v23  ;;  %v1748_v21 = vld [vmem:[%s3785_s30 + $0xeb0] sm:$0xff]  ;;  %v1429_v22 = vld [vmem:[%s3785_s30 + $0x4b8] sm:$0xff] }
 0x268   : > { %2033 = vmatpush.msra.mxu2 %v1411_v24  ;;  %2052 = vmatpush.msra.mxu3 %v1683_v25  ;;  %v1701_v23 = vld [vmem:[%s3785_s30 + $0xd38] sm:$0xff]  ;;  %v1460_v24 = vld [vmem:[%s3785_s30 + $0x5b0] sm:$0xff] }
 0x269   : > { %1991 = vmatpush.msra.mxu0 %v1442_v26  ;;  %2010 = vmatpush.msra.mxu1 %v1714_v27  ;;  %v1732_v25 = vld [vmem:[%s3785_s30 + $0xe30] sm:$0xff]  ;;  %v1413_v26 = vld [vmem:[%s3785_s30 + $0x438] sm:$0xff] }
 0x26a   : > { %2034 = vmatpush.msra.mxu2 %v1395_v28  ;;  %2053 = vmatpush.msra.mxu3 %v1667_v29  ;;  %v1685_v27 = vld [vmem:[%s3785_s30 + $0xcb8] sm:$0xff]  ;;  %v1444_v28 = vld [vmem:[%s3785_s30 + $0x530] sm:$0xff] }
 0x26b   : > { %1992 = vmatpush.msra.mxu0 %v1426_v30  ;;  %2011 = vmatpush.msra.mxu1 %v1698_v31  ;;  %v1716_v29 = vld [vmem:[%s3785_s30 + $0xdb0] sm:$0xff]  ;;  %v1397_v30 = vld [vmem:[%s3785_s30 + $0x3b8] sm:$0xff] }
 0x26c   : > { %2035 = vmatpush.msra.mxu2 %v1379_v32  ;;  %2054 = vmatpush.msra.mxu3 %v1651_v33  ;;  %v1669_v31 = vld [vmem:[%s3785_s30 + $0xc38] sm:$0xff]  ;;  %v1428_v32 = vld [vmem:[%s3785_s30 + $0x4b0] sm:$0xff] }
 0x26d   : > { %1993 = vmatpush.msra.mxu0 %v1410_v34  ;;  %2012 = vmatpush.msra.mxu1 %v1682_v35  ;;  %v1700_v33 = vld [vmem:[%s3785_s30 + $0xd30] sm:$0xff]  ;;  %v1381_v34 = vld [vmem:[%s3785_s30 + $0x338] sm:$0xff] }
 0x26e   : > { %2036 = vmatpush.msra.mxu2 %v1363_v36  ;;  %2055 = vmatpush.msra.mxu3 %v1635_v37  ;;  %v1653_v35 = vld [vmem:[%s3785_s30 + $0xbb8] sm:$0xff]  ;;  %v1412_v36 = vld [vmem:[%s3785_s30 + $0x430] sm:$0xff] }
 0x26f   : > { %1994 = vmatpush.msra.mxu0 %v1394_v38  ;;  %2013 = vmatpush.msra.mxu1 %v1666_v39  ;;  %v1684_v37 = vld [vmem:[%s3785_s30 + $0xcb0] sm:$0xff]  ;;  %v1365_v38 = vld [vmem:[%s3785_s30 + $0x2b8] sm:$0xff] }
 0x270   : > { %2037 = vmatpush.msra.mxu2 %v1347_v40  ;;  %2056 = vmatpush.msra.mxu3 %v1619_v41  ;;  %v1637_v39 = vld [vmem:[%s3785_s30 + $0xb38] sm:$0xff]  ;;  %v1396_v40 = vld [vmem:[%s3785_s30 + $0x3b0] sm:$0xff] }
 0x271   : > { %1995 = vmatpush.msra.mxu0 %v1378_v42  ;;  %2014 = vmatpush.msra.mxu1 %v1650_v43  ;;  %v1668_v41 = vld [vmem:[%s3785_s30 + $0xc30] sm:$0xff]  ;;  %v1349_v42 = vld [vmem:[%s3785_s30 + $0x238] sm:$0xff] }
 0x272   : > { %2038 = vmatpush.msra.mxu2 %v1331_v44  ;;  %2057 = vmatpush.msra.mxu3 %v1603_v45  ;;  %v1621_v43 = vld [vmem:[%s3785_s30 + $0xab8] sm:$0xff]  ;;  %v1380_v44 = vld [vmem:[%s3785_s30 + $0x330] sm:$0xff] }
 0x273   : > { %1996 = vmatpush.msra.mxu0 %v1362_v46  ;;  %2015 = vmatpush.msra.mxu1 %v1634_v47  ;;  %v1652_v45 = vld [vmem:[%s3785_s30 + $0xbb0] sm:$0xff]  ;;  %v1333_v46 = vld [vmem:[%s3785_s30 + $0x1b8] sm:$0xff] }
 0x274   : > { %2039 = vmatpush.msra.mxu2 %v1315_v48  ;;  %2058 = vmatpush.msra.mxu3 %v1587_v49  ;;  %v1605_v47 = vld [vmem:[%s3785_s30 + $0xa38] sm:$0xff]  ;;  %v1364_v48 = vld [vmem:[%s3785_s30 + $0x2b0] sm:$0xff] }
 0x275   : > { %1997 = vmatpush.msra.mxu0 %v1346_v50  ;;  %2016 = vmatpush.msra.mxu1 %v1618_v51  ;;  %v1636_v49 = vld [vmem:[%s3785_s30 + $0xb30] sm:$0xff]  ;;  %v1317_v50 = vld [vmem:[%s3785_s30 + $0x138] sm:$0xff] }
 0x276   : > { %2040 = vmatpush.msra.mxu2 %v1299_v52  ;;  %2059 = vmatpush.msra.mxu3 %v1571_v53  ;;  %v1589_v51 = vld [vmem:[%s3785_s30 + $0x9b8] sm:$0xff]  ;;  %v1348_v52 = vld [vmem:[%s3785_s30 + $0x230] sm:$0xff] }
 0x277   : > { %1998 = vmatpush.msra.mxu0 %v1330_v54  ;;  %2017 = vmatpush.msra.mxu1 %v1602_v56  ;;  %v1620_v53 = vld [vmem:[%s3785_s30 + $0xab0] sm:$0xff]  ;;  %v1301_v54 = vld [vmem:[%s3785_s30 + $0xb8] sm:$0xff] }
 0x278   : > { %2041 = vmatpush.msra.mxu2 %v1283_v57  ;;  %2060 = vmatpush.msra.mxu3 %v1555_v58  ;;  %v1573_v56 = vld [vmem:[%s3785_s30 + $0x938] sm:$0xff]  ;;  %v1332_v57 = vld [vmem:[%s3785_s30 + $0x1b0] sm:$0xff] }
 0x279   : > { %1962 = vmatmul.f32.vlgmr.msrb.gmra.mxu2 %v3909_v55  ;;  %1999 = vmatpush.msra.mxu0 %v1314_v60  ;;  %v1604_v58 = vld [vmem:[%s3785_s30 + $0xa30] sm:$0xff]  ;;  %v1557_v60 = vld [vmem:[%s3785_s30 + $0x8b8] sm:$0xff] }
 0x27a   : > { %2106 = vmatpush.msrb.mxu2 %v1525_v59  ;;  %2018 = vmatpush.msra.mxu1 %v1586_v62  ;;  %v1285_v59 = vld [vmem:[%s3785_s30 + $0x38] sm:$0xff]  ;;  %v1527_v62 = vld [vmem:[%s3785_s30 + $0x7c8] sm:$0xff] }
 0x27b   : > { %2061 = vmatpush.msra.mxu3 %v1539_v63  ;;  %2000 = vmatpush.msra.mxu0 %v1298_v2  ;;  %v1316_v63 = vld [vmem:[%s3785_s30 + $0x130] sm:$0xff]  ;;  %v1511_v2 = vld [vmem:[%s3785_s30 + $0x748] sm:$0xff] }
 0x27c   : > { %1982 = vmatmul.f32.vlgmr.msrb.gmra.mxu3 %v3920_v61  ;;  %2107 = vmatpush.msrb.mxu2 %v1509_v0  ;;  %v1588_v0 = vld [vmem:[%s3785_s30 + $0x9b0] sm:$0xff] }
 0x27d   : > { %2126 = vmatpush.msrb.mxu3 %v1781_v1  ;;  %2019 = vmatpush.msra.mxu1 %v1570_v3  ;;  %v1541_v1 = vld [vmem:[%s3785_s30 + $0x838] sm:$0xff]  ;;  %v1783_v3 = vld [vmem:[%s3785_s30 + $0xfc8] sm:$0xff] }
 0x27e   : > { %2108 = vmatpush.msrb.mxu2 %v1493_v4  ;;  %2001 = vmatpush.msra.mxu0 %v1282_v6  ;;  %v1300_v4 = vld [vmem:[%s3785_s30 + $0xb0] sm:$0xff]  ;;  %v1495_v6 = vld [vmem:[%s3785_s30 + $0x6c8] sm:$0xff] }
 0x27f   : > { %2127 = vmatpush.msrb.mxu3 %v1765_v5  ;;  %2020 = vmatpush.msra.mxu1 %v1554_v7  ;;  %v1572_v5 = vld [vmem:[%s3785_s30 + $0x930] sm:$0xff]  ;;  %v1767_v7 = vld [vmem:[%s3785_s30 + $0xf48] sm:$0xff] }
 0x280   : > { %1922 = vmatmul.f32.vlgmr.msrb.gmra.mxu0 %v3909_v55  ;;  %2109 = vmatpush.msrb.mxu2 %v1477_v9  ;;  %v1556_v9 = vld [vmem:[%s3785_s30 + $0x8b0] sm:$0xff] }
 0x281   : > { %2066 = vmatpush.msrb.mxu0 %v1524_v8  ;;  %2128 = vmatpush.msrb.mxu3 %v1749_v10  ;;  %v1284_v8 = vld [vmem:[%s3785_s30 + $0x30] sm:$0xff]  ;;  %v1526_v10 = vld [vmem:[%s3785_s30 + $0x7c0] sm:$0xff] }
 0x282   : > { %2021 = vmatpush.msra.mxu1 %v1538_v11  ;;  %2110 = vmatpush.msrb.mxu2 %v1461_v14  ;;  %v1479_v11 = vld [vmem:[%s3785_s30 + $0x648] sm:$0xff]  ;;  %v1510_v14 = vld [vmem:[%s3785_s30 + $0x740] sm:$0xff] }
 0x283   : > { %1942 = vmatmul.f32.vlgmr.msrb.gmra.mxu1 %v3920_v61  ;;  %2067 = vmatpush.msrb.mxu0 %v1508_v12  ;;  %v1751_v12 = vld [vmem:[%s3785_s30 + $0xec8] sm:$0xff] }
 0x284   : > { %2086 = vmatpush.msrb.mxu1 %v1780_v13  ;;  %2129 = vmatpush.msrb.mxu3 %v1733_v15  ;;  %v1540_v13 = vld [vmem:[%s3785_s30 + $0x830] sm:$0xff]  ;;  %v1782_v15 = vld [vmem:[%s3785_s30 + $0xfc0] sm:$0xff] }
 0x285   : > { %2068 = vmatpush.msrb.mxu0 %v1492_v16  ;;  %2111 = vmatpush.msrb.mxu2 %v1445_v18  ;;  %v1463_v16 = vld [vmem:[%s3785_s30 + $0x5c8] sm:$0xff]  ;;  %v1494_v18 = vld [vmem:[%s3785_s30 + $0x6c0] sm:$0xff] }
 0x286   : > { %2087 = vmatpush.msrb.mxu1 %v1764_v17  ;;  %2130 = vmatpush.msrb.mxu3 %v1717_v19  ;;  %v1735_v17 = vld [vmem:[%s3785_s30 + $0xe48] sm:$0xff]  ;;  %v1766_v19 = vld [vmem:[%s3785_s30 + $0xf40] sm:$0xff] }
 0x287   : > { %2069 = vmatpush.msrb.mxu0 %v1476_v20  ;;  %2112 = vmatpush.msrb.mxu2 %v1429_v22  ;;  %v1447_v20 = vld [vmem:[%s3785_s30 + $0x548] sm:$0xff]  ;;  %v1478_v22 = vld [vmem:[%s3785_s30 + $0x640] sm:$0xff] }
 0x288   : > { %2088 = vmatpush.msrb.mxu1 %v1748_v21  ;;  %2131 = vmatpush.msrb.mxu3 %v1701_v23  ;;  %v1719_v21 = vld [vmem:[%s3785_s30 + $0xdc8] sm:$0xff]  ;;  %v1750_v23 = vld [vmem:[%s3785_s30 + $0xec0] sm:$0xff] }
 0x289   : > { %2070 = vmatpush.msrb.mxu0 %v1460_v24  ;;  %2113 = vmatpush.msrb.mxu2 %v1413_v26  ;;  %v1431_v24 = vld [vmem:[%s3785_s30 + $0x4c8] sm:$0xff]  ;;  %v1462_v26 = vld [vmem:[%s3785_s30 + $0x5c0] sm:$0xff] }
 0x28a   : > { %2089 = vmatpush.msrb.mxu1 %v1732_v25  ;;  %2132 = vmatpush.msrb.mxu3 %v1685_v27  ;;  %v1703_v25 = vld [vmem:[%s3785_s30 + $0xd48] sm:$0xff]  ;;  %v1734_v27 = vld [vmem:[%s3785_s30 + $0xe40] sm:$0xff] }
 0x28b   : > { %2071 = vmatpush.msrb.mxu0 %v1444_v28  ;;  %2114 = vmatpush.msrb.mxu2 %v1397_v30  ;;  %v1415_v28 = vld [vmem:[%s3785_s30 + $0x448] sm:$0xff]  ;;  %v1446_v30 = vld [vmem:[%s3785_s30 + $0x540] sm:$0xff] }
 0x28c   : > { %2090 = vmatpush.msrb.mxu1 %v1716_v29  ;;  %2133 = vmatpush.msrb.mxu3 %v1669_v31  ;;  %v1687_v29 = vld [vmem:[%s3785_s30 + $0xcc8] sm:$0xff]  ;;  %v1718_v31 = vld [vmem:[%s3785_s30 + $0xdc0] sm:$0xff] }
 0x28d   : > { %2072 = vmatpush.msrb.mxu0 %v1428_v32  ;;  %2115 = vmatpush.msrb.mxu2 %v1381_v34  ;;  %v1399_v32 = vld [vmem:[%s3785_s30 + $0x3c8] sm:$0xff]  ;;  %v1430_v34 = vld [vmem:[%s3785_s30 + $0x4c0] sm:$0xff] }
 0x28e   : > { %2091 = vmatpush.msrb.mxu1 %v1700_v33  ;;  %2134 = vmatpush.msrb.mxu3 %v1653_v35  ;;  %v1671_v33 = vld [vmem:[%s3785_s30 + $0xc48] sm:$0xff]  ;;  %v1702_v35 = vld [vmem:[%s3785_s30 + $0xd40] sm:$0xff] }
 0x28f   : > { %2073 = vmatpush.msrb.mxu0 %v1412_v36  ;;  %2116 = vmatpush.msrb.mxu2 %v1365_v38  ;;  %v1383_v36 = vld [vmem:[%s3785_s30 + $0x348] sm:$0xff]  ;;  %v1414_v38 = vld [vmem:[%s3785_s30 + $0x440] sm:$0xff] }
 0x290   : > { %2092 = vmatpush.msrb.mxu1 %v1684_v37  ;;  %2135 = vmatpush.msrb.mxu3 %v1637_v39  ;;  %v1655_v37 = vld [vmem:[%s3785_s30 + $0xbc8] sm:$0xff]  ;;  %v1686_v39 = vld [vmem:[%s3785_s30 + $0xcc0] sm:$0xff] }
 0x291   : > { %2074 = vmatpush.msrb.mxu0 %v1396_v40  ;;  %2117 = vmatpush.msrb.mxu2 %v1349_v42  ;;  %v1367_v40 = vld [vmem:[%s3785_s30 + $0x2c8] sm:$0xff]  ;;  %v1398_v42 = vld [vmem:[%s3785_s30 + $0x3c0] sm:$0xff] }
 0x292   : > { %2093 = vmatpush.msrb.mxu1 %v1668_v41  ;;  %2136 = vmatpush.msrb.mxu3 %v1621_v43  ;;  %v1639_v41 = vld [vmem:[%s3785_s30 + $0xb48] sm:$0xff]  ;;  %v1670_v43 = vld [vmem:[%s3785_s30 + $0xc40] sm:$0xff] }
 0x293   : > { %2075 = vmatpush.msrb.mxu0 %v1380_v44  ;;  %2118 = vmatpush.msrb.mxu2 %v1333_v46  ;;  %v1351_v44 = vld [vmem:[%s3785_s30 + $0x248] sm:$0xff]  ;;  %v1382_v46 = vld [vmem:[%s3785_s30 + $0x340] sm:$0xff] }
 0x294   : > { %2094 = vmatpush.msrb.mxu1 %v1652_v45  ;;  %2137 = vmatpush.msrb.mxu3 %v1605_v47  ;;  %v1623_v45 = vld [vmem:[%s3785_s30 + $0xac8] sm:$0xff]  ;;  %v1654_v47 = vld [vmem:[%s3785_s30 + $0xbc0] sm:$0xff] }
 0x295   : > { %2076 = vmatpush.msrb.mxu0 %v1364_v48  ;;  %2119 = vmatpush.msrb.mxu2 %v1317_v50  ;;  %v1335_v48 = vld [vmem:[%s3785_s30 + $0x1c8] sm:$0xff]  ;;  %v1366_v50 = vld [vmem:[%s3785_s30 + $0x2c0] sm:$0xff] }
 0x296   : > { %2095 = vmatpush.msrb.mxu1 %v1636_v49  ;;  %2138 = vmatpush.msrb.mxu3 %v1589_v51  ;;  %v1607_v49 = vld [vmem:[%s3785_s30 + $0xa48] sm:$0xff]  ;;  %v1638_v51 = vld [vmem:[%s3785_s30 + $0xb40] sm:$0xff] }
 0x297   : > { %2077 = vmatpush.msrb.mxu0 %v1348_v52  ;;  %2120 = vmatpush.msrb.mxu2 %v1301_v54  ;;  %v1319_v52 = vld [vmem:[%s3785_s30 + $0x148] sm:$0xff]  ;;  %v1350_v54 = vld [vmem:[%s3785_s30 + $0x240] sm:$0xff] }
 0x298   : > { %2096 = vmatpush.msrb.mxu1 %v1620_v53  ;;  %2139 = vmatpush.msrb.mxu3 %v1573_v56  ;;  %v1591_v53 = vld [vmem:[%s3785_s30 + $0x9c8] sm:$0xff]  ;;  %v1622_v56 = vld [vmem:[%s3785_s30 + $0xac0] sm:$0xff] }
 0x299   : > { %2078 = vmatpush.msrb.mxu0 %v1332_v57  ;;  %2121 = vmatpush.msrb.mxu2 %v1285_v59  ;;  %v1303_v57 = vld [vmem:[%s3785_s30 + $0xc8] sm:$0xff]  ;;  %v1334_v59 = vld [vmem:[%s3785_s30 + $0x1c0] sm:$0xff] }
 0x29a   : > { %2097 = vmatpush.msrb.mxu1 %v1604_v58  ;;  %2140 = vmatpush.msrb.mxu3 %v1557_v60  ;;  %v1575_v58 = vld [vmem:[%s3785_s30 + $0x948] sm:$0xff]  ;;  %v1606_v60 = vld [vmem:[%s3785_s30 + $0xa40] sm:$0xff] }
 0x29b   : > { %2042 = vmatmul.f32.vlgmr.msra.gmra.mxu2 %v3909_v55  ;;  %2079 = vmatpush.msrb.mxu0 %v1316_v63  ;;  %v1559_v63 = vld [vmem:[%s3785_s30 + $0x8c8] sm:$0xff] }
 0x29c   : > { %2186 = vmatpush.msra.mxu2 %v1527_v62  ;;  %2098 = vmatpush.msrb.mxu1 %v1588_v0  ;;  %v1287_v62 = vld [vmem:[%s3785_s30 + $0x48] sm:$0xff]  ;;  %v1529_v0 = vld [vmem:[%s3785_s30 + $0x7d8] sm:$0xff] }
 0x29d   : > { %2141 = vmatpush.msrb.mxu3 %v1541_v1  ;;  %2080 = vmatpush.msrb.mxu0 %v1300_v4  ;;  %v1318_v1 = vld [vmem:[%s3785_s30 + $0x140] sm:$0xff]  ;;  %v1513_v4 = vld [vmem:[%s3785_s30 + $0x758] sm:$0xff] }
 0x29e   : > { %2062 = vmatmul.f32.vlgmr.msra.gmra.mxu3 %v3920_v61  ;;  %2187 = vmatpush.msra.mxu2 %v1511_v2  ;;  %v1590_v2 = vld [vmem:[%s3785_s30 + $0x9c0] sm:$0xff] }
 0x29f   : > { %2206 = vmatpush.msra.mxu3 %v1783_v3  ;;  %2099 = vmatpush.msrb.mxu1 %v1572_v5  ;;  %v1543_v3 = vld [vmem:[%s3785_s30 + $0x848] sm:$0xff]  ;;  %v1785_v5 = vld [vmem:[%s3785_s30 + $0xfd8] sm:$0xff] }
 0x2a0   : > { %2188 = vmatpush.msra.mxu2 %v1495_v6  ;;  %2081 = vmatpush.msrb.mxu0 %v1284_v8  ;;  %v1302_v6 = vld [vmem:[%s3785_s30 + $0xc0] sm:$0xff]  ;;  %v1497_v8 = vld [vmem:[%s3785_s30 + $0x6d8] sm:$0xff] }
 0x2a1   : > { %2207 = vmatpush.msra.mxu3 %v1767_v7  ;;  %2100 = vmatpush.msrb.mxu1 %v1556_v9  ;;  %v1574_v7 = vld [vmem:[%s3785_s30 + $0x940] sm:$0xff]  ;;  %v1769_v9 = vld [vmem:[%s3785_s30 + $0xf58] sm:$0xff] }
 0x2a2   : > { %2002 = vmatmul.f32.vlgmr.msra.gmra.mxu0 %v3909_v55  ;;  %2189 = vmatpush.msra.mxu2 %v1479_v11  ;;  %v1558_v11 = vld [vmem:[%s3785_s30 + $0x8c0] sm:$0xff] }
 0x2a3   : > { %2146 = vmatpush.msra.mxu0 %v1526_v10  ;;  %2208 = vmatpush.msra.mxu3 %v1751_v12  ;;  %v1286_v10 = vld [vmem:[%s3785_s30 + $0x40] sm:$0xff]  ;;  %v1528_v12 = vld [vmem:[%s3785_s30 + $0x7d0] sm:$0xff] }
 0x2a4   : > { %2101 = vmatpush.msrb.mxu1 %v1540_v13  ;;  %2190 = vmatpush.msra.mxu2 %v1463_v16  ;;  %v1481_v13 = vld [vmem:[%s3785_s30 + $0x658] sm:$0xff]  ;;  %v1512_v16 = vld [vmem:[%s3785_s30 + $0x750] sm:$0xff] }
 0x2a5   : > { %2022 = vmatmul.f32.vlgmr.msra.gmra.mxu1 %v3920_v61  ;;  %2147 = vmatpush.msra.mxu0 %v1510_v14  ;;  %v1753_v14 = vld [vmem:[%s3785_s30 + $0xed8] sm:$0xff] }
 0x2a6   : > { %2166 = vmatpush.msra.mxu1 %v1782_v15  ;;  %2209 = vmatpush.msra.mxu3 %v1735_v17  ;;  %v1542_v15 = vld [vmem:[%s3785_s30 + $0x840] sm:$0xff]  ;;  %v1784_v17 = vld [vmem:[%s3785_s30 + $0xfd0] sm:$0xff] }
 0x2a7   : > { %2148 = vmatpush.msra.mxu0 %v1494_v18  ;;  %2191 = vmatpush.msra.mxu2 %v1447_v20  ;;  %v1465_v18 = vld [vmem:[%s3785_s30 + $0x5d8] sm:$0xff]  ;;  %v1496_v20 = vld [vmem:[%s3785_s30 + $0x6d0] sm:$0xff] }
 0x2a8   : > { %2167 = vmatpush.msra.mxu1 %v1766_v19  ;;  %2210 = vmatpush.msra.mxu3 %v1719_v21  ;;  %v1737_v19 = vld [vmem:[%s3785_s30 + $0xe58] sm:$0xff] }
 0x2a9   : > { %2149 = vmatpush.msra.mxu0 %v1478_v22  ;;  %2192 = vmatpush.msra.mxu2 %v1431_v24  ;;  %v1449_v21 = vld [vmem:[%s3785_s30 + $0x558] sm:$0xff]  ;;  %v1752_v24 = vld [vmem:[%s3785_s30 + $0xed0] sm:$0xff] }
 0x2aa   : > { %2168 = vmatpush.msra.mxu1 %v1750_v23  ;;  %2211 = vmatpush.msra.mxu3 %v1703_v25  ;;  %v1721_v22 = vld [vmem:[%s3785_s30 + $0xdd8] sm:$0xff]  ;;  %v1480_v23 = vld [vmem:[%s3785_s30 + $0x650] sm:$0xff] }
 0x2ab   : > { %2150 = vmatpush.msra.mxu0 %v1462_v26  ;;  %2193 = vmatpush.msra.mxu2 %v1415_v28  ;;  %v1433_v25 = vld [vmem:[%s3785_s30 + $0x4d8] sm:$0xff]  ;;  %v1464_v26 = vld [vmem:[%s3785_s30 + $0x5d0] sm:$0xff] }
 0x2ac   : > { %2169 = vmatpush.msra.mxu1 %v1734_v27  ;;  %2212 = vmatpush.msra.mxu3 %v1687_v29  ;;  %v1736_v27 = vld [vmem:[%s3785_s30 + $0xe50] sm:$0xff]  ;;  %v1417_v28 = vld [vmem:[%s3785_s30 + $0x458] sm:$0xff] }
 0x2ad   : > { %2151 = vmatpush.msra.mxu0 %v1446_v30  ;;  %2194 = vmatpush.msra.mxu2 %v1399_v32  ;;  %v1689_v29 = vld [vmem:[%s3785_s30 + $0xcd8] sm:$0xff]  ;;  %v1448_v30 = vld [vmem:[%s3785_s30 + $0x550] sm:$0xff] }
 0x2ae   : > { %2170 = vmatpush.msra.mxu1 %v1718_v31  ;;  %2213 = vmatpush.msra.mxu3 %v1671_v33  ;;  %v1720_v31 = vld [vmem:[%s3785_s30 + $0xdd0] sm:$0xff]  ;;  %v1401_v32 = vld [vmem:[%s3785_s30 + $0x3d8] sm:$0xff] }
 0x2af   : > { %2152 = vmatpush.msra.mxu0 %v1430_v34  ;;  %2195 = vmatpush.msra.mxu2 %v1383_v36  ;;  %v1673_v33 = vld [vmem:[%s3785_s30 + $0xc58] sm:$0xff]  ;;  %v1432_v34 = vld [vmem:[%s3785_s30 + $0x4d0] sm:$0xff] }
 0x2b0   : > { %2171 = vmatpush.msra.mxu1 %v1702_v35  ;;  %2214 = vmatpush.msra.mxu3 %v1655_v37  ;;  %v1704_v35 = vld [vmem:[%s3785_s30 + $0xd50] sm:$0xff]  ;;  %v1385_v36 = vld [vmem:[%s3785_s30 + $0x358] sm:$0xff] }
 0x2b1   : > { %2153 = vmatpush.msra.mxu0 %v1414_v38  ;;  %2196 = vmatpush.msra.mxu2 %v1367_v40  ;;  %v1657_v37 = vld [vmem:[%s3785_s30 + $0xbd8] sm:$0xff]  ;;  %v1416_v38 = vld [vmem:[%s3785_s30 + $0x450] sm:$0xff] }
 0x2b2   : > { %2172 = vmatpush.msra.mxu1 %v1686_v39  ;;  %2215 = vmatpush.msra.mxu3 %v1639_v41  ;;  %v1688_v39 = vld [vmem:[%s3785_s30 + $0xcd0] sm:$0xff]  ;;  %v1369_v40 = vld [vmem:[%s3785_s30 + $0x2d8] sm:$0xff] }
 0x2b3   : > { %2154 = vmatpush.msra.mxu0 %v1398_v42  ;;  %2197 = vmatpush.msra.mxu2 %v1351_v44  ;;  %v1641_v41 = vld [vmem:[%s3785_s30 + $0xb58] sm:$0xff]  ;;  %v1400_v42 = vld [vmem:[%s3785_s30 + $0x3d0] sm:$0xff] }
 0x2b4   : > { %2173 = vmatpush.msra.mxu1 %v1670_v43  ;;  %2216 = vmatpush.msra.mxu3 %v1623_v45  ;;  %v1672_v43 = vld [vmem:[%s3785_s30 + $0xc50] sm:$0xff]  ;;  %v1353_v44 = vld [vmem:[%s3785_s30 + $0x258] sm:$0xff] }
 0x2b5   : > { %2155 = vmatpush.msra.mxu0 %v1382_v46  ;;  %2198 = vmatpush.msra.mxu2 %v1335_v48  ;;  %v1625_v45 = vld [vmem:[%s3785_s30 + $0xad8] sm:$0xff]  ;;  %v1384_v46 = vld [vmem:[%s3785_s30 + $0x350] sm:$0xff] }
 0x2b6   : > { %2174 = vmatpush.msra.mxu1 %v1654_v47  ;;  %2217 = vmatpush.msra.mxu3 %v1607_v49  ;;  %v4194_v47 = vld [vmem:[%s4185_s12] sm:$0xff]  ;;  %v1656_v48 = vld [vmem:[%s3785_s30 + $0xbd0] sm:$0xff]  ;;  %v1337_v49 = vld [vmem:[%s3785_s30 + $0x1d8] sm:$0xff] }
 0x2b7   : > { %2156 = vmatpush.msra.mxu0 %v1366_v50  ;;  %2199 = vmatpush.msra.mxu2 %v1319_v52  ;;  %v1609_v50 = vld [vmem:[%s3785_s30 + $0xa58] sm:$0xff]  ;;  %v1640_v52 = vld [vmem:[%s3785_s30 + $0xb50] sm:$0xff] }
 0x2b8   : > { %2175 = vmatpush.msra.mxu1 %v1638_v51  ;;  %2218 = vmatpush.msra.mxu3 %v1591_v53  ;;  %v1368_v51 = vld [vmem:[%s3785_s30 + $0x2d0] sm:$0xff]  ;;  %v1321_v53 = vld [vmem:[%s3785_s30 + $0x158] sm:$0xff] }
 0x2b9   : > { %2157 = vmatpush.msra.mxu0 %v1350_v54  ;;  %2200 = vmatpush.msra.mxu2 %v1303_v57  ;;  %v1795_v54 = vperm.slane %v4194_v47, 1  ;;  %v1352_v57 = vld [vmem:[%s3785_s30 + $0x250] sm:$0xff] }
 0x2ba   : > { %2176 = vmatpush.msra.mxu1 %v1622_v56  ;;  %2219 = vmatpush.msra.mxu3 %v1575_v58  ;;  %v1593_v56 = vld [vmem:[%s3785_s30 + $0x9d8] sm:$0xff]  ;;  %v1794_v58 = vperm.slane %v4194_v47, 0 }
 0x2bb   : > { %2158 = vmatpush.msra.mxu0 %v1334_v59  ;;  %2201 = vmatpush.msra.mxu2 %v1287_v62  ;;  %v1624_v59 = vld [vmem:[%s3785_s30 + $0xad0] sm:$0xff]  ;;  %v1577_v62 = vld [vmem:[%s3785_s30 + $0x958] sm:$0xff] }
 0x2bc   : > { %2177 = vmatpush.msra.mxu1 %v1606_v60  ;;  %2220 = vmatpush.msra.mxu3 %v1559_v63  ;;  %v1305_v60 = vld [vmem:[%s3785_s30 + $0xd8] sm:$0xff]  ;;  %v1336_v63 = vld [vmem:[%s3785_s30 + $0x1d0] sm:$0xff] }
 0x2bd   : > { %2122 = vmatmul.f32.vlgmr.msrb.gmra.mxu2 %v3909_v55  ;;  %2159 = vmatpush.msra.mxu0 %v1318_v1  ;;  %v1608_v1 = vld [vmem:[%s3785_s30 + $0xa50] sm:$0xff] }
 0x2be   : > { %2266 = vmatpush.msrb.mxu2 %v1529_v0  ;;  %2178 = vmatpush.msra.mxu1 %v1590_v2  ;;  %v1289_v2 = vld [vmem:[%s3785_s30 + $0x58] sm:$0xff] }
 0x2bf   : > { %2221 = vmatpush.msra.mxu3 %v1543_v3  ;;  %2160 = vmatpush.msra.mxu0 %v1302_v6 }
 0x2c0   : > { %2142 = vmatmul.f32.vlgmr.msrb.gmra.mxu3 %v3920_v61  ;;  %2267 = vmatpush.msrb.mxu2 %v1513_v4 }
 0x2c1   : > { %2286 = vmatpush.msrb.mxu3 %v1785_v5  ;;  %2179 = vmatpush.msra.mxu1 %v1574_v7  ;;  %v1561_v5 = vld [vmem:[%s3785_s30 + $0x8d8] sm:$0xff]  ;;  %v1531_v7 = vld [vmem:[%s3785_s30 + $0x7e8] sm:$0xff] }
 0x2c2   : > { %2268 = vmatpush.msrb.mxu2 %v1497_v8  ;;  %2161 = vmatpush.msra.mxu0 %v1286_v10  ;;  %v1320_v8 = vld [vmem:[%s3785_s30 + $0x150] sm:$0xff] }
 0x2c3   : > { %2287 = vmatpush.msrb.mxu3 %v1769_v9  ;;  %2180 = vmatpush.msra.mxu1 %v1558_v11  ;;  %v1592_v10 = vld [vmem:[%s3785_s30 + $0x9d0] sm:$0xff]  ;;  %v1545_v11 = vld [vmem:[%s3785_s30 + $0x858] sm:$0xff] }
 0x2c4   : > { %2082 = vmatmul.f32.vlgmr.msrb.gmra.mxu0 %v3909_v55  ;;  %2269 = vmatpush.msrb.mxu2 %v1481_v13  ;;  %v1768_v55 = vld [vmem:[%s3785_s30 + $0xf50] sm:$0xff] }
 0x2c5   : > { %2226 = vmatpush.msrb.mxu0 %v1528_v12  ;;  %2288 = vmatpush.msrb.mxu3 %v1753_v14  ;;  %v4226_v14 = vld [vmem:[%s4419_s0] sm:$0xff] }
 0x2c6   : > { %2181 = vmatpush.msra.mxu1 %v1542_v15  ;;  %2270 = vmatpush.msrb.mxu2 %v1465_v18  ;;  %v1515_v15 = vld [vmem:[%s3785_s30 + $0x768] sm:$0xff]  ;;  %v1304_v18 = vld [vmem:[%s3785_s30 + $0xd0] sm:$0xff] }
 0x2c7   : > { %2102 = vmatmul.f32.vlgmr.msrb.gmra.mxu1 %v3920_v61  ;;  %2227 = vmatpush.msrb.mxu0 %v1512_v16  ;;  %v1705_v61 = vld [vmem:[%s3785_s30 + $0xd58] sm:$0xff] }
 0x2c8   : > { %2246 = vmatpush.msrb.mxu1 %v1784_v17  ;;  %2289 = vmatpush.msrb.mxu3 %v1737_v19  ;;  %v1787_v17 = vld [vmem:[%s3785_s30 + $0xfe8] sm:$0xff]  ;;  %v1576_v19 = vld [vmem:[%s3785_s30 + $0x950] sm:$0xff] }
 0x2c9   : > { %2228 = vmatpush.msrb.mxu0 %v1496_v20  ;;  %2271 = vmatpush.msrb.mxu2 %v1449_v21  ;;  %v1499_v20 = vld [vmem:[%s3785_s30 + $0x6e8] sm:$0xff] }
 0x2ca   : > { %2247 = vmatpush.msrb.mxu1 %v1768_v55  ;;  %2290 = vmatpush.msrb.mxu3 %v1721_v22  ;;  %v4239_v55 = vld [vmem:[%s4419_s0 + $0x8] sm:$0xff]  ;;  %v1288_v22 = vld [vmem:[%s3785_s30 + $0x50] sm:$0xff] }
 0x2cb   : > { %2229 = vmatpush.msrb.mxu0 %v1480_v23  ;;  %2272 = vmatpush.msrb.mxu2 %v1433_v25  ;;  %v1771_v21 = vld [vmem:[%s3785_s30 + $0xf68] sm:$0xff]  ;;  %v1560_v23 = vld [vmem:[%s3785_s30 + $0x8d0] sm:$0xff] }
 0x2cc   : > { %2248 = vmatpush.msrb.mxu1 %v1752_v24  ;;  %2291 = vmatpush.msrb.mxu3 %v1705_v61  ;;  %v1530_v24 = vld [vmem:[%s3785_s30 + $0x7e0] sm:$0xff]  ;;  %v1483_v25 = vld [vmem:[%s3785_s30 + $0x668] sm:$0xff] }
 0x2cd   : > { %2230 = vmatpush.msrb.mxu0 %v1464_v26  ;;  %2273 = vmatpush.msrb.mxu2 %v1417_v28  ;;  %v1755_v61 = vld [vmem:[%s3785_s30 + $0xee8] sm:$0xff]  ;;  %v1544_v26 = vld [vmem:[%s3785_s30 + $0x850] sm:$0xff]  ;;  %v1786_v28 = vld [vmem:[%s3785_s30 + $0xfe0] sm:$0xff] }
 0x2ce   : > { %2249 = vmatpush.msrb.mxu1 %v1736_v27  ;;  %2292 = vmatpush.msrb.mxu3 %v1689_v29  ;;  %v1514_v27 = vld [vmem:[%s3785_s30 + $0x760] sm:$0xff]  ;;  %v1467_v29 = vld [vmem:[%s3785_s30 + $0x5e8] sm:$0xff] }
 0x2cf   : > { %2231 = vmatpush.msrb.mxu0 %v1448_v30  ;;  %2274 = vmatpush.msrb.mxu2 %v1401_v32  ;;  %v1739_v30 = vld [vmem:[%s3785_s30 + $0xe68] sm:$0xff]  ;;  %v1770_v32 = vld [vmem:[%s3785_s30 + $0xf60] sm:$0xff] }
 0x2d0   : > { %2250 = vmatpush.msrb.mxu1 %v1720_v31  ;;  %2293 = vmatpush.msrb.mxu3 %v1673_v33  ;;  %v1498_v31 = vld [vmem:[%s3785_s30 + $0x6e0] sm:$0xff]  ;;  %v1451_v33 = vld [vmem:[%s3785_s30 + $0x568] sm:$0xff] }
 0x2d1   : > { %2232 = vmatpush.msrb.mxu0 %v1432_v34  ;;  %2275 = vmatpush.msrb.mxu2 %v1385_v36  ;;  %v1723_v34 = vld [vmem:[%s3785_s30 + $0xde8] sm:$0xff]  ;;  %v1754_v36 = vld [vmem:[%s3785_s30 + $0xee0] sm:$0xff] }
 0x2d2   : > { %2251 = vmatpush.msrb.mxu1 %v1704_v35  ;;  %2294 = vmatpush.msrb.mxu3 %v1657_v37  ;;  %v1482_v35 = vld [vmem:[%s3785_s30 + $0x660] sm:$0xff]  ;;  %v1435_v37 = vld [vmem:[%s3785_s30 + $0x4e8] sm:$0xff] }
 0x2d3   : > { %2233 = vmatpush.msrb.mxu0 %v1416_v38  ;;  %2276 = vmatpush.msrb.mxu2 %v1369_v40  ;;  %v1707_v38 = vld [vmem:[%s3785_s30 + $0xd68] sm:$0xff]  ;;  %v1738_v40 = vld [vmem:[%s3785_s30 + $0xe60] sm:$0xff] }
 0x2d4   : > { %2252 = vmatpush.msrb.mxu1 %v1688_v39  ;;  %2295 = vmatpush.msrb.mxu3 %v1641_v41  ;;  %v1466_v39 = vld [vmem:[%s3785_s30 + $0x5e0] sm:$0xff]  ;;  %v1419_v41 = vld [vmem:[%s3785_s30 + $0x468] sm:$0xff] }
 0x2d5   : > { %2234 = vmatpush.msrb.mxu0 %v1400_v42  ;;  %2277 = vmatpush.msrb.mxu2 %v1353_v44  ;;  %v1691_v42 = vld [vmem:[%s3785_s30 + $0xce8] sm:$0xff]  ;;  %v1722_v44 = vld [vmem:[%s3785_s30 + $0xde0] sm:$0xff] }
 0x2d6   : > { %2253 = vmatpush.msrb.mxu1 %v1672_v43  ;;  %2296 = vmatpush.msrb.mxu3 %v1625_v45  ;;  %v1450_v43 = vld [vmem:[%s3785_s30 + $0x560] sm:$0xff]  ;;  %v1403_v45 = vld [vmem:[%s3785_s30 + $0x3e8] sm:$0xff] }
 0x2d7   : > { %2235 = vmatpush.msrb.mxu0 %v1384_v46  ;;  %2278 = vmatpush.msrb.mxu2 %v1337_v49  ;;  %v1675_v46 = vld [vmem:[%s3785_s30 + $0xc68] sm:$0xff]  ;;  %v1706_v49 = vld [vmem:[%s3785_s30 + $0xd60] sm:$0xff] }
 0x2d8   : > { %2254 = vmatpush.msrb.mxu1 %v1656_v48  ;;  %2297 = vmatpush.msrb.mxu3 %v1609_v50  ;;  %v1883_v0 = vpop.f32.mrf.mxu2  ;;  %v1434_v48 = vld [vmem:[%s3785_s30 + $0x4e0] sm:$0xff]  ;;  %v1387_v50 = vld [vmem:[%s3785_s30 + $0x368] sm:$0xff] }
 0x2d9   : > { %2236 = vmatpush.msrb.mxu0 %v1368_v51  ;;  %2279 = vmatpush.msrb.mxu2 %v1321_v53  ;;  %v1884_v4 = vadd.f32 %v1883_v0, %v1795_v54  ;;  %v1659_v51 = vld [vmem:[%s3785_s30 + $0xbe8] sm:$0xff]  ;;  %v1690_v53 = vld [vmem:[%s3785_s30 + $0xce0] sm:$0xff] }
 0x2da   : > { %2255 = vmatpush.msrb.mxu1 %v1640_v52  ;;  %2298 = vmatpush.msrb.mxu3 %v1593_v56  ;;  %v1843_v3 = vpop.f32.mrf.mxu0  ;;  %v1903_v9 = vpop.f32.mrf.mxu3  ;;  %v1418_v52 = vld [vmem:[%s3785_s30 + $0x460] sm:$0xff]  ;;  %v1371_v54 = vld [vmem:[%s3785_s30 + $0x2e8] sm:$0xff] }
 0x2db   : > { %2237 = vmatpush.msrb.mxu0 %v1352_v57  ;;  %2280 = vmatpush.msrb.mxu2 %v1305_v60  ;;  %v1844_v6 = vadd.f32 %v1843_v3, %v1794_v58  ;;  %v1904_v13 = vadd.f32 %v1903_v9, %v1884_v4  ;;  %v1643_v56 = vld [vmem:[%s3785_s30 + $0xb68] sm:$0xff]  ;;  %v1402_v57 = vld [vmem:[%s3785_s30 + $0x3e0] sm:$0xff] }
 0x2dc   : > { %2256 = vmatpush.msrb.mxu1 %v1624_v59  ;;  %2299 = vmatpush.msrb.mxu3 %v1577_v62  ;;  %v1863_v12 = vpop.f32.mrf.mxu1  ;;  %v1674_v58 = vld [vmem:[%s3785_s30 + $0xc60] sm:$0xff]  ;;  %v1355_v59 = vld [vmem:[%s3785_s30 + $0x268] sm:$0xff] }
 0x2dd   : > { %2238 = vmatpush.msrb.mxu0 %v1336_v63  ;;  %2281 = vmatpush.msrb.mxu2 %v1289_v2  ;;  %v1864_v16 = vadd.f32 %v1863_v12, %v1844_v6  ;;  %2467 = vst [vmem:[%s4219_s21 + $0x8] sm:$0xff] %v1904_v13  ;;  %v1627_v60 = vld [vmem:[%s3785_s30 + $0xae8] sm:$0xff]  ;;  %v1386_v62 = vld [vmem:[%s3785_s30 + $0x360] sm:$0xff] }
 0x2de   : > { %2257 = vmatpush.msrb.mxu1 %v1608_v1  ;;  %2300 = vmatpush.msrb.mxu3 %v1561_v5  ;;  %v1658_v63 = vld [vmem:[%s3785_s30 + $0xbe0] sm:$0xff]  ;;  %v1339_v0 = vld [vmem:[%s3785_s30 + $0x1e8] sm:$0xff]  ;;  %v1797_v5 = vperm.slane %v4194_v47, 3 }
 0x2df   : > { %2202 = vmatmul.f32.vlgmr.msra.gmra.mxu2 %v4226_v14  ;;  %2239 = vmatpush.msrb.mxu0 %v1320_v8  ;;  %2466 = vst [vmem:[%s4219_s21] sm:$0xff] %v1864_v16  ;;  %v1611_v1 = vld [vmem:[%s3785_s30 + $0xa68] sm:$0xff]  ;;  %v1370_v2 = vld [vmem:[%s3785_s30 + $0x2e0] sm:$0xff]  ;;  %v1796_v8 = vperm.slane %v4194_v47, 2 }
 0x2e0   : > { %2346 = vmatpush.msra.mxu2 %v1531_v7  ;;  %2258 = vmatpush.msrb.mxu1 %v1592_v10  ;;  %v1642_v3 = vld [vmem:[%s3785_s30 + $0xb60] sm:$0xff]  ;;  %v1323_v4 = vld [vmem:[%s3785_s30 + $0x168] sm:$0xff] }
 0x2e1   : > { %2301 = vmatpush.msrb.mxu3 %v1545_v11  ;;  %2240 = vmatpush.msrb.mxu0 %v1304_v18  ;;  %v1595_v6 = vld [vmem:[%s3785_s30 + $0x9e8] sm:$0xff]  ;;  %v1354_v7 = vld [vmem:[%s3785_s30 + $0x260] sm:$0xff] }
 0x2e2   : > { %2222 = vmatmul.f32.vlgmr.msra.gmra.mxu3 %v4239_v55  ;;  %2347 = vmatpush.msra.mxu2 %v1515_v15  ;;  %v1626_v9 = vld [vmem:[%s3785_s30 + $0xae0] sm:$0xff]  ;;  %v1307_v10 = vld [vmem:[%s3785_s30 + $0xe8] sm:$0xff] }
 0x2e3   : > { %2366 = vmatpush.msra.mxu3 %v1787_v17  ;;  %2259 = vmatpush.msrb.mxu1 %v1576_v19  ;;  %v1579_v11 = vld [vmem:[%s3785_s30 + $0x968] sm:$0xff]  ;;  %v1338_v12 = vld [vmem:[%s3785_s30 + $0x1e0] sm:$0xff] }
 0x2e4   : > { %2348 = vmatpush.msra.mxu2 %v1499_v20  ;;  %2241 = vmatpush.msrb.mxu0 %v1288_v22  ;;  %v1610_v15 = vld [vmem:[%s3785_s30 + $0xa60] sm:$0xff]  ;;  %v1291_v16 = vld [vmem:[%s3785_s30 + $0x68] sm:$0xff] }
 0x2e5   : > { %2367 = vmatpush.msra.mxu3 %v1771_v21  ;;  %2260 = vmatpush.msrb.mxu1 %v1560_v23  ;;  %v1563_v19 = vld [vmem:[%s3785_s30 + $0x8e8] sm:$0xff]  ;;  %v1533_v21 = vld [vmem:[%s3785_s30 + $0x7f8] sm:$0xff]  ;;  %v1322_v22 = vld [vmem:[%s3785_s30 + $0x160] sm:$0xff] }
 0x2e6   : > { %2162 = vmatmul.f32.vlgmr.msra.gmra.mxu0 %v4226_v14  ;;  %2349 = vmatpush.msra.mxu2 %v1483_v25  ;;  %v1547_v25 = vld [vmem:[%s3785_s30 + $0x868] sm:$0xff] }
 0x2e7   : > { %2306 = vmatpush.msra.mxu0 %v1530_v24  ;;  %2368 = vmatpush.msra.mxu3 %v1755_v61  ;;  %v1594_v24 = vld [vmem:[%s3785_s30 + $0x9e0] sm:$0xff] }
 0x2e8   : > { %2261 = vmatpush.msrb.mxu1 %v1544_v26  ;;  %2350 = vmatpush.msra.mxu2 %v1467_v29  ;;  %v1789_v29 = vld [vmem:[%s3785_s30 + $0xff8] sm:$0xff] }
 0x2e9   : > { %2182 = vmatmul.f32.vlgmr.msra.gmra.mxu1 %v4239_v55  ;;  %2307 = vmatpush.msra.mxu0 %v1514_v27  ;;  %v1517_v27 = vld [vmem:[%s3785_s30 + $0x778] sm:$0xff] }
 0x2ea   : > { %2326 = vmatpush.msra.mxu1 %v1786_v28  ;;  %2369 = vmatpush.msra.mxu3 %v1739_v30  ;;  %v1306_v30 = vld [vmem:[%s3785_s30 + $0xe0] sm:$0xff] }
 0x2eb   : > { %2308 = vmatpush.msra.mxu0 %v1498_v31  ;;  %2351 = vmatpush.msra.mxu2 %v1451_v33  ;;  %v1578_v31 = vld [vmem:[%s3785_s30 + $0x960] sm:$0xff]  ;;  %v1773_v33 = vld [vmem:[%s3785_s30 + $0xf78] sm:$0xff] }
 0x2ec   : > { %2327 = vmatpush.msra.mxu1 %v1770_v32  ;;  %2370 = vmatpush.msra.mxu3 %v1723_v34  ;;  %v1501_v32 = vld [vmem:[%s3785_s30 + $0x6f8] sm:$0xff]  ;;  %v1290_v34 = vld [vmem:[%s3785_s30 + $0x60] sm:$0xff] }
 0x2ed   : > { %2309 = vmatpush.msra.mxu0 %v1482_v35  ;;  %2352 = vmatpush.msra.mxu2 %v1435_v37  ;;  %v1562_v35 = vld [vmem:[%s3785_s30 + $0x8e0] sm:$0xff]  ;;  %v1485_v37 = vld [vmem:[%s3785_s30 + $0x678] sm:$0xff] }
 0x2ee   : > { %2328 = vmatpush.msra.mxu1 %v1754_v36  ;;  %2371 = vmatpush.msra.mxu3 %v1707_v38  ;;  %v1532_v36 = vld [vmem:[%s3785_s30 + $0x7f0] sm:$0xff]  ;;  %v1757_v38 = vld [vmem:[%s3785_s30 + $0xef8] sm:$0xff] }
 0x2ef   : > { %2310 = vmatpush.msra.mxu0 %v1466_v39  ;;  %2353 = vmatpush.msra.mxu2 %v1419_v41  ;;  %v1546_v39 = vld [vmem:[%s3785_s30 + $0x860] sm:$0xff]  ;;  %v1788_v41 = vld [vmem:[%s3785_s30 + $0xff0] sm:$0xff] }
 0x2f0   : > { %2329 = vmatpush.msra.mxu1 %v1738_v40  ;;  %2372 = vmatpush.msra.mxu3 %v1691_v42  ;;  %v1516_v40 = vld [vmem:[%s3785_s30 + $0x770] sm:$0xff]  ;;  %v1469_v42 = vld [vmem:[%s3785_s30 + $0x5f8] sm:$0xff] }
 0x2f1   : > { %2311 = vmatpush.msra.mxu0 %v1450_v43  ;;  %2354 = vmatpush.msra.mxu2 %v1403_v45  ;;  %v1741_v43 = vld [vmem:[%s3785_s30 + $0xe78] sm:$0xff]  ;;  %v1772_v45 = vld [vmem:[%s3785_s30 + $0xf70] sm:$0xff] }
 0x2f2   : > { %2330 = vmatpush.msra.mxu1 %v1722_v44  ;;  %2373 = vmatpush.msra.mxu3 %v1675_v46  ;;  %v1500_v44 = vld [vmem:[%s3785_s30 + $0x6f0] sm:$0xff]  ;;  %v1453_v46 = vld [vmem:[%s3785_s30 + $0x578] sm:$0xff] }
 0x2f3   : > { %2312 = vmatpush.msra.mxu0 %v1434_v48  ;;  %2355 = vmatpush.msra.mxu2 %v1387_v50  ;;  %v1725_v48 = vld [vmem:[%s3785_s30 + $0xdf8] sm:$0xff]  ;;  %v1756_v50 = vld [vmem:[%s3785_s30 + $0xef0] sm:$0xff] }
 0x2f4   : > { %2331 = vmatpush.msra.mxu1 %v1706_v49  ;;  %2374 = vmatpush.msra.mxu3 %v1659_v51  ;;  %v1484_v49 = vld [vmem:[%s3785_s30 + $0x670] sm:$0xff]  ;;  %v1437_v51 = vld [vmem:[%s3785_s30 + $0x4f8] sm:$0xff] }
 0x2f5   : > { %2313 = vmatpush.msra.mxu0 %v1418_v52  ;;  %2356 = vmatpush.msra.mxu2 %v1371_v54  ;;  %v1709_v52 = vld [vmem:[%s3785_s30 + $0xd78] sm:$0xff]  ;;  %v1740_v54 = vld [vmem:[%s3785_s30 + $0xe70] sm:$0xff] }
 0x2f6   : > { %2332 = vmatpush.msra.mxu1 %v1690_v53  ;;  %2375 = vmatpush.msra.mxu3 %v1643_v56  ;;  %v1468_v53 = vld [vmem:[%s3785_s30 + $0x5f0] sm:$0xff]  ;;  %v1421_v56 = vld [vmem:[%s3785_s30 + $0x478] sm:$0xff] }
 0x2f7   : > { %2314 = vmatpush.msra.mxu0 %v1402_v57  ;;  %2357 = vmatpush.msra.mxu2 %v1355_v59  ;;  %v1693_v57 = vld [vmem:[%s3785_s30 + $0xcf8] sm:$0xff]  ;;  %v1724_v59 = vld [vmem:[%s3785_s30 + $0xdf0] sm:$0xff] }
 0x2f8   : > { %2333 = vmatpush.msra.mxu1 %v1674_v58  ;;  %2376 = vmatpush.msra.mxu3 %v1627_v60  ;;  %v1452_v58 = vld [vmem:[%s3785_s30 + $0x570] sm:$0xff]  ;;  %v1405_v60 = vld [vmem:[%s3785_s30 + $0x3f8] sm:$0xff] }
 0x2f9   : > { %2315 = vmatpush.msra.mxu0 %v1386_v62  ;;  %2358 = vmatpush.msra.mxu2 %v1339_v0  ;;  %v1677_v62 = vld [vmem:[%s3785_s30 + $0xc78] sm:$0xff]  ;;  %v1708_v0 = vld [vmem:[%s3785_s30 + $0xd70] sm:$0xff] }
 0x2fa   : > { %2334 = vmatpush.msra.mxu1 %v1658_v63  ;;  %2377 = vmatpush.msra.mxu3 %v1611_v1  ;;  %v1436_v63 = vld [vmem:[%s3785_s30 + $0x4f0] sm:$0xff]  ;;  %v1389_v1 = vld [vmem:[%s3785_s30 + $0x378] sm:$0xff] }
 0x2fb   : > { %2316 = vmatpush.msra.mxu0 %v1370_v2  ;;  %2359 = vmatpush.msra.mxu2 %v1323_v4  ;;  %v1661_v2 = vld [vmem:[%s3785_s30 + $0xbf8] sm:$0xff]  ;;  %v1692_v4 = vld [vmem:[%s3785_s30 + $0xcf0] sm:$0xff] }
 0x2fc   : > { %2335 = vmatpush.msra.mxu1 %v1642_v3  ;;  %v1963_v13 = vpop.f32.mrf.mxu2  ;;  %2378 = vmatpush.msra.mxu3 %v1595_v6  ;;  %v1420_v3 = vld [vmem:[%s3785_s30 + $0x470] sm:$0xff]  ;;  %v1645_v6 = vld [vmem:[%s3785_s30 + $0xb78] sm:$0xff] }
 0x2fd   : > { %2317 = vmatpush.msra.mxu0 %v1354_v7  ;;  %v1923_v17 = vpop.f32.mrf.mxu0  ;;  %v1964_v18 = vadd.f32 %v1963_v13, %v1797_v5  ;;  %2360 = vmatpush.msra.mxu2 %v1307_v10  ;;  %v1373_v5 = vld [vmem:[%s3785_s30 + $0x2f8] sm:$0xff]  ;;  %v1404_v7 = vld [vmem:[%s3785_s30 + $0x3f0] sm:$0xff] }
 0x2fe   : > { %2336 = vmatpush.msra.mxu1 %v1626_v9  ;;  %v1924_v20 = vadd.f32 %v1923_v17, %v1796_v8  ;;  %2379 = vmatpush.msra.mxu3 %v1579_v11  ;;  %v1676_v8 = vld [vmem:[%s3785_s30 + $0xc70] sm:$0xff]  ;;  %v1357_v9 = vld [vmem:[%s3785_s30 + $0x278] sm:$0xff]  ;;  %v1799_v17 = vperm.slane %v4194_v47, 5 }
 0x2ff   : > { %2318 = vmatpush.msra.mxu0 %v1338_v12  ;;  %v1983_v23 = vpop.f32.mrf.mxu3  ;;  %2361 = vmatpush.msra.mxu2 %v1291_v16  ;;  %v1629_v10 = vld [vmem:[%s3785_s30 + $0xaf8] sm:$0xff]  ;;  %v1388_v11 = vld [vmem:[%s3785_s30 + $0x370] sm:$0xff] }
 0x300   : > { %2337 = vmatpush.msra.mxu1 %v1610_v15  ;;  %v1943_v61 = vpop.f32.mrf.mxu1  ;;  %v1984_v26 = vadd.f32 %v1983_v23, %v1964_v18  ;;  %2380 = vmatpush.msra.mxu3 %v1563_v19  ;;  %v1660_v12 = vld [vmem:[%s3785_s30 + $0xbf0] sm:$0xff]  ;;  %v1341_v13 = vld [vmem:[%s3785_s30 + $0x1f8] sm:$0xff] }
 0x301   : > { %2282 = vmatmul.f32.vlgmr.msrb.gmra.mxu2 %v4226_v14  ;;  %v1944_v28 = vadd.f32 %v1943_v61, %v1924_v20  ;;  %2319 = vmatpush.msra.mxu0 %v1322_v22  ;;  %v1613_v15 = vld [vmem:[%s3785_s30 + $0xa78] sm:$0xff]  ;;  %v1372_v16 = vld [vmem:[%s3785_s30 + $0x2f0] sm:$0xff]  ;;  %v1798_v20 = vperm.slane %v4194_v47, 4 }
 0x302   : > { %2426 = vmatpush.msrb.mxu2 %v1533_v21  ;;  %2469 = vst [vmem:[%s4219_s21 + $0x18] sm:$0xff] %v1984_v26  ;;  %2338 = vmatpush.msra.mxu1 %v1594_v24  ;;  %v1644_v18 = vld [vmem:[%s3785_s30 + $0xb70] sm:$0xff]  ;;  %v1325_v19 = vld [vmem:[%s3785_s30 + $0x178] sm:$0xff] }
 0x303   : > { %2381 = vmatpush.msra.mxu3 %v1547_v25  ;;  %2468 = vst [vmem:[%s4219_s21 + $0x10] sm:$0xff] %v1944_v28  ;;  %2320 = vmatpush.msra.mxu0 %v1306_v30  ;;  %v1597_v21 = vld [vmem:[%s3785_s30 + $0x9f8] sm:$0xff]  ;;  %v1356_v22 = vld [vmem:[%s3785_s30 + $0x270] sm:$0xff] }
 0x304   : > { %2302 = vmatmul.f32.vlgmr.msrb.gmra.mxu3 %v4239_v55  ;;  %2427 = vmatpush.msrb.mxu2 %v1517_v27  ;;  %v1628_v23 = vld [vmem:[%s3785_s30 + $0xaf0] sm:$0xff]  ;;  %v1309_v24 = vld [vmem:[%s3785_s30 + $0xf8] sm:$0xff] }
 0x305   : > { %2446 = vmatpush.msrb.mxu3 %v1789_v29  ;;  %2339 = vmatpush.msra.mxu1 %v1578_v31  ;;  %v1581_v61 = vld [vmem:[%s3785_s30 + $0x978] sm:$0xff]  ;;  %v1340_v28 = vld [vmem:[%s3785_s30 + $0x1f0] sm:$0xff] }
 0x306   : > { %2428 = vmatpush.msrb.mxu2 %v1501_v32  ;;  %2321 = vmatpush.msra.mxu0 %v1290_v34  ;;  %v1612_v29 = vld [vmem:[%s3785_s30 + $0xa70] sm:$0xff]  ;;  %v1293_v31 = vld [vmem:[%s3785_s30 + $0x78] sm:$0xff] }
 0x307   : > { %2447 = vmatpush.msrb.mxu3 %v1773_v33  ;;  %2340 = vmatpush.msra.mxu1 %v1562_v35  ;;  %v1565_v32 = vld [vmem:[%s3785_s30 + $0x8f8] sm:$0xff] }
 0x308   : > { %2242 = vmatmul.f32.vlgmr.msrb.gmra.mxu0 %v4226_v14  ;;  %2429 = vmatpush.msrb.mxu2 %v1485_v37  ;;  %v1596_v37 = vld [vmem:[%s3785_s30 + $0x9f0] sm:$0xff] }
 0x309   : > { %2386 = vmatpush.msrb.mxu0 %v1532_v36  ;;  %2448 = vmatpush.msrb.mxu3 %v1757_v38  ;;  %v1324_v36 = vld [vmem:[%s3785_s30 + $0x170] sm:$0xff] }
 0x30a   : > { %2341 = vmatpush.msra.mxu1 %v1546_v39  ;;  %2430 = vmatpush.msrb.mxu2 %v1469_v42  ;;  %v1549_v39 = vld [vmem:[%s3785_s30 + $0x878] sm:$0xff]  ;;  %v1292_v42 = vld [vmem:[%s3785_s30 + $0x70] sm:$0xff] }
 0x30b   : > { %2262 = vmatmul.f32.vlgmr.msrb.gmra.mxu1 %v4239_v55  ;;  %2387 = vmatpush.msrb.mxu0 %v1516_v40  ;;  %v1308_v40 = vld [vmem:[%s3785_s30 + $0xf0] sm:$0xff] }
 0x30c   : > { %2406 = vmatpush.msrb.mxu1 %v1788_v41  ;;  %2449 = vmatpush.msrb.mxu3 %v1741_v43  ;;  %v1580_v41 = vld [vmem:[%s3785_s30 + $0x970] sm:$0xff] }
 0x30d   : > { %2388 = vmatpush.msrb.mxu0 %v1500_v44  ;;  %2431 = vmatpush.msrb.mxu2 %v1453_v46  ;;  %v1564_v43 = vld [vmem:[%s3785_s30 + $0x8f0] sm:$0xff]  ;;  %v1800_v46 = vperm.slane %v4194_v47, 6 }
 0x30e   : > { %2407 = vmatpush.msrb.mxu1 %v1772_v45  ;;  %2450 = vmatpush.msrb.mxu3 %v1725_v48  ;;  %v1548_v44 = vld [vmem:[%s3785_s30 + $0x870] sm:$0xff]  ;;  %v1801_v45 = vperm.slane %v4194_v47, 7 }
 0x30f   : > { %2389 = vmatpush.msrb.mxu0 %v1484_v49  ;;  %2432 = vmatpush.msrb.mxu2 %v1437_v51 }
 0x310   : > { %2408 = vmatpush.msrb.mxu1 %v1756_v50  ;;  %2451 = vmatpush.msrb.mxu3 %v1709_v52 }
 0x311   : > { %2390 = vmatpush.msrb.mxu0 %v1468_v53  ;;  %2433 = vmatpush.msrb.mxu2 %v1421_v56 }
 0x312   : > { %2409 = vmatpush.msrb.mxu1 %v1740_v54  ;;  %2452 = vmatpush.msrb.mxu3 %v1693_v57 }
 0x313   : > { %2391 = vmatpush.msrb.mxu0 %v1452_v58  ;;  %2434 = vmatpush.msrb.mxu2 %v1405_v60 }
 0x314   : > { %2410 = vmatpush.msrb.mxu1 %v1724_v59  ;;  %2453 = vmatpush.msrb.mxu3 %v1677_v62 }
 0x315   : > { %2392 = vmatpush.msrb.mxu0 %v1436_v63  ;;  %2435 = vmatpush.msrb.mxu2 %v1389_v1 }
 0x316   : > { %2411 = vmatpush.msrb.mxu1 %v1708_v0  ;;  %2454 = vmatpush.msrb.mxu3 %v1661_v2 }
 0x317   : > { %2393 = vmatpush.msrb.mxu0 %v1420_v3  ;;  %2436 = vmatpush.msrb.mxu2 %v1373_v5 }
 0x318   : > { %2412 = vmatpush.msrb.mxu1 %v1692_v4  ;;  %2455 = vmatpush.msrb.mxu3 %v1645_v6 }
 0x319   : > { %2394 = vmatpush.msrb.mxu0 %v1404_v7  ;;  %2437 = vmatpush.msrb.mxu2 %v1357_v9 }
 0x31a   : > { %2413 = vmatpush.msrb.mxu1 %v1676_v8  ;;  %2456 = vmatpush.msrb.mxu3 %v1629_v10 }
 0x31b   : > { %2362 = vmatmul.f32.vlgmr.msra.gmra.mxu2 %v4226_v14  ;;  %2395 = vmatpush.msrb.mxu0 %v1388_v11 }
 0x31c   : > { %2414 = vmatpush.msrb.mxu1 %v1660_v12  ;;  %2438 = vmatpush.msrb.mxu2 %v1341_v13 }
 0x31d   : > { %2457 = vmatpush.msrb.mxu3 %v1613_v15  ;;  %2396 = vmatpush.msrb.mxu0 %v1372_v16 }
 0x31e   : > { %2382 = vmatmul.f32.vlgmr.msra.gmra.mxu3 %v4239_v55  ;;  %v2043_v25 = vpop.f32.mrf.mxu2  ;;  %2415 = vmatpush.msrb.mxu1 %v1644_v18 }
 0x31f   : > { %2439 = vmatpush.msrb.mxu2 %v1325_v19  ;;  %v2003_v26 = vpop.f32.mrf.mxu0  ;;  %v2044_v27 = vadd.f32 %v2043_v25, %v1799_v17  ;;  %2458 = vmatpush.msrb.mxu3 %v1597_v21 }
 0x320   : > { %2397 = vmatpush.msrb.mxu0 %v1356_v22  ;;  %v2004_v30 = vadd.f32 %v2003_v26, %v1798_v20  ;;  %2416 = vmatpush.msrb.mxu1 %v1628_v23 }
 0x321   : > { %2440 = vmatpush.msrb.mxu2 %v1309_v24  ;;  %v2063_v33 = vpop.f32.mrf.mxu3  ;;  %2459 = vmatpush.msrb.mxu3 %v1581_v61 }
 0x322   : > { %2322 = vmatmul.f32.vlgmr.msra.gmra.mxu0 %v4226_v14  ;;  %v2023_v34 = vpop.f32.mrf.mxu1  ;;  %v2064_v35 = vadd.f32 %v2063_v33, %v2044_v27  ;;  %2417 = vmatpush.msrb.mxu1 %v1612_v29 }
 0x323   : > { %2398 = vmatpush.msrb.mxu0 %v1340_v28  ;;  %v2024_v38 = vadd.f32 %v2023_v34, %v2004_v30  ;;  %2441 = vmatpush.msrb.mxu2 %v1293_v31 }
 0x324   : > { %2460 = vmatpush.msrb.mxu3 %v1565_v32  ;;  %2471 = vst [vmem:[%s4219_s21 + $0x28] sm:$0xff] %v2064_v35  ;;  %2342 = vmatmul.f32.vlgmr.msra.gmra.mxu1 %v4239_v55 }
 0x325   : > { %2442 = vmatmul.f32.vlgmr.msrb.gmra.mxu2 %v4226_v14  ;;  %2470 = vst [vmem:[%s4219_s21 + $0x20] sm:$0xff] %v2024_v38  ;;  %2399 = vmatpush.msrb.mxu0 %v1324_v36 }
 0x326   : > { %2418 = vmatpush.msrb.mxu1 %v1596_v37  ;;  %2461 = vmatpush.msrb.mxu3 %v1549_v39 }
 0x327   : > { %2462 = vmatmul.f32.vlgmr.msrb.gmra.mxu3 %v4239_v55  ;;  %2400 = vmatpush.msrb.mxu0 %v1308_v40 }
 0x328   : > { %2419 = vmatpush.msrb.mxu1 %v1580_v41 }
 0x329   : > { %2401 = vmatpush.msrb.mxu0 %v1292_v42 }
 0x32a   : > { %2420 = vmatpush.msrb.mxu1 %v1564_v43  ;;  %2402 = vmatmul.f32.vlgmr.msrb.gmra.mxu0 %v4226_v14  ;;  %v1791_v14 = vld [vmem:[%s4185_s12 + $0x8] sm:$0xff] }
 0x32b   : > { %v1803_v57 = vperm.slane %v1791_v14, 1  ;;  %v1802_v58 = vperm.slane %v1791_v14, 0  ;;  %v1805_v2 = vperm.slane %v1791_v14, 3  ;;  %v1804_v3 = vperm.slane %v1791_v14, 2 }
 0x32c   : > { %2421 = vmatpush.msrb.mxu1 %v1548_v44  ;;  %v1807_v12 = vperm.slane %v1791_v14, 5  ;;  %v1806_v13 = vperm.slane %v1791_v14, 4  ;;  %v1808_v23 = vperm.slane %v1791_v14, 6  ;;  %v1809_v24 = vperm.slane %v1791_v14, 7 }
 0x32d   : > { %2422 = vmatmul.f32.vlgmr.msrb.gmra.mxu1 %v4239_v55 }
 0x340   : > { %v2123_v48 = vpop.f32.mrf.mxu2 }
 0x341   : > { %v2083_v49 = vpop.f32.mrf.mxu0  ;;  %v2124_v50 = vadd.f32 %v2123_v48, %v1801_v45 }
 0x342   : > { %v2084_v51 = vadd.f32 %v2083_v49, %v1800_v46 }
 0x343   : > { %v2143_v52 = vpop.f32.mrf.mxu3 }
 0x344   : > { %v2103_v53 = vpop.f32.mrf.mxu1  ;;  %v2144_v54 = vadd.f32 %v2143_v52, %v2124_v50 }
 0x345   : > { %v2104_v56 = vadd.f32 %v2103_v53, %v2084_v51 }
 0x346   : > { %2473 = vst [vmem:[%s4219_s21 + $0x38] sm:$0xff] %v2144_v54 }
 0x347   : > { %2472 = vst [vmem:[%s4219_s21 + $0x30] sm:$0xff] %v2104_v56 }
 0x362   : > { %v2203_v55 = vpop.f32.mrf.mxu2 }
 0x363   : > { %v2163_v59 = vpop.f32.mrf.mxu0  ;;  %v2204_v60 = vadd.f32 %v2203_v55, %v1803_v57 }
 0x364   : > { %v2164_v62 = vadd.f32 %v2163_v59, %v1802_v58 }
 0x365   : > { %v2223_v47 = vpop.f32.mrf.mxu3 }
 0x366   : > { %v2183_v63 = vpop.f32.mrf.mxu1  ;;  %v2224_v0 = vadd.f32 %v2223_v47, %v2204_v60 }
 0x367   : > { %v2184_v1 = vadd.f32 %v2183_v63, %v2164_v62 }
 0x368   : > { %2475 = vst [vmem:[%s4219_s21 + $0x48] sm:$0xff] %v2224_v0 }
 0x369   : > { %2474 = vst [vmem:[%s4219_s21 + $0x40] sm:$0xff] %v2184_v1 }
 0x384   : > { %v2283_v4 = vpop.f32.mrf.mxu2 }
 0x385   : > { %v2243_v5 = vpop.f32.mrf.mxu0  ;;  %v2284_v6 = vadd.f32 %v2283_v4, %v1805_v2 }
 0x386   : > { %v2244_v7 = vadd.f32 %v2243_v5, %v1804_v3 }
 0x387   : > { %v2303_v8 = vpop.f32.mrf.mxu3 }
 0x388   : > { %v2263_v9 = vpop.f32.mrf.mxu1  ;;  %v2304_v10 = vadd.f32 %v2303_v8, %v2284_v6 }
 0x389   : > { %v2264_v11 = vadd.f32 %v2263_v9, %v2244_v7 }
 0x38a   : > { %2477 = vst [vmem:[%s4219_s21 + $0x58] sm:$0xff] %v2304_v10 }
 0x38b   : > { %2476 = vst [vmem:[%s4219_s21 + $0x50] sm:$0xff] %v2264_v11 }
 0x39e   : > { %v2363_v15 = vpop.f32.mrf.mxu2 }
 0x39f   : > { %v2323_v16 = vpop.f32.mrf.mxu0  ;;  %v2364_v17 = vadd.f32 %v2363_v15, %v1807_v12 }
 0x3a0   : > { %v2324_v18 = vadd.f32 %v2323_v16, %v1806_v13 }
 0x3a1   : > { %v2383_v19 = vpop.f32.mrf.mxu3  ;;  %v2343_v20 = vpop.f32.mrf.mxu1 }
 0x3a2   : > { %v2384_v21 = vadd.f32 %v2383_v19, %v2364_v17  ;;  %v2344_v22 = vadd.f32 %v2343_v20, %v2324_v18 }
 0x3a4   : > { %2479 = vst [vmem:[%s4219_s21 + $0x68] sm:$0xff] %v2384_v21 }
 0x3a5   : > { %2478 = vst [vmem:[%s4219_s21 + $0x60] sm:$0xff] %v2344_v22 }
 0x3a7   : > { %v2403_v25 = vpop.f32.mrf.mxu0 }
 0x3a8   : > { %v2443_v61 = vpop.f32.mrf.mxu2  ;;  %v2404_v26 = vadd.f32 %v2403_v25, %v1808_v23 }
 0x3a9   : > { %v2444_v27 = vadd.f32 %v2443_v61, %v1809_v24 }
 0x3aa   : > { %v2423_v28 = vpop.f32.mrf.mxu1  ;;  %v2463_v29 = vpop.f32.mrf.mxu3 }
 0x3ab   : > { %v2424_v30 = vadd.f32 %v2423_v28, %v2404_v26  ;;  %v2464_v31 = vadd.f32 %v2463_v29, %v2444_v27 }
 0x3ad   : > { %2480 = vst [vmem:[%s4219_s21 + $0x70] sm:$0xff] %v2424_v30 }
 0x3ae   : > { %2481 = vst [vmem:[%s4219_s21 + $0x78] sm:$0xff] %v2464_v31 }
 0x3af PF: > { %s13_s16 = sadd.s32 1, %s2689_s16   ;;  %s4424_s12 = smov %s2677_s13 }
 0x3b0   : > { %p10_p10 = scmp.ge.s32.totalorder %s13_s16, 10   ;;  %s4425_s13 = smov %s2746_s20 }
 0x3b1   : > { %s4426_s14 = smov %s2685_s15  ;;  %s4427_s15 = smov %s4429_s17 }
 0x3b2   :  { %12 = sbr.rel (!%p10_p10) target bundleno = 3 (0x3), region = 96 }

</bundles_post_ra>
